<compile_context>
chip_gen: v6e
topology: v6e:2x2x1
jax: 0.10.0
libtpu: 0.0.40
codegen_flags: <defaults>
</compile_context>

<pallas_src>
import jax
import jax.numpy as jnp
from jax.experimental import pallas as pl
from jax.experimental.pallas import tpu as pltpu


def _shift_w(t, dx, w_iota):
    """Shift an (R, W, C) f32 tile along W by (dx - 1) with zero fill (SAME pad)."""
    W = t.shape[1]
    if dx == 1:
        return t
    if dx == 0:
        # out[:, w] = t[:, w-1]; zero at w == 0
        r = pltpu.roll(t, shift=1, axis=1)
        return jnp.where(w_iota == 0, 0.0, r)
    # dx == 2: out[:, w] = t[:, w+1]; zero at w == W-1
    r = pltpu.roll(t, shift=W - 1, axis=1)
    return jnp.where(w_iota == W - 1, 0.0, r)


def _im2col_3x3(a_f32, out_rows, compute_dtype):
    """a_f32: (out_rows + 2, W, C) f32, H-halo included.

    Returns the (out_rows * W, 9 * C) im2col patch in `compute_dtype`, with tap
    order (dy, dx, cin) matching the (9*Cin, Cout) weight layout built in the
    wrapper.
    """
    _, W, C = a_f32.shape
    w_iota = jax.lax.broadcasted_iota(jnp.int32, (out_rows, W, C), 1)
    taps = []
    for dy in range(3):
        rows = a_f32[dy:dy + out_rows]              # leading-dim slice (no relayout)
        for dx in range(3):
            taps.append(_shift_w(rows, dx, w_iota).astype(compute_dtype))
    patch = jnp.concatenate(taps, axis=-1)           # (out_rows, W, 9*C), lane-aligned
    return patch.reshape(out_rows * W, 9 * C)


def _residual_block_kernel(x_ref, top_ref, bot_ref, w1_ref, w2_ref, out_ref):
    """Refs (per grid step (n, hb)):

    x_ref   : (1, TH, W, C)  bf16  this H-block of the NHWC input
    top_ref : (1, 2,  W, C)  bf16  two rows just above the block (clamped at edges)
    bot_ref : (1, 2,  W, C)  bf16  two rows just below the block (clamped at edges)
    w1_ref  : (9*C, C)       bf16  conv1 weights, im2col layout
    w2_ref  : (9*C, C)       bf16  conv2 weights, im2col layout
    out_ref : (1, TH, W, C)  f32
    """
    hb = pl.program_id(1)
    n_hb = pl.num_programs(1)
    _, TH, W, C = x_ref.shape
    cdt = x_ref.dtype                                # bf16 compute dtype for the MXU

    xin = x_ref[0].astype(jnp.float32)               # (TH, W, C)
    top = top_ref[0].astype(jnp.float32)             # (2, W, C)
    bot = bot_ref[0].astype(jnp.float32)             # (2, W, C)

    # Halo rows that fall outside the image contribute zero (SAME padding of conv1).
    top = jnp.where(hb == 0, 0.0, top)
    bot = jnp.where(hb == n_hb - 1, 0.0, bot)
    xh = jnp.concatenate([top, xin, bot], axis=0)    # (TH+4, W, C)

    # ---- conv1: one fused im2col matmul over TH+2 rows (1-row halo for conv2) ----
    p1 = _im2col_3x3(xh, TH + 2, cdt)                                # ((TH+2)*W, 9C)
    mid = jnp.dot(p1, w1_ref[...], preferred_element_type=jnp.float32)
    mid = jnp.maximum(mid, 0.0).reshape(TH + 2, W, C)                # ReLU in f32

    # conv2's SAME padding: relu(conv1) rows outside the image are zero.
    r_iota = jax.lax.broadcasted_iota(jnp.int32, (TH + 2, W, C), 0)
    mid = jnp.where((hb == 0) & (r_iota == 0), 0.0, mid)
    mid = jnp.where((hb == n_hb - 1) & (r_iota == TH + 1), 0.0, mid)

    # ---- conv2: one fused im2col matmul over the TH output rows ----
    p2 = _im2col_3x3(mid, TH, cdt)                                   # (TH*W, 9C)
    y = jnp.dot(p2, w2_ref[...], preferred_element_type=jnp.float32)

    # ---- residual add (f32) ----
    out = y.reshape(TH, W, C) + xin
    out_ref[...] = out.reshape(out_ref.shape)


def residual_block_pallas(x_nchw, w1_oihw, w2_oihw, *, block_h=8):
    """x_nchw: (N, Cin, H, W) float32; weights in PyTorch OIHW layout (bias=False)."""
    N, Cin, H, W = x_nchw.shape
    Cout = w2_oihw.shape[0]
    assert w1_oihw.shape == (Cin, Cin, 3, 3)
    assert w2_oihw.shape == (Cout, Cin, 3, 3)
    assert Cout == Cin, "residual add requires output_channel == input_channel"
    block_h = min(block_h, H)
    assert H % block_h == 0 and block_h % 2 == 0, "need H % block_h == 0, block_h even"

    # NCHW -> NHWC in bf16 storage (halves HBM traffic; MXU runs bf16 natively).
    x = jnp.transpose(x_nchw, (0, 2, 3, 1)).astype(jnp.bfloat16)
    # OIHW -> HWIO -> (9*Cin, Cout): row = (ky*3 + kx)*Cin + cin, matching the
    # im2col tap order used in the kernel.
    w1 = jnp.transpose(w1_oihw, (2, 3, 1, 0)).reshape(9 * Cin, Cin).astype(jnp.bfloat16)
    w2 = jnp.transpose(w2_oihw, (2, 3, 1, 0)).reshape(9 * Cin, Cout).astype(jnp.bfloat16)

    n_hb = H // block_h
    hb2 = block_h // 2         # halo blocks are 2 rows tall -> H block granularity 2

    x_spec = pl.BlockSpec((1, block_h, W, Cin), lambda n, hb: (n, hb, 0, 0))
    top_spec = pl.BlockSpec(
        (1, 2, W, Cin), lambda n, hb: (n, jnp.maximum(hb * hb2 - 1, 0), 0, 0))
    bot_spec = pl.BlockSpec(
        (1, 2, W, Cin),
        lambda n, hb: (n, jnp.minimum(hb * hb2 + hb2, H // 2 - 1), 0, 0))
    w1_spec = pl.BlockSpec((9 * Cin, Cin), lambda n, hb: (0, 0))
    w2_spec = pl.BlockSpec((9 * Cin, Cout), lambda n, hb: (0, 0))
    out_spec = pl.BlockSpec((1, block_h, W, Cout), lambda n, hb: (n, hb, 0, 0))

    flops = 2 * 2 * 9 * N * H * W * Cin * Cout
    bytes_accessed = (N * H * W * Cin * 2            # input (bf16), read ~once
                      + 2 * 9 * Cin * Cout * 2       # both weight tensors (bf16)
                      + N * H * W * Cout * 4)        # output (f32)

    out_nhwc = pl.pallas_call(
        _residual_block_kernel,
        out_shape=jax.ShapeDtypeStruct((N, H, W, Cout), jnp.float32),
        grid=(N, n_hb),
        in_specs=[x_spec, top_spec, bot_spec, w1_spec, w2_spec],
        out_specs=out_spec,
        compiler_params=pltpu.CompilerParams(
            dimension_semantics=("parallel", "parallel")),
        cost_estimate=pl.CostEstimate(
            flops=flops, transcendentals=0, bytes_accessed=bytes_accessed),
    )(x, x, x, w1, w2)

    # Back to NCHW to match the PyTorch module's convention.
    return jnp.transpose(out_nhwc, (0, 3, 1, 2))


def _reference(x_nchw, w1_oihw, w2_oihw):
    """Pure-JAX reference matching the kernel's bf16-input / f32-accumulate numerics."""
    dn = ('NCHW', 'OIHW', 'NCHW')
    xb = x_nchw.astype(jnp.bfloat16)
    w1b = w1_oihw.astype(jnp.bfloat16)
    w2b = w2_oihw.astype(jnp.bfloat16)
    c1 = jax.lax.conv_general_dilated(xb, w1b, (1, 1), 'SAME', dimension_numbers=dn,
                                      preferred_element_type=jnp.float32)
    c1 = jnp.maximum(c1, 0.0).astype(jnp.bfloat16)   # kernel feeds conv2 in bf16
    c2 = jax.lax.conv_general_dilated(c1, w2b, (1, 1), 'SAME', dimension_numbers=dn,
                                      preferred_element_type=jnp.float32)
    return c2 + xb.astype(jnp.float32)


if __name__ == "__main__":
    key = jax.random.PRNGKey(0)
    k_x, k_w1, k_w2 = jax.random.split(key, 3)

    # Small shapes consistent with the module (input_channel == output_channel).
    # C=128 keeps the channel/lane dim dense (module default is 256).
    N, C, H, W = 2, 128, 16, 16

    x = jax.random.normal(k_x, (N, C, H, W), dtype=jnp.float32)
    # PyTorch Conv2d weight layout: (out_ch, in_ch, kH, kW), bias=False.
    w1 = 0.05 * jax.random.normal(k_w1, (C, C, 3, 3), dtype=jnp.float32)
    w2 = 0.05 * jax.random.normal(k_w2, (C, C, 3, 3), dtype=jnp.float32)

    out = jax.block_until_ready(residual_block_pallas(x, w1, w2, block_h=8))
    ref = jax.block_until_ready(_reference(x, w1, w2))

    assert out.shape == ref.shape == (N, C, H, W)
    err = float(jnp.max(jnp.abs(out - ref)))
    assert err < 2e-2, f"max abs err {err}"
    print("KERNEL_OK")
</pallas_src>

<mosaic_0001>
module attributes {stable_mosaic.version = 11 : i64} {
  func.func @_residual_block_kernel(%arg0: i32, %arg1: i32, %arg2: memref<1x8x16x128xbf16, #tpu.memory_space<vmem>>, %arg3: memref<1x2x16x128xbf16, #tpu.memory_space<vmem>>, %arg4: memref<1x2x16x128xbf16, #tpu.memory_space<vmem>>, %arg5: memref<1152x128xbf16, #tpu.memory_space<vmem>>, %arg6: memref<1152x128xbf16, #tpu.memory_space<vmem>>, %arg7: memref<1x8x16x128xf32, #tpu.memory_space<vmem>>) attributes {dimension_semantics = [#tpu.dimension_semantics<parallel>, #tpu.dimension_semantics<parallel>], iteration_bounds = array<i64: 2, 2>, scalar_prefetch = 0 : i64, scratch_operands = 0 : i64, tpu.core_type = #tpu.core_type<tc>, window_params = [{transform_indices = @transform_0, window_bounds = array<i64: 1, 8, 16, 128>}, {transform_indices = @transform_1, window_bounds = array<i64: 1, 2, 16, 128>}, {transform_indices = @transform_2, window_bounds = array<i64: 1, 2, 16, 128>}, {pipeline_mode = #tpu.pipeline_mode<synchronous>, transform_indices = @transform_3, window_bounds = array<i64: 1152, 128>}, {pipeline_mode = #tpu.pipeline_mode<synchronous>, transform_indices = @transform_4, window_bounds = array<i64: 1152, 128>}, {transform_indices = @transform_5, window_bounds = array<i64: 1, 8, 16, 128>}]} {
    %c0 = arith.constant 0 : index
    %c0_0 = arith.constant 0 : index
    %c0_1 = arith.constant 0 : index
    %c0_2 = arith.constant 0 : index
    %0 = vector.load %arg2[%c0, %c0_0, %c0_1, %c0_2] : memref<1x8x16x128xbf16, #tpu.memory_space<vmem>>, vector<1x8x16x128xbf16>
    %1 = vector.shape_cast %0 : vector<1x8x16x128xbf16> to vector<8x16x128xbf16>
    %2 = arith.extf %1 : vector<8x16x128xbf16> to vector<8x16x128xf32>
    %c0_3 = arith.constant 0 : index
    %c0_4 = arith.constant 0 : index
    %c0_5 = arith.constant 0 : index
    %c0_6 = arith.constant 0 : index
    %3 = vector.load %arg3[%c0_3, %c0_4, %c0_5, %c0_6] : memref<1x2x16x128xbf16, #tpu.memory_space<vmem>>, vector<1x2x16x128xbf16>
    %4 = vector.shape_cast %3 : vector<1x2x16x128xbf16> to vector<2x16x128xbf16>
    %5 = arith.extf %4 : vector<2x16x128xbf16> to vector<2x16x128xf32>
    %c0_7 = arith.constant 0 : index
    %c0_8 = arith.constant 0 : index
    %c0_9 = arith.constant 0 : index
    %c0_10 = arith.constant 0 : index
    %6 = vector.load %arg4[%c0_7, %c0_8, %c0_9, %c0_10] : memref<1x2x16x128xbf16, #tpu.memory_space<vmem>>, vector<1x2x16x128xbf16>
    %7 = vector.shape_cast %6 : vector<1x2x16x128xbf16> to vector<2x16x128xbf16>
    %8 = arith.extf %7 : vector<2x16x128xbf16> to vector<2x16x128xf32>
    %c0_i32 = arith.constant 0 : i32
    %9 = arith.cmpi eq, %arg1, %c0_i32 : i32
    %cst = arith.constant 0.000000e+00 : f32
    %10 = vector.broadcast %cst : f32 to vector<2x16x128xf32>
    %11 = arith.select %9, %10, %5 : vector<2x16x128xf32>
    %c1_i32 = arith.constant 1 : i32
    %12 = arith.cmpi eq, %arg1, %c1_i32 : i32
    %cst_11 = arith.constant 0.000000e+00 : f32
    %13 = vector.broadcast %cst_11 : f32 to vector<2x16x128xf32>
    %14 = arith.select %12, %13, %8 : vector<2x16x128xf32>
    %15 = tpu.concatenate %11, %2, %14 in 0 : vector<2x16x128xf32>, vector<8x16x128xf32>, vector<2x16x128xf32> -> vector<12x16x128xf32>
    %16 = tpu.iota {dimensions = array<i32: 1>} : vector<10x16x128xi32>
    %17 = vector.extract_strided_slice %15 {offsets = [0, 0, 0], sizes = [10, 16, 128], strides = [1, 1, 1]} : vector<12x16x128xf32> to vector<10x16x128xf32>
    %c1_i32_12 = arith.constant 1 : i32
    %18 = tpu.dynamic_rotate %17 by %c1_i32_12 dim 1 : vector<10x16x128xf32>, i32 -> vector<10x16x128xf32>
    %c0_i32_13 = arith.constant 0 : i32
    %19 = vector.broadcast %c0_i32_13 : i32 to vector<10x16x128xi32>
    %20 = arith.cmpi eq, %16, %19 : vector<10x16x128xi32>
    %cst_14 = arith.constant 0.000000e+00 : f32
    %21 = vector.broadcast %cst_14 : f32 to vector<10x16x128xf32>
    %22 = arith.select %20, %21, %18 : vector<10x16x128xi1>, vector<10x16x128xf32>
    %23 = arith.truncf %22 : vector<10x16x128xf32> to vector<10x16x128xbf16>
    %24 = arith.truncf %17 : vector<10x16x128xf32> to vector<10x16x128xbf16>
    %c15_i32 = arith.constant 15 : i32
    %25 = tpu.dynamic_rotate %17 by %c15_i32 dim 1 : vector<10x16x128xf32>, i32 -> vector<10x16x128xf32>
    %c15_i32_15 = arith.constant 15 : i32
    %26 = vector.broadcast %c15_i32_15 : i32 to vector<10x16x128xi32>
    %27 = arith.cmpi eq, %16, %26 : vector<10x16x128xi32>
    %cst_16 = arith.constant 0.000000e+00 : f32
    %28 = vector.broadcast %cst_16 : f32 to vector<10x16x128xf32>
    %29 = arith.select %27, %28, %25 : vector<10x16x128xi1>, vector<10x16x128xf32>
    %30 = arith.truncf %29 : vector<10x16x128xf32> to vector<10x16x128xbf16>
    %31 = vector.extract_strided_slice %15 {offsets = [1, 0, 0], sizes = [10, 16, 128], strides = [1, 1, 1]} : vector<12x16x128xf32> to vector<10x16x128xf32>
    %c1_i32_17 = arith.constant 1 : i32
    %32 = tpu.dynamic_rotate %31 by %c1_i32_17 dim 1 : vector<10x16x128xf32>, i32 -> vector<10x16x128xf32>
    %c0_i32_18 = arith.constant 0 : i32
    %33 = vector.broadcast %c0_i32_18 : i32 to vector<10x16x128xi32>
    %34 = arith.cmpi eq, %16, %33 : vector<10x16x128xi32>
    %cst_19 = arith.constant 0.000000e+00 : f32
    %35 = vector.broadcast %cst_19 : f32 to vector<10x16x128xf32>
    %36 = arith.select %34, %35, %32 : vector<10x16x128xi1>, vector<10x16x128xf32>
    %37 = arith.truncf %36 : vector<10x16x128xf32> to vector<10x16x128xbf16>
    %38 = arith.truncf %31 : vector<10x16x128xf32> to vector<10x16x128xbf16>
    %c15_i32_20 = arith.constant 15 : i32
    %39 = tpu.dynamic_rotate %31 by %c15_i32_20 dim 1 : vector<10x16x128xf32>, i32 -> vector<10x16x128xf32>
    %c15_i32_21 = arith.constant 15 : i32
    %40 = vector.broadcast %c15_i32_21 : i32 to vector<10x16x128xi32>
    %41 = arith.cmpi eq, %16, %40 : vector<10x16x128xi32>
    %cst_22 = arith.constant 0.000000e+00 : f32
    %42 = vector.broadcast %cst_22 : f32 to vector<10x16x128xf32>
    %43 = arith.select %41, %42, %39 : vector<10x16x128xi1>, vector<10x16x128xf32>
    %44 = arith.truncf %43 : vector<10x16x128xf32> to vector<10x16x128xbf16>
    %45 = vector.extract_strided_slice %15 {offsets = [2, 0, 0], sizes = [10, 16, 128], strides = [1, 1, 1]} : vector<12x16x128xf32> to vector<10x16x128xf32>
    %c1_i32_23 = arith.constant 1 : i32
    %46 = tpu.dynamic_rotate %45 by %c1_i32_23 dim 1 : vector<10x16x128xf32>, i32 -> vector<10x16x128xf32>
    %c0_i32_24 = arith.constant 0 : i32
    %47 = vector.broadcast %c0_i32_24 : i32 to vector<10x16x128xi32>
    %48 = arith.cmpi eq, %16, %47 : vector<10x16x128xi32>
    %cst_25 = arith.constant 0.000000e+00 : f32
    %49 = vector.broadcast %cst_25 : f32 to vector<10x16x128xf32>
    %50 = arith.select %48, %49, %46 : vector<10x16x128xi1>, vector<10x16x128xf32>
    %51 = arith.truncf %50 : vector<10x16x128xf32> to vector<10x16x128xbf16>
    %52 = arith.truncf %45 : vector<10x16x128xf32> to vector<10x16x128xbf16>
    %c15_i32_26 = arith.constant 15 : i32
    %53 = tpu.dynamic_rotate %45 by %c15_i32_26 dim 1 : vector<10x16x128xf32>, i32 -> vector<10x16x128xf32>
    %c15_i32_27 = arith.constant 15 : i32
    %54 = vector.broadcast %c15_i32_27 : i32 to vector<10x16x128xi32>
    %55 = arith.cmpi eq, %16, %54 : vector<10x16x128xi32>
    %cst_28 = arith.constant 0.000000e+00 : f32
    %56 = vector.broadcast %cst_28 : f32 to vector<10x16x128xf32>
    %57 = arith.select %55, %56, %53 : vector<10x16x128xi1>, vector<10x16x128xf32>
    %58 = arith.truncf %57 : vector<10x16x128xf32> to vector<10x16x128xbf16>
    %59 = tpu.concatenate %23, %24, %30, %37, %38, %44, %51, %52, %58 in 2 : vector<10x16x128xbf16>, vector<10x16x128xbf16>, vector<10x16x128xbf16>, vector<10x16x128xbf16>, vector<10x16x128xbf16>, vector<10x16x128xbf16>, vector<10x16x128xbf16>, vector<10x16x128xbf16>, vector<10x16x128xbf16> -> vector<10x16x1152xbf16>
    %60 = vector.shape_cast %59 : vector<10x16x1152xbf16> to vector<160x1152xbf16>
    %c0_29 = arith.constant 0 : index
    %c0_30 = arith.constant 0 : index
    %61 = vector.load %arg5[%c0_29, %c0_30] : memref<1152x128xbf16, #tpu.memory_space<vmem>>, vector<1152x128xbf16>
    %cst_31 = arith.constant dense<0.000000e+00> : vector<160x128xf32>
    %62 = tpu.matmul %60, %61, %cst_31 {dimension_numbers = #tpu.dot_dimension_numbers<[1], [0], [0], [1], [0, 0, 1, 1], [], []>} : vector<160x1152xbf16>, vector<1152x128xbf16>, vector<160x128xf32> -> vector<160x128xf32>
    %cst_32 = arith.constant 0.000000e+00 : f32
    %63 = vector.broadcast %cst_32 : f32 to vector<160x128xf32>
    %64 = arith.maximumf %62, %63 : vector<160x128xf32>
    %65 = vector.shape_cast %64 : vector<160x128xf32> to vector<10x16x128xf32>
    %66 = tpu.iota {dimensions = array<i32: 0>} : vector<10x16x128xi32>
    %c0_i32_33 = arith.constant 0 : i32
    %67 = arith.cmpi eq, %arg1, %c0_i32_33 : i32
    %c0_i32_34 = arith.constant 0 : i32
    %68 = vector.broadcast %c0_i32_34 : i32 to vector<10x16x128xi32>
    %69 = arith.cmpi eq, %66, %68 : vector<10x16x128xi32>
    %70 = vector.broadcast %67 : i1 to vector<10x16x128xi1>
    %71 = arith.andi %70, %69 : vector<10x16x128xi1>
    %cst_35 = arith.constant 0.000000e+00 : f32
    %72 = vector.broadcast %cst_35 : f32 to vector<10x16x128xf32>
    %73 = arith.select %71, %72, %65 : vector<10x16x128xi1>, vector<10x16x128xf32>
    %c1_i32_36 = arith.constant 1 : i32
    %74 = arith.cmpi eq, %arg1, %c1_i32_36 : i32
    %c9_i32 = arith.constant 9 : i32
    %75 = vector.broadcast %c9_i32 : i32 to vector<10x16x128xi32>
    %76 = arith.cmpi eq, %66, %75 : vector<10x16x128xi32>
    %77 = vector.broadcast %74 : i1 to vector<10x16x128xi1>
    %78 = arith.andi %77, %76 : vector<10x16x128xi1>
    %cst_37 = arith.constant 0.000000e+00 : f32
    %79 = vector.broadcast %cst_37 : f32 to vector<10x16x128xf32>
    %80 = arith.select %78, %79, %73 : vector<10x16x128xi1>, vector<10x16x128xf32>
    %81 = tpu.iota {dimensions = array<i32: 1>} : vector<8x16x128xi32>
    %82 = vector.extract_strided_slice %80 {offsets = [0, 0, 0], sizes = [8, 16, 128], strides = [1, 1, 1]} : vector<10x16x128xf32> to vector<8x16x128xf32>
    %c1_i32_38 = arith.constant 1 : i32
    %83 = tpu.dynamic_rotate %82 by %c1_i32_38 dim 1 : vector<8x16x128xf32>, i32 -> vector<8x16x128xf32>
    %c0_i32_39 = arith.constant 0 : i32
    %84 = vector.broadcast %c0_i32_39 : i32 to vector<8x16x128xi32>
    %85 = arith.cmpi eq, %81, %84 : vector<8x16x128xi32>
    %cst_40 = arith.constant 0.000000e+00 : f32
    %86 = vector.broadcast %cst_40 : f32 to vector<8x16x128xf32>
    %87 = arith.select %85, %86, %83 : vector<8x16x128xi1>, vector<8x16x128xf32>
    %88 = arith.truncf %87 : vector<8x16x128xf32> to vector<8x16x128xbf16>
    %89 = arith.truncf %82 : vector<8x16x128xf32> to vector<8x16x128xbf16>
    %c15_i32_41 = arith.constant 15 : i32
    %90 = tpu.dynamic_rotate %82 by %c15_i32_41 dim 1 : vector<8x16x128xf32>, i32 -> vector<8x16x128xf32>
    %c15_i32_42 = arith.constant 15 : i32
    %91 = vector.broadcast %c15_i32_42 : i32 to vector<8x16x128xi32>
    %92 = arith.cmpi eq, %81, %91 : vector<8x16x128xi32>
    %cst_43 = arith.constant 0.000000e+00 : f32
    %93 = vector.broadcast %cst_43 : f32 to vector<8x16x128xf32>
    %94 = arith.select %92, %93, %90 : vector<8x16x128xi1>, vector<8x16x128xf32>
    %95 = arith.truncf %94 : vector<8x16x128xf32> to vector<8x16x128xbf16>
    %96 = vector.extract_strided_slice %80 {offsets = [1, 0, 0], sizes = [8, 16, 128], strides = [1, 1, 1]} : vector<10x16x128xf32> to vector<8x16x128xf32>
    %c1_i32_44 = arith.constant 1 : i32
    %97 = tpu.dynamic_rotate %96 by %c1_i32_44 dim 1 : vector<8x16x128xf32>, i32 -> vector<8x16x128xf32>
    %c0_i32_45 = arith.constant 0 : i32
    %98 = vector.broadcast %c0_i32_45 : i32 to vector<8x16x128xi32>
    %99 = arith.cmpi eq, %81, %98 : vector<8x16x128xi32>
    %cst_46 = arith.constant 0.000000e+00 : f32
    %100 = vector.broadcast %cst_46 : f32 to vector<8x16x128xf32>
    %101 = arith.select %99, %100, %97 : vector<8x16x128xi1>, vector<8x16x128xf32>
    %102 = arith.truncf %101 : vector<8x16x128xf32> to vector<8x16x128xbf16>
    %103 = arith.truncf %96 : vector<8x16x128xf32> to vector<8x16x128xbf16>
    %c15_i32_47 = arith.constant 15 : i32
    %104 = tpu.dynamic_rotate %96 by %c15_i32_47 dim 1 : vector<8x16x128xf32>, i32 -> vector<8x16x128xf32>
    %c15_i32_48 = arith.constant 15 : i32
    %105 = vector.broadcast %c15_i32_48 : i32 to vector<8x16x128xi32>
    %106 = arith.cmpi eq, %81, %105 : vector<8x16x128xi32>
    %cst_49 = arith.constant 0.000000e+00 : f32
    %107 = vector.broadcast %cst_49 : f32 to vector<8x16x128xf32>
    %108 = arith.select %106, %107, %104 : vector<8x16x128xi1>, vector<8x16x128xf32>
    %109 = arith.truncf %108 : vector<8x16x128xf32> to vector<8x16x128xbf16>
    %110 = vector.extract_strided_slice %80 {offsets = [2, 0, 0], sizes = [8, 16, 128], strides = [1, 1, 1]} : vector<10x16x128xf32> to vector<8x16x128xf32>
    %c1_i32_50 = arith.constant 1 : i32
    %111 = tpu.dynamic_rotate %110 by %c1_i32_50 dim 1 : vector<8x16x128xf32>, i32 -> vector<8x16x128xf32>
    %c0_i32_51 = arith.constant 0 : i32
    %112 = vector.broadcast %c0_i32_51 : i32 to vector<8x16x128xi32>
    %113 = arith.cmpi eq, %81, %112 : vector<8x16x128xi32>
    %cst_52 = arith.constant 0.000000e+00 : f32
    %114 = vector.broadcast %cst_52 : f32 to vector<8x16x128xf32>
    %115 = arith.select %113, %114, %111 : vector<8x16x128xi1>, vector<8x16x128xf32>
    %116 = arith.truncf %115 : vector<8x16x128xf32> to vector<8x16x128xbf16>
    %117 = arith.truncf %110 : vector<8x16x128xf32> to vector<8x16x128xbf16>
    %c15_i32_53 = arith.constant 15 : i32
    %118 = tpu.dynamic_rotate %110 by %c15_i32_53 dim 1 : vector<8x16x128xf32>, i32 -> vector<8x16x128xf32>
    %c15_i32_54 = arith.constant 15 : i32
    %119 = vector.broadcast %c15_i32_54 : i32 to vector<8x16x128xi32>
    %120 = arith.cmpi eq, %81, %119 : vector<8x16x128xi32>
    %cst_55 = arith.constant 0.000000e+00 : f32
    %121 = vector.broadcast %cst_55 : f32 to vector<8x16x128xf32>
    %122 = arith.select %120, %121, %118 : vector<8x16x128xi1>, vector<8x16x128xf32>
    %123 = arith.truncf %122 : vector<8x16x128xf32> to vector<8x16x128xbf16>
    %124 = tpu.concatenate %88, %89, %95, %102, %103, %109, %116, %117, %123 in 2 : vector<8x16x128xbf16>, vector<8x16x128xbf16>, vector<8x16x128xbf16>, vector<8x16x128xbf16>, vector<8x16x128xbf16>, vector<8x16x128xbf16>, vector<8x16x128xbf16>, vector<8x16x128xbf16>, vector<8x16x128xbf16> -> vector<8x16x1152xbf16>
    %125 = vector.shape_cast %124 : vector<8x16x1152xbf16> to vector<128x1152xbf16>
    %c0_56 = arith.constant 0 : index
    %c0_57 = arith.constant 0 : index
    %126 = vector.load %arg6[%c0_56, %c0_57] : memref<1152x128xbf16, #tpu.memory_space<vmem>>, vector<1152x128xbf16>
    %cst_58 = arith.constant dense<0.000000e+00> : vector<128x128xf32>
    %127 = tpu.matmul %125, %126, %cst_58 {dimension_numbers = #tpu.dot_dimension_numbers<[1], [0], [0], [1], [0, 0, 1, 1], [], []>} : vector<128x1152xbf16>, vector<1152x128xbf16>, vector<128x128xf32> -> vector<128x128xf32>
    %128 = vector.shape_cast %127 : vector<128x128xf32> to vector<8x16x128xf32>
    %129 = arith.addf %128, %2 : vector<8x16x128xf32>
    %130 = vector.shape_cast %129 : vector<8x16x128xf32> to vector<1x8x16x128xf32>
    %c0_59 = arith.constant 0 : index
    %c0_60 = arith.constant 0 : index
    %c0_61 = arith.constant 0 : index
    %c0_62 = arith.constant 0 : index
    %131 = vector.load %arg7[%c0_59, %c0_60, %c0_61, %c0_62] : memref<1x8x16x128xf32, #tpu.memory_space<vmem>>, vector<1x8x16x128xf32>
    tpu.vector_store %arg7[%c0_59, %c0_60, %c0_61, %c0_62], %130 {strides = array<i32>} : memref<1x8x16x128xf32, #tpu.memory_space<vmem>>, vector<1x8x16x128xf32>,
    return
  }
  func.func @transform_0(%arg0: i32, %arg1: i32) -> (i32, i32, i32, i32) {
    %c0_i32 = arith.constant 0 : i32
    %c0_i32_0 = arith.constant 0 : i32
    %c0_i32_1 = arith.constant 0 : i32
    return %arg0, %arg1, %c0_i32, %c0_i32_0 : i32, i32, i32, i32
  }
  func.func @transform_1(%arg0: i32, %arg1: i32) -> (i32, i32, i32, i32) {
    %c4_i32 = arith.constant 4 : i32
    %0 = arith.muli %arg1, %c4_i32 : i32
    %c1_i32 = arith.constant 1 : i32
    %1 = arith.subi %0, %c1_i32 : i32
    %c0_i32 = arith.constant 0 : i32
    %2 = arith.maxsi %1, %c0_i32 : i32
    %c0_i32_0 = arith.constant 0 : i32
    %c0_i32_1 = arith.constant 0 : i32
    %c0_i32_2 = arith.constant 0 : i32
    return %arg0, %2, %c0_i32_0, %c0_i32_1 : i32, i32, i32, i32
  }
  func.func @transform_2(%arg0: i32, %arg1: i32) -> (i32, i32, i32, i32) {
    %c4_i32 = arith.constant 4 : i32
    %0 = arith.muli %arg1, %c4_i32 : i32
    %c4_i32_0 = arith.constant 4 : i32
    %1 = arith.addi %0, %c4_i32_0 : i32
    %c7_i32 = arith.constant 7 : i32
    %2 = arith.minsi %1, %c7_i32 : i32
    %c0_i32 = arith.constant 0 : i32
    %c0_i32_1 = arith.constant 0 : i32
    %c0_i32_2 = arith.constant 0 : i32
    return %arg0, %2, %c0_i32, %c0_i32_1 : i32, i32, i32, i32
  }
  func.func @transform_3(%arg0: i32, %arg1: i32) -> (i32, i32) {
    %c0_i32 = arith.constant 0 : i32
    %c0_i32_0 = arith.constant 0 : i32
    %c0_i32_1 = arith.constant 0 : i32
    return %c0_i32, %c0_i32_0 : i32, i32
  }
  func.func @transform_4(%arg0: i32, %arg1: i32) -> (i32, i32) {
    %c0_i32 = arith.constant 0 : i32
    %c0_i32_0 = arith.constant 0 : i32
    %c0_i32_1 = arith.constant 0 : i32
    return %c0_i32, %c0_i32_0 : i32, i32
  }
  func.func @transform_5(%arg0: i32, %arg1: i32) -> (i32, i32, i32, i32) {
    %c0_i32 = arith.constant 0 : i32
    %c0_i32_0 = arith.constant 0 : i32
    %c0_i32_1 = arith.constant 0 : i32
    return %arg0, %arg1, %c0_i32, %c0_i32_0 : i32, i32, i32, i32
  }
}

</mosaic_0001>

<bundles_post_ra>
// kernel: tpu_custom_call.1
= control target key start
LH: loop header
LB: loop body
LE: loop exit
PB: predicated region body
PF: predicated region fallthrough
CT: control target
= control target key end

     0   :  { %s7068_s0 = inlined_call_operand.hbm [shape: bf16[2,16,16,128], index: 0, kind: input, shape index: {}]   ;;  %s7069_s1 = inlined_call_operand.hbm [shape: bf16[2,16,16,128], index: 1, kind: input, shape index: {}]   ;;  %s7070_s2 = inlined_call_operand.hbm [shape: bf16[2,16,16,128], index: 2, kind: input, shape index: {}]   ;;  %s7071_s3 = inlined_call_operand.hbm [shape: bf16[1152,128], index: 3, kind: input, shape index: {}]   ;;  %s7072_s4 = inlined_call_operand.hbm [shape: bf16[1152,128], index: 4, kind: input, shape index: {}]   ;;  %s7073_s5 = inlined_call_operand.hbm [shape: f32[2,16,16,128], index: 5, kind: output, shape index: {}]  }
   0x1   :  { %7122 = sst [smem:[#allocation68_spill]] %s7068_s0 }
   0x2   :  { %7123 = sst [smem:[#allocation69_spill]] %s7069_s1 }
   0x3   :  { %7124 = sst [smem:[#allocation70_spill]] %s7070_s2 }
   0x4   :  { %7125 = sst [smem:[#allocation71_spill]] %s7071_s3 }
   0x5   :  { %7126 = sst [smem:[#allocation72_spill]] %s7072_s4 }
   0x6   :  { %7127 = sst [smem:[#allocation73_spill]] %s7073_s5 }
   0x7   :  { %10 = vsyncpa [#allocation3], 0 }
   0x8   :  { %12 = vsyncpa [#allocation3 + $0x1], 0 }
   0x9   :  { %13 = vsyncpa [#allocation6], 0 }
   0xa   :  { %15 = vsyncpa [#allocation6 + $0x1], 0 }
   0xb   :  { %16 = vsyncpa [#allocation9], 0 }
   0xc   :  { %17 = vsyncpa [#allocation4], 0 }
   0xd   :  { %19 = vsyncpa [#allocation4 + $0x1], 0  ;;  %s5294_s18 = smov 0   ;;  %s5296_s19 = smov 0  }
   0xe   :  { %s5298_s20 = smov 0   ;;  %s5300_s21 = smov 0  }
   0xf   :  { %s5302_s22 = smov 0   ;;  %s5304_s23 = smov 0  }
  0x10   :  { %s5306_s24 = smov 0   ;;  %s5308_s25 = smov 0  }
  0x11   :  { %s5310_s26 = smov 0   ;;  %s5312_s27 = smov 0  }
  0x12   :  { %s5314_s28 = smov 0   ;;  %s5316_s29 = smov 0  }
  0x13   :  { %s5318_s30 = smov 0   ;;  %s5320_s6 = smov 0  }
  0x14 LB: > { %7128 = sst [smem:[#allocation17_spill]] %s5199_s18  ;;  %s5365_s7 = sadd.s32 4294967295, %s5251_s6   ;;  %s5251_s6 = sphi %s5320_s6, %s25_s6   ;;  %s5247_s30 = sphi %s5318_s30, %s7302_s30   ;;  %s5243_s29 = sphi %s5316_s29, %s7301_s29   ;;  %s5239_s28 = sphi %s5314_s28, %s7309_s28   ;;  %s5235_s27 = sphi %s5312_s27, %s7299_s27   ;;  %s5231_s26 = sphi %s5310_s26, %s7308_s26   ;;  %s5227_s25 = sphi %s5308_s25, %s7307_s25   ;;  %s5223_s24 = sphi %s5306_s24, %s7306_s24   ;;  %s5219_s23 = sphi %s5304_s23, %s7305_s23   ;;  %s5215_s22 = sphi %s5302_s22, %s7304_s22   ;;  %s5211_s21 = sphi %s5300_s21, %s7297_s21   ;;  %s5207_s20 = sphi %s5298_s20, %s7303_s20   ;;  %s5203_s19 = sphi %s5296_s19, %s7296_s19   ;;  %s5199_s18 = sphi %s5294_s18, %s7295_s18  }
  0x15   : > { %7129 = sst [smem:[#allocation18_spill]] %s5203_s19  ;;  %p3295_p0 = scmp.ge.s32.totalorder %s5251_s6, 1 }
  0x16   : > { %7130 = sst [smem:[#allocation19_spill]] %s5207_s20  ;;  %p7090_p1 = scmp.eq.s32.totalorder %s5365_s7, 0 }
  0x17   : > { %7131 = sst [smem:[#allocation20_spill]] %s5215_s22  ;;  %p212_p3 = scmp.lt.s32.totalorder %s5251_s6, 5 }
  0x18   : > { %7132 = sst [smem:[#allocation21_spill]] %s5235_s27  ;;  %s5253_s9 = smov [#allocation8]  }
  0x19   : > { %7133 = sst [smem:[#allocation22_spill]] %s5239_s28  ;;  %p5371_p4 = pnand %p3295_p0, %p212_p3 }
  0x1a   : > { %7134 = sst [smem:[#allocation23_spill]] %s5243_s29  ;;  %s224_s10 = sshll.u32 %s5253_s9, 4  ;;  %s225_s10 = int_to_ptr.vmem [resolvable:$true] %s224_s10 }
  0x1b   : > { %7135 = sst [smem:[#allocation24_spill]] %s5247_s30  ;;  %p4645_p5 = pneg %p5371_p4 }
  0x1c   : > { %s7136_s8 = scalar_select %p5371_p4, 1, 0 }
  0x1d   : > { %p5379_p6 = pnand %p4645_p5, %p7090_p1  ;;  %s4970_s12 = scalar_lea.vmem %s225_s10, 9216 }
  0x1e   : > { %7137 = sst [smem:[#allocation25_spill]] %s7136_s8  ;;  %p4971_p8 = scmp.ne.s32.totalorder %s225_s10, %s4970_s12 }
  0x1f   : > { %p4961_p7 = pneg %p5379_p6  ;;  %p4978_p11 = scmp.lt.s32.totalorder %s225_s10, %s225_s10 }
  0x20   : > { %p4979_p12 = scmp.lt.s32.totalorder %s4970_s12, %s4970_s12 }
  0x21   : > { %p4973_p9 = pnand %p4971_p8, %p4961_p7 }
  0x22   : > { %p4980_p13 = por %p4979_p12, %p4978_p11 }
  0x23   : > { %p4974_p10 = pneg %p4973_p9 }
  0x25   : > { %p4981_p0 = pnand %p4980_p13, %p4974_p10 }
  0x27   : > { %4984 = shalt.err (!%p4981_p0)
}
  0x28   : > { %s7076_s13 = smov 64   ;;  %s7078_s14 = smov 4  }
  0x29   : > { %s7139_s3 = sld [smem:[#allocation71_spill]]  ;;  %s34_s17 = sadd.s32 1, %s5243_s29 }
  0x2a   : > { %s37_s9 = sadd.s32 1, %s5247_s30  ;;  %p35_p3 = scmp.ge.s32.totalorder %s34_s17, 2 }
  0x2b   : > { %p7092_p5 = scmp.eq.s32.totalorder %s5251_s6, 0  ;;  %s3289_s12 = sshll.u32 %s5243_s29, 2 }
  0x2c   : > { %s82_s5 = sadd.s32 1, %s5219_s23  ;;  %s7311_s17 = smov (%p35_p3, %s34_s17), 0 }
  0x2d   : > { %7140 = sst [smem:[#allocation26_spill]] %s7311_s17  ;;  %s7313_s9 = smov (!%p35_p3, %s37_s9), %s5247_s30 }
  0x2e   : > { %s42_s28 = ssub.s32 %s5243_s29, %s7311_s17  ;;  %s3290_s27 = sadd.s32 4294967295, %s3289_s12 }
  0x2f   : > { %4648 = dma.hbm_to_vmem [thread:$0]  (!%p5379_p6), %s7139_s3, 9216, %s225_s10, [#allocation9], %s7076_s13, %s7076_s13, %s7078_s14  }
  0x30   : > { %p39_p8 = scmp.ge.s32.totalorder %s7313_s9, 2  ;;  %p71_p9 = scmp.gt.s32.totalorder %s3290_s27, 0 }
  0x31   : > { %s3291_s10 = sshll.u32 %s7311_s17, 2  ;;  %p89_p10 = scmp.ne.s32.totalorder %s5219_s23, %s5215_s22 }
  0x32   : > { %s7315_s9 = smov (%p39_p8, %s7313_s9), 0  ;;  %s7317_s27 = smov (!%p71_p9, %s3290_s27), 0 }
  0x33   : > { %7141 = sst [smem:[#allocation27_spill]] %s7315_s9  ;;  %s5413_s15 = ssub.s32 %s5247_s30, %s7315_s9 }
  0x34   : > { %7142 = sst [smem:[#allocation28_spill]] %s5413_s15  ;;  %s3292_s16 = sadd.s32 4294967295, %s3291_s10 }
  0x35   : > { %s5416_s13 = sor.u32 %s42_s28, %s5413_s15  ;;  %p75_p11 = scmp.gt.s32.totalorder %s3292_s16, 0 }
  0x36   : > { %p44_p12 = scmp.eq.s32.totalorder %s5416_s13, 0  ;;  %p5421_p13 = por %p89_p10, %p7092_p5 }
  0x37   : > { %s7319_s16 = smov (!%p75_p11, %s3292_s16), 0  ;;  %p95_p0 = scmp.ne.s32.totalorder %s5215_s22, %s5211_s21 }
  0x38   : > { %s5427_s3 = sadd.s32 4, %s3289_s12  ;;  %s78_s9 = ssub.s32 %s7317_s27, %s7319_s16 }
  0x39   : > { %s79_s28 = sor.u32 %s78_s9, %s5413_s15  ;;  %p5433_p8 = por %p95_p0, %p7090_p1 }
  0x3a   : > { %p80_p9 = scmp.eq.s32.totalorder %s79_s28, 0  ;;  %s5437_s8 = sadd.s32 4, %s3291_s10 }
  0x3b   : > { %s7144_s17 = scalar_select %p5433_p8, 1, 0 }
  0x3c   : > { %p7091_p11 = scmp.lt.s32.totalorder %s5251_s6, 4  ;;  %s5445_s12 = sshll.u32 %s5247_s30, 5 }
  0x3d   : > { %7145 = sst [smem:[#allocation29_spill]] %s7144_s17  ;;  %s275_s16 = sand.u32 1, %s5251_s6  }
  0x3e   : > { %s5442_s21 = scalar_select %p80_p9, %s5219_s23, %s82_s5  }
  0x3f   : > { %s277_s9 = sand.u32 1, %s5219_s23   ;;  %s3956_s2 = sshll.u32 %s7317_s27, 2 }
  0x40   : > { %7146 = sst [smem:[#allocation30_spill]] %s5442_s21  ;;  %s3304_s22 = sshll.u32 %s277_s9, 4 }
  0x41   : > { %s290_s15 = sadd.s32 %s3956_s2, %s5445_s12  ;;  %s279_s17 = scalar_lea.vmem [#allocation5], %s3304_s22 }
  0x42   : > { %s3310_s18 = sshll.u32 %s290_s15, 6  ;;  %s293_s28 = sshll.u32 %s279_s17, 4  ;;  %s294_s28 = int_to_ptr.vmem [resolvable:$true] %s293_s28 }
  0x43   : > { %s7147_s1 = sld [smem:[#allocation69_spill]]  ;;  %p5457_p0 = pnand %p7091_p11, %p5421_p13 }
  0x44   : > { %s5256_s30 = smov [#allocation10]   ;;  %s5463_s2 = scalar_lea.sflag [#allocation6], %s275_s16 }
  0x45   : > { %s237_s21 = sshll.u32 %s5256_s30, 4  ;;  %p4987_p9 = pneg %p5457_p0  ;;  %s5461_s21 = int_to_ptr.vmem [resolvable:$true] %s237_s21 }
  0x46   : > { %s4998_s22 = scalar_lea.vmem %s294_s28, 256 }
  0x47   : > { %p4999_p10 = scmp.ne.s32.totalorder %s294_s28, %s4998_s22 }
  0x49   : > { %s292_s10 = scalar_lea.hbm %s7147_s1, %s3310_s18  ;;  %p5001_p3 = pnand %p4999_p10, %p4987_p9 }
  0x4a   : > { %s5257_s18 = smov [#allocation5]  }
  0x4b   : > { %p5002_p1 = pneg %p5001_p3  ;;  %s5003_s19 = sshll.u32 %s5257_s18, 4  ;;  %s5004_s19 = int_to_ptr.vmem [resolvable:$false] %s5003_s19 }
  0x4c   : > { %s5005_s20 = scalar_lea.vmem %s5004_s19, 512  ;;  %p5006_p13 = scmp.lt.s32.totalorder %s294_s28, %s5004_s19 }
  0x4d   : > { %p5007_p11 = scmp.lt.s32.totalorder %s5005_s20, %s4998_s22 }
  0x4f   : > { %p5008_p2 = por %p5007_p11, %p5006_p13 }
  0x51   : > { %p5009_p5 = pnand %p5008_p2, %p5002_p1 }
  0x53   : > { %5012 = shalt.err (!%p5009_p5)
}
  0x54   : > { %s7149_s27 = smov 4   ;;  %s7150_s30 = smov 64  }
  0x55   : > { %4658 = dma.hbm_to_vmem [thread:$0]  (!%p5457_p0), %s292_s10, 256, %s294_s28, %s5463_s2, %s7150_s30, %s7150_s30, %s7149_s27  }
  0x56   : > { %s5024_s14 = scalar_lea.vmem %s5461_s21, 9216  ;;  %p5032_p1 = scmp.lt.s32.totalorder %s5461_s21, %s5461_s21 }
  0x57   : > { %p5025_p3 = scmp.ne.s32.totalorder %s5461_s21, %s5024_s14  ;;  %p5033_p2 = scmp.lt.s32.totalorder %s5024_s14, %s5024_s14 }
  0x59   : > { %p5027_p10 = pnand %p5025_p3, %p4961_p7  ;;  %p5034_p5 = por %p5033_p2, %p5032_p1 }
  0x5b   : > { %p5028_p9 = pneg %p5027_p10 }
  0x5d   : > { %p5035_p11 = pnand %p5034_p5, %p5028_p9 }
  0x5f   : > { %5038 = shalt.err (!%p5035_p11)
}
  0x60   : > { %s7151_s4 = sld [smem:[#allocation72_spill]]  ;;  %s3288_s11 = sadd.s32 4294967294, %s5251_s6  }
  0x61   : > { %s46_s16 = sadd.s32 1, %s5231_s26  ;;  %p53_p7 = scmp.ne.s32.totalorder %s5231_s26, %s5227_s25 }
  0x62   : > { %s5496_s9 = scalar_select %p44_p12, %s5231_s26, %s46_s16  }
  0x63   : > { %p7152_p0 = scmp.eq.s32.totalorder %s5251_s6, 0  ;;  %p59_p3 = scmp.ne.s32.totalorder %s5227_s25, %s5223_s24 }
  0x64   : > { %p7154_p10 = scmp.eq.s32.totalorder %s5365_s7, 3  ;;  %p7156_p1 = scmp.eq.s32.totalorder %s5365_s7, 0 }
  0x65   : > { %p5500_p13 = por %p7152_p0, %p53_p7  ;;  %s251_s13 = sand.u32 1, %s5231_s26  }
  0x66   : > { %4651 = dma.hbm_to_vmem [thread:$0]  (!%p5379_p6), %s7151_s4, 9216, %s5461_s21, [#allocation9], %s7150_s30, %s7150_s30, %s7149_s27  }
  0x67   : > { %p5508_p9 = por %p7154_p10, %p53_p7  ;;  %p205_p6 = scmp.eq.s32.totalorder %s3288_s11, 3 }
  0x68   : > { %p5514_p2 = por %p7156_p1, %p59_p3  ;;  %s3299_s22 = sshll.u32 %s251_s13, 6 }
  0x69   : > { %s7155_s10 = scalar_select %p5508_p9, 1, 0 }
  0x6a   : > { %p5519_p12 = por %p205_p6, %p59_p3  ;;  %s3955_s18 = sshll.u32 %s5243_s29, 4 }
  0x6b   : > { %s262_s19 = sadd.s32 %s3955_s18, %s5445_s12  ;;  %s255_s14 = scalar_lea.vmem [#allocation2], %s3299_s22 }
  0x6c   : > { %s7158_s5 = scalar_select %p5519_p12, 1, 0 }
  0x6d   : > { %s3303_s20 = sshll.u32 %s262_s19, 6  ;;  %s265_s17 = sshll.u32 %s255_s14, 4  ;;  %s266_s17 = int_to_ptr.vmem [resolvable:$true] %s265_s17 }
  0x6e   : > { %s7159_s0 = sld [smem:[#allocation68_spill]]  ;;  %p7160_p5 = scmp.lt.s32.totalorder %s5251_s6, 4 }
  0x6f   : > { %s252_s4 = scalar_lea.sflag [#allocation3], %s251_s13  ;;  %s5052_s29 = scalar_lea.vmem %s266_s17, 1024 }
  0x70   : > { %p5532_p11 = pnand %p7160_p5, %p5500_p13  ;;  %p5053_p0 = scmp.ne.s32.totalorder %s266_s17, %s5052_s29 }
  0x71   : > { %s5258_s22 = smov [#allocation2]  }
  0x72   : > { %p5041_p7 = pneg %p5532_p11  ;;  %s5057_s18 = sshll.u32 %s5258_s22, 4  ;;  %s5058_s18 = int_to_ptr.vmem [resolvable:$false] %s5057_s18 }
  0x73   : > { %s5059_s19 = scalar_lea.vmem %s5058_s18, 2048  ;;  %p5060_p6 = scmp.lt.s32.totalorder %s266_s17, %s5058_s18 }
  0x74   : > { %s264_s11 = scalar_lea.hbm %s7159_s0, %s3303_s20  ;;  %p5055_p3 = pnand %p5053_p0, %p5041_p7 }
  0x75   : > { %p5061_p1 = scmp.lt.s32.totalorder %s5059_s19, %s5052_s29 }
  0x76   : > { %p5056_p10 = pneg %p5055_p3 }
  0x77   : > { %p5062_p12 = por %p5061_p1, %p5060_p6 }
  0x79   : > { %p5063_p9 = pnand %p5062_p12, %p5056_p10 }
  0x7b   : > { %5066 = shalt.err (!%p5063_p9)
}
  0x7c   : > { %s7162_s28 = sld [smem:[#allocation19_spill]]  ;;  %p7166_p13 = scmp.lt.s32.totalorder %s5427_s3, 7 }
  0x7d   : > { %s7163_s13 = sld [smem:[#allocation18_spill]]  ;;  %p7167_p9 = scmp.lt.s32.totalorder %s5437_s8, 7 }
  0x7e   : > { %s7164_s20 = sld [smem:[#allocation17_spill]]  ;;  %s7321_s3 = smov (!%p7166_p13, %s5427_s3), 7 }
  0x7f   : > { %s7165_s14 = sld [smem:[#allocation28_spill]]  ;;  %s7323_s8 = smov (!%p7167_p9, %s5437_s8), 7 }
  0x80   : > { %4655 = dma.hbm_to_vmem [thread:$0]  (!%p5532_p11), %s264_s11, 1024, %s266_s17, %s252_s4, %s7150_s30, %s7150_s30, %s7149_s27  }
  0x81   : > { %s114_s29 = ssub.s32 %s7321_s3, %s7323_s8  ;;  %p7168_p7 = scmp.eq.s32.totalorder %s5251_s6, 0 }
  0x82   : > { %s118_s1 = sadd.s32 1, %s7162_s28  ;;  %p7170_p10 = scmp.eq.s32.totalorder %s5365_s7, 0 }
  0x83   : > { %p125_p12 = scmp.ne.s32.totalorder %s7162_s28, %s7163_s13  ;;  %s305_s17 = sand.u32 1, %s7162_s28  }
  0x84   : > { %p131_p5 = scmp.ne.s32.totalorder %s7163_s13, %s7164_s20  ;;  %s3957_s11 = sshll.u32 %s7321_s3, 2 }
  0x85   : > { %s115_s15 = sor.u32 %s114_s29, %s7165_s14  ;;  %p5557_p0 = por %p125_p12, %p7168_p7 }
  0x86   : > { %p116_p3 = scmp.eq.s32.totalorder %s115_s15, 0  ;;  %p5563_p6 = por %p131_p5, %p7170_p10 }
  0x87   : > { %s3311_s8 = sshll.u32 %s305_s17, 4  ;;  %s318_s22 = sadd.s32 %s3957_s11, %s5445_s12 }
  0x88   : > { %s7171_s4 = scalar_select %p5563_p6, 1, 0 }
  0x89   : > { %s7325_s28 = smov (!%p116_p3, %s7162_s28), %s118_s1  ;;  %s3316_s18 = sshll.u32 %s318_s22, 6 }
  0x8a   : > { %s7172_s20 = sld [smem:[#allocation70_spill]]  ;;  %s307_s29 = scalar_lea.vmem [#allocation7], %s3311_s8 }
  0x8b   : > { %s321_s0 = sshll.u32 %s307_s29, 4  ;;  %p7173_p11 = scmp.lt.s32.totalorder %s5251_s6, 4  ;;  %s322_s0 = int_to_ptr.vmem [resolvable:$true] %s321_s0 }
  0x8c   : > { %s5080_s3 = scalar_lea.vmem %s322_s0, 256  ;;  %s5259_s12 = smov [#allocation7]  }
  0x8d   : > { %p5579_p1 = pnand %p7173_p11, %p5557_p0  ;;  %p5081_p9 = scmp.ne.s32.totalorder %s322_s0, %s5080_s3 }
  0x8e   : > { %s5085_s1 = sshll.u32 %s5259_s12, 4  ;;  %s5086_s1 = int_to_ptr.vmem [resolvable:$false] %s5085_s1 }
  0x8f   : > { %p5069_p13 = pneg %p5579_p1  ;;  %s5087_s17 = scalar_lea.vmem %s5086_s1, 512 }
  0x90   : > { %s320_s14 = scalar_lea.hbm %s7172_s20, %s3316_s18  ;;  %p5088_p7 = scmp.lt.s32.totalorder %s322_s0, %s5086_s1 }
  0x91   : > { %p5083_p12 = pnand %p5081_p9, %p5069_p13  ;;  %p5089_p3 = scmp.lt.s32.totalorder %s5087_s17, %s5080_s3 }
  0x93   : > { %p5084_p5 = pneg %p5083_p12  ;;  %p5090_p10 = por %p5089_p3, %p5088_p7 }
  0x95   : > { %p5091_p6 = pnand %p5090_p10, %p5084_p5 }
  0x97   : > { %5094 = shalt.err (!%p5091_p6)
}
  0x98   : > { %4661 = dma.hbm_to_vmem [thread:$0]  (!%p5579_p1), %s320_s14, 256, %s322_s0, %s5463_s2, %s7150_s30, %s7150_s30, %s7149_s27  }
  0x99   : > { %333 = sbr.rel (%p5371_p4) target bundleno = 957 (0x3bd), region = 40 }
  0x9e   : > { %s5594_s11 = sand.u32 1, %s5227_s25  }
  0x9f   : > { %s3318_s8 = sshll.u32 %s5594_s11, 6  ;;  %s336_s22 = scalar_lea.sflag [#allocation3], %s5594_s11 }
  0xa0   : > { %s5598_s18 = scalar_lea.vmem [#allocation2], %s3318_s8 }
  0xa1   : > { %5178 = dma.done.wait (%p5514_p2), %s336_s22, 1024  }
  0xa2   : > { %5180 = vsyncadd (%p5514_p2), %s336_s22, 4294966272  ;;  %s7176_s0 = sld [smem:[#allocation20_spill]]  ;;  %s344_s27 = sand.u32 1, %s5365_s7  }
  0xa3   : > { %s345_s13 = scalar_lea.sflag [#allocation6], %s344_s27 }
  0xa8   : > { %s346_s30 = sand.u32 1, %s7176_s0  }
  0xa9   : > { %s5606_s19 = sshll.u32 %s346_s30, 4 }
  0xaa   : > { %s348_s20 = scalar_lea.vmem [#allocation5], %s5606_s19 }
  0xab   : > { %5182 = dma.done.wait (%p5433_p8), %s345_s13, 256  }
  0xac   : > { %5184 = vsyncadd (%p5433_p8), %s345_s13, 4294967040  ;;  %s7178_s14 = sld [smem:[#allocation18_spill]]  ;;  %p7179_p4 = scmp.ne.s32.totalorder %s7171_s4, 0 }
  0xb2   : > { %s355_s29 = sand.u32 1, %s7178_s14  }
  0xb3   : > { %s5614_s21 = sshll.u32 %s355_s29, 4 }
  0xb4   : > { %s357_s15 = scalar_lea.vmem [#allocation7], %s5614_s21 }
  0xb5   : > { %5186 = dma.done.wait (%p7179_p4), %s345_s13, 256  }
  0xb6   : > { %5188 = vsyncadd (%p7179_p4), %s345_s13, 4294967040  ;;  %p7180_p2 = scmp.eq.s32.totalorder %s5365_s7, 0 }
  0xb8   : > { %5190 = dma.done.wait (%p7180_p2), [#allocation9], 18432   ;;  %p7181_p0 = pmov %p7180_p2 }
  0xb9   : > { %s7182_s3 = sld [smem:[#allocation21_spill]]  ;;  %v4791_v0 = vld [vmem:[#allocation8 + $0x78] sm:$0xff]   ;;  %v4795_v4 = vld [vmem:[#allocation8 + $0x70] sm:$0xff]   ;;  %v4799_v8 = vld [vmem:[#allocation8 + $0x68] sm:$0xff]   ;;  %v479_v27 = vlaneseq  ;;  %v7186_v37 = vmov 0  ;;  %vm5260_vm6 = vmmov 1  }
  0xba   : > { %5192 = vsyncadd (%p7181_p0), [#allocation9], 4294948864  ;;  %v4792_v1 = vld [vmem:[#allocation8 + $0xf8] sm:$0xff]   ;;  %3967 = vmatprep.subr.bf16.mxu0 %v4791_v0  ;;  %v4796_v5 = vld [vmem:[#allocation8 + $0xf0] sm:$0xff]   ;;  %v7189_v55 = vmov 0  ;;  %s3323_s4 = sshll.u32 %s5594_s11, 7 }
  0xbb   : > { %v4793_v2 = vld [vmem:[#allocation8 + $0x38] sm:$0xff]   ;;  %4043 = vmatprep.subr.bf16.mxu1 %v4792_v1  ;;  %v4797_v6 = vld [vmem:[#allocation8 + $0x30] sm:$0xff]   ;;  %v4800_v9 = vld [vmem:[#allocation8 + $0xe8] sm:$0xff]   ;;  %v5635_v32 = vshrl.u32 %v479_v27, 7  ;;  %s6902_s1 = scalar_lea.vmem [#allocation11], %s3323_s4  ;;  %s7281_s17 = sld [smem:[#allocation22_spill]] }
  0xbc   : > { %v4794_v3 = vld [vmem:[#allocation8 + $0xb8] sm:$0xff]   ;;  %3968 = vmatpush3.bf16.msra.mxu0 %v4793_v2  ;;  %v4798_v7 = vld [vmem:[#allocation8 + $0xb0] sm:$0xff]   ;;  %v4801_v10 = vld [vmem:[#allocation8 + $0x28] sm:$0xff]   ;;  %s7290_s30 = sld [smem:[#allocation73_spill]]  ;;  %p7292_p1 = scmp.ne.s32.totalorder %s7155_s10, 0 }
  0xbd   : > { %4044 = vmatpush3.bf16.msra.mxu1 %v4794_v3  ;;  %3969 = vmatprep.subr.bf16.mxu0 %v4795_v4  ;;  %v4802_v11 = vld [vmem:[#allocation8 + $0xa8] sm:$0xff]   ;;  %v4803_v12 = vld [vmem:[#allocation8 + $0x60] sm:$0xff]   ;;  %v4807_v16 = vld [vmem:[#allocation8 + $0x58] sm:$0xff]   ;;  %7185 = vst [vmem:[#allocation31_spill] sm:$0xff] %v5635_v32  ;;  %v481_v39 = vadd.s32 8, %v5635_v32  ;;  %vm502_vm3 = vcmp.lt.s32.totalorder %v5635_v32, 1 }
  0xbe   : > { %4045 = vmatprep.subr.bf16.mxu1 %v4796_v5  ;;  %v4804_v13 = vld [vmem:[#allocation8 + $0xe0] sm:$0xff]   ;;  %v4808_v17 = vld [vmem:[#allocation8 + $0xd8] sm:$0xff]   ;;  %v4811_v21 = vld [vmem:[#allocation8 + $0x50] sm:$0xff]   ;;  %vm3965_vm4 = vcmp.ne.s32.totalorder %v5635_v32, 0  ;;  %vm585_vm5 = vcmp.lt.s32.totalorder %v5635_v32, 7  ;;  %s5261_s29 = smov [#allocation11]  }
  0xbf   : > { %p463_p8 = scmp.eq.s32.totalorder %s7182_s3, 0  ;;  %v4805_v14 = vld [vmem:[#allocation8 + $0x20] sm:$0xff]   ;;  %v4809_v19 = vld [vmem:[#allocation8 + $0x18] sm:$0xff]   ;;  %v4812_v23 = vld [vmem:[#allocation8 + $0xd0] sm:$0xff]   ;;  %vm3966_vm8 = vcmp.ne.s32.totalorder %v481_v39, 15  ;;  %p471_p6 = scmp.eq.s32.totalorder %s7182_s3, 1 }
  0xc0   : > { %3970 = vmatpush3.bf16.msra.mxu0 %v4797_v6  ;;  %v4806_v15 = vld [vmem:[#allocation8 + $0xa0] sm:$0xff]   ;;  %v4810_v20 = vld [vmem:[#allocation8 + $0x98] sm:$0xff]   ;;  %v4813_v24 = vld [vmem:[#allocation8 + $0x10] sm:$0xff]   ;;  %s3964_s16 = sshll.u32 %s7182_s3, 4  ;;  %s5099_s21 = sshll.u32 %s5261_s29, 4  ;;  %s5100_s21 = int_to_ptr.vmem [resolvable:$false] %s5099_s21 }
  0xc1   : > { %s5626_s12 = scalar_select %p463_p8, 1, 0  ;;  %4046 = vmatpush3.bf16.msra.mxu1 %v4798_v7  ;;  %3971 = vmatprep.subr.bf16.mxu0 %v4799_v8  ;;  %v4814_v25 = vld [vmem:[#allocation8 + $0x90] sm:$0xff]   ;;  %v4815_v26 = vld [vmem:[#allocation8 + $0x48] sm:$0xff]   ;;  %v4819_v31 = vld [vmem:[#allocation8 + $0x40] sm:$0xff]  }
  0xc2   : > { %4047 = vmatprep.subr.bf16.mxu1 %v4800_v9  ;;  %v4816_v28 = vld [vmem:[#allocation8 + $0xc8] sm:$0xff]   ;;  %v4820_v33 = vld [vmem:[#allocation8 + $0xc0] sm:$0xff]   ;;  %v4824_v44 = vld [vmem:[#allocation8 + $0x178] sm:$0xff]   ;;  %s5769_s7 = scalar_select %p471_p6, 1, 0 }
  0xc3   : > { %v465_v18 = vstv %s5626_s12  ;;  %v4817_v29 = vld [vmem:[#allocation8 + $0x8] sm:$0xff]   ;;  %v4821_v34 = vld [vmem:[#allocation8] sm:$0xff]   ;;  %vm5673_vm7 = vmpackc.low %vm5260_vm6, %vm3965_vm4  ;;  %s3951_s8 = sshll.u32 %s7281_s17, 5  ;;  %s7291_s13 = smov %s7290_s30 }
  0xc4   : > { %3972 = vmatpush3.bf16.msra.mxu0 %v4801_v10  ;;  %vm5629_vm0 = vcmp.eq.s32.totalorder %v465_v18, 1  ;;  %v4818_v30 = vld [vmem:[#allocation8 + $0x88] sm:$0xff]   ;;  %v4822_v35 = vld [vmem:[#allocation8 + $0x80] sm:$0xff]   ;;  %v7190_v55 = vsel %vm5673_vm7, 4294967295, %v7189_v55  ;;  %v4825_v56 = vld [vmem:[#allocation8 + $0x138] sm:$0xff]   ;;  %v7194_v10 = vmov 0  ;;  %s3126_s22 = sadd.s32 %s3964_s16, %s3951_s8 }
  0xc5   : > { %4048 = vmatpush3.bf16.msra.mxu1 %v4802_v11  ;;  %3973 = vmatprep.subr.bf16.mxu0 %v4803_v12  ;;  %vm3404_vm1 = vmneg %vm5629_vm0  ;;  %v447_v36 = vld [vmem:[%s348_s20] sm:$0xff]   ;;  %v5649_v38 = vld [vmem:[%s348_s20 + $0x8] sm:$0xff]   ;;  %7191 = vst [vmem:[#allocation33_spill] sm:$0xff] %v7190_v55  ;;  %s3952_s0 = sshll.u32 %s3126_s22, 7  ;;  %s3113_s20 = scalar_lea.sflag [#allocation4], %s5594_s11 }
  0xc6   : > { %4049 = vmatprep.subr.bf16.mxu1 %v4804_v13  ;;  %vm5643_vm2 = vmpackc.low %vm3404_vm1, %vm3404_vm1  ;;  %v451_v40 = vunpack.c.l.bf16 %v447_v36  ;;  %v452_v41 = vunpack.c.h.bf16 %v447_v36  ;;  %v453_v42 = vunpack.c.l.bf16 %v5649_v38  ;;  %v454_v43 = vunpack.c.h.bf16 %v5649_v38  ;;  %v5666_v48 = vld [vmem:[%s5598_s18] sm:$0xff]   ;;  %v4827_v61 = vld [vmem:[#allocation8 + $0x170] sm:$0xff]   ;;  %s6990_s19 = scalar_lea.hbm %s7290_s30, %s3952_s0 }
  0xc7   : > { %v7187_v37 = vsel %vm5643_vm2, 4294967295, %v7186_v37  ;;  %3408 = vmatprep.mubr.msk.bf16.mxu0 %vm5643_vm2, %v447_v36  ;;  %v5678_v57 = vunpack.c.l.bf16 %v5666_v48  ;;  %v5689_v1 = vunpack.c.h.bf16 %v5666_v48  ;;  %v5692_v2 = vld [vmem:[%s5598_s18 + $0x8] sm:$0xff]   ;;  %vm5701_vm9 = vmpackc.low %vm3966_vm8, %vm5260_vm6  ;;  %v4828_v12 = vld [vmem:[#allocation8 + $0x130] sm:$0xff]  }
  0xc8   : > { %3974 = vmatpush3.bf16.msra.mxu0 %v4805_v14  ;;  %7188 = vst [vmem:[#allocation32_spill] sm:$0xff] %v7187_v37  ;;  %v467_v45 = vsel %vm5629_vm0, 0.0, %v451_v40  ;;  %v468_v46 = vsel %vm5629_vm0, 0.0, %v452_v41  ;;  %v469_v47 = vsel %vm5629_vm0, 0.0, %v453_v42  ;;  %v470_v53 = vsel %vm5629_vm0, 0.0, %v454_v43  ;;  %v5724_v18 = vld [vmem:[%s5598_s18 + $0x10] sm:$0xff]  }
  0xc9   : > { %4050 = vmatpush3.bf16.msra.mxu1 %v4806_v15  ;;  %3975 = vmatprep.subr.bf16.mxu0 %v4807_v16  ;;  %v482_v49 = vrot.slane %v467_v45, 7  ;;  %v492_v50 = vrot.slane %v468_v46, 7  ;;  %v565_v51 = vrot.slane %v467_v45, 1  ;;  %v575_v52 = vrot.slane %v468_v46, 1  ;;  %7192 = vst [vmem:[#allocation34_spill] sm:$0xff] %v5678_v57  ;;  %7193 = vst [vmem:[#allocation35_spill] sm:$0xff] %v5689_v1 }
  0xca   : > { %4051 = vmatprep.subr.bf16.mxu1 %v4808_v17  ;;  %v483_v54 = vrot.slane %v469_v47, 7  ;;  %v493_v58 = vrot.slane %v470_v53, 7  ;;  %v484_v6 = vrot.slane %v5678_v57, 7  ;;  %v566_v7 = vrot.slane %v469_v47, 1  ;;  %v4830_v15 = vld [vmem:[#allocation8 + $0x168] sm:$0xff]   ;;  %v4835_v36 = vld [vmem:[#allocation8 + $0x120] sm:$0xff]  }
  0xcb   : > { %v503_v59 = vsel %vm502_vm3, %v482_v49, %v492_v50  ;;  %v513_v60 = vsel %vm502_vm3, %v492_v50, %v482_v49  ;;  %v586_v63 = vsel %vm585_vm5, %v565_v51, %v575_v52  ;;  %v596_v0 = vsel %vm585_vm5, %v575_v52, %v565_v51  ;;  %v4831_v27 = vld [vmem:[#allocation8 + $0x128] sm:$0xff]   ;;  %v4841_v39 = vld [vmem:[#allocation8 + $0x1f8] sm:$0xff]   ;;  %v4844_v45 = vld [vmem:[#allocation8 + $0x1f0] sm:$0xff]  }
  0xcc   : > { %3976 = vmatpush3.bf16.msra.mxu0 %v4809_v19  ;;  %v3411_v62 = vpack.c.bf16 %v503_v59, %v513_v60  ;;  %v504_v3 = vsel %vm502_vm3, %v483_v54, %v493_v58  ;;  %v514_v4 = vsel %vm502_vm3, %v493_v58, %v483_v54  ;;  %v3460_v5 = vpack.c.bf16 %v596_v0, %v586_v63  ;;  %v4837_v43 = vld [vmem:[#allocation8 + $0x158] sm:$0xff]   ;;  %v4840_v51 = vld [vmem:[#allocation8 + $0x150] sm:$0xff]   ;;  %v4847_v58 = vld [vmem:[#allocation8 + $0x1e8] sm:$0xff]  }
  0xcd   : > { %4052 = vmatpush3.bf16.msra.mxu1 %v4810_v20  ;;  %3977 = vmatprep.subr.bf16.mxu0 %v4811_v21  ;;  %v576_v8 = vrot.slane %v470_v53, 1  ;;  %v3420_v9 = vpack.c.bf16 %v504_v3, %v514_v4  ;;  %v7195_v10 = vsel %vm5701_vm9, 4294967295, %v7194_v10  ;;  %v494_v11 = vrot.slane %v5689_v1, 7  ;;  %v4838_v46 = vld [vmem:[#allocation8 + $0x118] sm:$0xff]   ;;  %v4846_v52 = vld [vmem:[#allocation8 + $0x1b0] sm:$0xff]   ;;  %v4848_v4 = vld [vmem:[#allocation8 + $0x1a8] sm:$0xff]  }
  0xce   : > { %4053 = vmatprep.subr.bf16.mxu1 %v4812_v23  ;;  %7196 = vst [vmem:[#allocation36_spill] sm:$0xff] %v7195_v10  ;;  %v5712_v13 = vunpack.c.l.bf16 %v5692_v2  ;;  %v5715_v14 = vunpack.c.h.bf16 %v5692_v2  ;;  %v4842_v63 = vld [vmem:[#allocation8 + $0x110] sm:$0xff]  }
  0xcf   : > { %3457 = vmatprep.mubr.msk.bf16.mxu1 %vm5673_vm7, %v3420_v9  ;;  %v505_v16 = vsel %vm502_vm3, %v484_v6, %v494_v11  ;;  %v515_v17 = vsel %vm502_vm3, %v494_v11, %v484_v6  ;;  %v587_v23 = vsel %vm585_vm5, %v566_v7, %v576_v8  ;;  %v4849_v6 = vld [vmem:[#allocation8 + $0x148] sm:$0xff]  }
  0xd0   : > { %3978 = vmatpush3.bf16.msra.mxu0 %v4813_v24  ;;  %7197 = vst [vmem:[#allocation37_spill] sm:$0xff] %v5712_v13  ;;  %7198 = vst [vmem:[#allocation38_spill] sm:$0xff] %v5715_v14  ;;  %v5728_v19 = vpack.c.bf16 %v505_v16, %v515_v17  ;;  %v485_v20 = vrot.slane %v5712_v13, 7  ;;  %v495_v21 = vrot.slane %v5715_v14, 7  ;;  %v597_v24 = vsel %vm585_vm5, %v576_v8, %v566_v7  ;;  %v4851_v7 = vld [vmem:[#allocation8 + $0x1e0] sm:$0xff]   ;;  %v4850_v8 = vld [vmem:[#allocation8 + $0x108] sm:$0xff]  }
  0xd1   : > { %4054 = vmatpush3.bf16.msra.mxu1 %v4814_v25  ;;  %3979 = vmatprep.subr.bf16.mxu0 %v4815_v26  ;;  %v568_v60 = vrot.slane %v5712_v13, 1  ;;  %v4853_v16 = vld [vmem:[#allocation8 + $0x1a0] sm:$0xff]  }
  0xd2   : > { %4055 = vmatprep.subr.bf16.mxu1 %v4816_v28  ;;  %v506_v25 = vsel %vm502_vm3, %v485_v20, %v495_v21  ;;  %v516_v26 = vsel %vm502_vm3, %v495_v21, %v485_v20  ;;  %v5744_v28 = vunpack.c.l.bf16 %v5724_v18 }
  0xd3   : > { %v5759_v40 = vpack.c.bf16 %v506_v25, %v516_v26  ;;  %v5826_v25 = vld [vmem:[%s5598_s18 + $0x28] sm:$0xff]   ;;  %v4855_v26 = vld [vmem:[#allocation8 + $0x198] sm:$0xff]  }
  0xd4   : > { %3980 = vmatpush3.bf16.msra.mxu0 %v4817_v29  ;;  %7199 = vst [vmem:[#allocation39_spill] sm:$0xff] %v5744_v28  ;;  %v5747_v29 = vunpack.c.h.bf16 %v5724_v18  ;;  %v486_v41 = vrot.slane %v5744_v28, 7 }
  0xd5   : > { %4056 = vmatpush3.bf16.msra.mxu1 %v4818_v30  ;;  %3981 = vmatprep.subr.bf16.mxu0 %v4819_v31  ;;  %v567_v30 = vrot.slane %v5678_v57, 1  ;;  %v4833_v31 = vld [vmem:[#allocation8 + $0x160] sm:$0xff]  }
  0xd6   : > { %4057 = vmatprep.subr.bf16.mxu1 %v4820_v33  ;;  %7200 = vst [vmem:[#allocation40_spill] sm:$0xff] %v5747_v29  ;;  %v5751_v33 = vpack.c.bf16 %v597_v24, %v587_v23  ;;  %v496_v42 = vrot.slane %v5747_v29, 7  ;;  %v4854_v23 = vld [vmem:[#allocation8 + $0x1d8] sm:$0xff]   ;;  %v569_v24 = vrot.slane %v5744_v28, 1 }
  0xd8   : > { %3982 = vmatpush3.bf16.msra.mxu0 %v4821_v34  ;;  %v577_v34 = vrot.slane %v5689_v1, 1  ;;  %v507_v53 = vsel %vm502_vm3, %v486_v41, %v496_v42  ;;  %v517_v54 = vsel %vm502_vm3, %v496_v42, %v486_v41  ;;  %v4857_v42 = vld [vmem:[#allocation8 + $0x1d0] sm:$0xff]  }
  0xd9   : > { %4058 = vmatpush3.bf16.msra.mxu1 %v4822_v35  ;;  %4119 = vmatprep.subr.bf16.mxu0 %v4824_v44  ;;  %v5755_v35 = vld [vmem:[%s5598_s18 + $0x18] sm:$0xff]   ;;  %v5798_v0 = vpack.c.bf16 %v507_v53, %v517_v54  ;;  %v4860_v53 = vld [vmem:[#allocation8 + $0x190] sm:$0xff]  }
  0xda   : > { %v4843_v44 = vld [vmem:[#allocation8 + $0x1b8] sm:$0xff]   ;;  %4195 = vmatprep.subr.bf16.mxu1 %v4841_v39  ;;  %v588_v47 = vsel %vm585_vm5, %v567_v30, %v577_v34  ;;  %v598_v49 = vsel %vm585_vm5, %v577_v34, %v567_v30  ;;  %v5779_v50 = vunpack.c.l.bf16 %v5755_v35  ;;  %v7205_v30 = vmov 0 }
  0xdb   : > { %3412 = vmatmul.mubr.msk.bf16.vlgmr.msra.gmra.mxu0 %vm5673_vm7, %v3411_v62  ;;  %v5788_v59 = vpack.c.bf16 %v598_v49, %v588_v47  ;;  %v5793_v62 = vld [vmem:[%s5598_s18 + $0x20] sm:$0xff]   ;;  %v579_v34 = vrot.slane %v5747_v29, 1 }
  0xdc   : > { %4120 = vmatpush3.bf16.msra.mxu0 %v4825_v56  ;;  %3417 = vmatprep.mubr.msk.bf16.mxu0 %vm5643_vm2, %v5649_v38  ;;  %7201 = vst [vmem:[#allocation41_spill] sm:$0xff] %v5779_v50  ;;  %v5786_v56 = vunpack.c.h.bf16 %v5755_v35  ;;  %v487_v3 = vrot.slane %v5779_v50, 7  ;;  %v5822_v21 = vunpack.c.h.bf16 %v5793_v62  ;;  %v570_v47 = vrot.slane %v5779_v50, 1 }
  0xdd   : > { %4121 = vmatprep.subr.bf16.mxu0 %v4827_v61  ;;  %3461 = vmatmul.mubr.msk.bf16.vlgmr.msra.gmra.mxu1 %vm5701_vm9, %v3460_v5  ;;  %v578_v61 = vrot.slane %v5715_v14, 1  ;;  %v590_v49 = vsel %vm585_vm5, %v569_v24, %v579_v34  ;;  %v600_v54 = vsel %vm585_vm5, %v579_v34, %v569_v24  ;;  %v4862_v24 = vld [vmem:[#allocation8 + $0x188] sm:$0xff]   ;;  %v4863_v34 = vld [vmem:[#allocation8 + $0x1c0] sm:$0xff]  }
  0xde   : > { %3465 = vmatprep.mubr.msk.bf16.mxu1 %vm5673_vm7, %v5728_v19  ;;  %4196 = vmatpush3.bf16.msra.mxu1 %v4843_v44  ;;  %7202 = vst [vmem:[#allocation42_spill] sm:$0xff] %v5786_v56  ;;  %v497_v5 = vrot.slane %v5786_v56, 7  ;;  %7204 = vst [vmem:[#allocation44_spill] sm:$0xff] %v5822_v21 }
  0xdf   : > { %4197 = vmatprep.subr.bf16.mxu1 %v4844_v45  ;;  %v589_v11 = vsel %vm585_vm5, %v568_v60, %v578_v61  ;;  %v498_v45 = vrot.slane %v5822_v21, 7 }
  0xe0   : > { %4122 = vmatpush3.bf16.msra.mxu0 %v4828_v12  ;;  %v599_v12 = vsel %vm585_vm5, %v578_v61, %v568_v60  ;;  %v508_v17 = vsel %vm502_vm3, %v487_v3, %v497_v5  ;;  %v518_v20 = vsel %vm502_vm3, %v497_v5, %v487_v3  ;;  %v5871_v60 = vld [vmem:[%s5598_s18 + $0x30] sm:$0xff]   ;;  %v4861_v5 = vld [vmem:[#allocation8 + $0x1c8] sm:$0xff]  }
  0xe1   : > { %4123 = vmatprep.subr.bf16.mxu0 %v4830_v15  ;;  %v5815_v15 = vunpack.c.l.bf16 %v5793_v62  ;;  %v5842_v39 = vpack.c.bf16 %v508_v17, %v518_v20 }
  0xe2   : > { %4198 = vmatpush3.bf16.msra.mxu1 %v4846_v52 }
  0xe3   : > { %3421 = vmatmul.mubr.msk.bf16.gmra.mxu0 %vm5673_vm7, %v3420_v9  ;;  %4199 = vmatprep.subr.bf16.mxu1 %v4847_v58  ;;  %v473_v9 = vstv %s5769_s7  ;;  %7203 = vst [vmem:[#allocation43_spill] sm:$0xff] %v5815_v15  ;;  %v488_v41 = vrot.slane %v5815_v15, 7  ;;  %v5868_v58 = vunpack.c.h.bf16 %v5826_v25 }
  0xe4   : > { %1292 = vmatprep.mubr.bf16.mxu0 %v5666_v48  ;;  %4124 = vmatpush3.bf16.msra.mxu0 %v4831_v27  ;;  %v4856_v27 = vld [vmem:[#allocation8 + $0x140] sm:$0xff]   ;;  %vm5828_vm10 = vcmp.eq.s32.totalorder %v473_v9, 1  ;;  %v5887_v9 = vpack.c.bf16 %v600_v54, %v590_v49  ;;  %v581_v49 = vrot.slane %v5822_v21, 1 }
  0xe5   : > { %4125 = vmatprep.subr.bf16.mxu0 %v4833_v31  ;;  %3469 = vmatmul.mubr.msk.bf16.gmra.mxu1 %vm5701_vm9, %v5751_v33  ;;  %v7206_v30 = vsel %vm5828_vm10, 4294967295, %v7205_v30  ;;  %v5832_v31 = vpack.c.bf16 %v599_v12, %v589_v11  ;;  %7209 = vst [vmem:[#allocation47_spill] sm:$0xff] %v5868_v58  ;;  %v509_v3 = vsel %vm502_vm3, %v488_v41, %v498_v45  ;;  %v5890_v12 = vld [vmem:[#allocation8 + $0x238] sm:$0xff]   ;;  %vm3579_vm11 = vmneg %vm5828_vm10 }
  0xe6   : > { %3473 = vmatprep.mubr.msk.bf16.mxu1 %vm5673_vm7, %v5759_v40  ;;  %4200 = vmatpush3.bf16.msra.mxu1 %v4848_v4  ;;  %7207 = vst [vmem:[#allocation45_spill] sm:$0xff] %v7206_v30  ;;  %v519_v4 = vsel %vm502_vm3, %v498_v45, %v488_v41  ;;  %v5909_v41 = vunpack.c.h.bf16 %v5871_v60  ;;  %vm6109_vm12 = vmpackc.low %vm3579_vm11, %vm3579_vm11 }
  0xe7   : > { %4201 = vmatprep.subr.bf16.mxu1 %v4851_v7  ;;  %v580_v7 = vrot.slane %v5786_v56, 1  ;;  %v5899_v20 = vpack.c.bf16 %v509_v3, %v519_v4 }
  0xe8   : > { %4126 = vmatpush3.bf16.msra.mxu0 %v4835_v36  ;;  %v5837_v36 = vld [vmem:[%s357_s15] sm:$0xff]   ;;  %7211 = vst [vmem:[#allocation49_spill] sm:$0xff] %v5909_v41 }
  0xe9   : > { %4127 = vmatprep.subr.bf16.mxu0 %v4837_v43  ;;  %v459_v43 = vunpack.c.l.bf16 %v5837_v36  ;;  %v460_v44 = vunpack.c.h.bf16 %v5837_v36  ;;  %v601_v45 = vsel %vm585_vm5, %v580_v7, %v570_v47 }
  0xea   : > { %4202 = vmatpush3.bf16.msra.mxu1 %v4853_v16 }
  0xeb   : > { %3425 = vmatmul.mubr.msk.bf16.gmra.mxu0 %vm5673_vm7, %v5728_v19  ;;  %4203 = vmatprep.subr.bf16.mxu1 %v4854_v23  ;;  %v5860_v52 = vsel %vm5828_vm10, 0.0, %v459_v43  ;;  %v5875_v61 = vsel %vm5828_vm10, 0.0, %v460_v44  ;;  %v499_v23 = vrot.slane %v5868_v58, 7  ;;  %v591_v43 = vsel %vm585_vm5, %v570_v47, %v580_v7 }
  0xec   : > { %1300 = vmatprep.mubr.bf16.mxu0 %v5692_v2  ;;  %4128 = vmatpush3.bf16.msra.mxu0 %v4838_v46  ;;  %v4859_v46 = vld [vmem:[#allocation8 + $0x100] sm:$0xff]   ;;  %v571_v44 = vrot.slane %v5815_v15, 1  ;;  %v500_v47 = vrot.slane %v5909_v41, 7 }
  0xed   : > { %4129 = vmatprep.subr.bf16.mxu0 %v4840_v51  ;;  %3477 = vmatmul.mubr.msk.bf16.gmra.mxu1 %vm5701_vm9, %v5788_v59  ;;  %v5856_v51 = vunpack.c.l.bf16 %v5826_v25 }
  0xee   : > { %3481 = vmatprep.mubr.msk.bf16.mxu1 %vm5673_vm7, %v5798_v0  ;;  %4204 = vmatpush3.bf16.msra.mxu1 %v4855_v26 }
  0xef   : > { %7208 = vst [vmem:[#allocation46_spill] sm:$0xff] %v5856_v51  ;;  %4205 = vmatprep.subr.bf16.mxu1 %v4857_v42  ;;  %v489_v11 = vrot.slane %v5856_v51, 7  ;;  %v572_v3 = vrot.slane %v5856_v51, 1 }
  0xf0   : > { %4130 = vmatpush3.bf16.msra.mxu0 %v4842_v63  ;;  %v646_v63 = vrot.slane %v5860_v52, 1 }
  0xf1   : > { %4131 = vmatprep.subr.bf16.mxu0 %v4849_v6  ;;  %v647_v6 = vrot.slane %v5875_v61, 1  ;;  %v520_v54 = vsel %vm502_vm3, %v499_v23, %v489_v11 }
  0xf2   : > { %4206 = vmatpush3.bf16.msra.mxu1 %v4860_v53  ;;  %v4864_v53 = vld [vmem:[#allocation8 + $0x180] sm:$0xff]  }
  0xf3   : > { %3429 = vmatmul.mubr.msk.bf16.gmra.mxu0 %vm5673_vm7, %v5759_v40  ;;  %v648_v16 = vsel %vm585_vm5, %v646_v63, %v647_v6  ;;  %v649_v17 = vsel %vm585_vm5, %v647_v6, %v646_v63  ;;  %4207 = vmatprep.subr.bf16.mxu1 %v4861_v5  ;;  %v582_v5 = vrot.slane %v5868_v58, 1 }
  0xf4   : > { %1308 = vmatprep.mubr.bf16.mxu0 %v5724_v18  ;;  %4132 = vmatpush3.bf16.msra.mxu0 %v4850_v8  ;;  %v5885_v8 = vld [vmem:[%s5598_s18 + $0x38] sm:$0xff]   ;;  %v5902_v26 = vpack.c.bf16 %v649_v17, %v648_v16  ;;  %v5940_v16 = vpack.c.bf16 %v601_v45, %v591_v43  ;;  %s3129_s18 = sshll.u32 %s6902_s1, 4  ;;  %s6983_s18 = int_to_ptr.vmem [resolvable:$true] %s3129_s18 }
  0xf5   : > { %4133 = vmatprep.subr.bf16.mxu0 %v4856_v27  ;;  %3485 = vmatmul.mubr.msk.bf16.gmra.mxu1 %vm5701_vm9, %v5832_v31  ;;  %v5906_v27 = vunpack.c.l.bf16 %v5871_v60  ;;  %v5912_v42 = vunpack.c.l.bf16 %v5885_v8  ;;  %v5934_v4 = vunpack.c.h.bf16 %v5885_v8  ;;  %s5095_s14 = scalar_lea.vmem %s6983_s18, 2048  ;;  %p5102_p12 = scmp.lt.s32.totalorder %s6983_s18, %s5100_s21 }
  0xf6   : > { %3489 = vmatprep.mubr.msk.bf16.mxu1 %vm5673_vm7, %v5842_v39  ;;  %4208 = vmatpush3.bf16.msra.mxu1 %v4862_v24  ;;  %v638_v24 = vrot.slane %v5860_v52, 7  ;;  %v602_v52 = vsel %vm585_vm5, %v581_v49, %v571_v44  ;;  %p5096_p11 = scmp.ne.s32.totalorder %s6983_s18, %s5095_s14 }
  0xf7   : > { %7210 = vst [vmem:[#allocation48_spill] sm:$0xff] %v5906_v27  ;;  %7212 = vst [vmem:[#allocation50_spill] sm:$0xff] %v5912_v42  ;;  %v490_v63 = vrot.slane %v5906_v27, 7  ;;  %4209 = vmatprep.subr.bf16.mxu1 %v4863_v34  ;;  %v491_v6 = vrot.slane %v5912_v42, 7  ;;  %v573_v7 = vrot.slane %v5906_v27, 1  ;;  %v501_v17 = vrot.slane %v5934_v4, 7 }
  0xf8   : > { %4134 = vmatpush3.bf16.msra.mxu0 %v4859_v46  ;;  %v510_v46 = vsel %vm502_vm3, %v489_v11, %v499_v23  ;;  %7213 = vst [vmem:[#allocation51_spill] sm:$0xff] %v5934_v4  ;;  %v583_v23 = vrot.slane %v5909_v41, 1  ;;  %v639_v34 = vrot.slane %v5875_v61, 7  ;;  %v574_v43 = vrot.slane %v5912_v42, 1  ;;  %p5097_p13 = pnand %p5096_p11, %p7292_p1 }
  0xf9   : > { %4561 = vmatprep.subr.bf16.mxu0 %v5890_v12  ;;  %v5945_v11 = vpack.c.bf16 %v510_v46, %v520_v54  ;;  %v584_v45 = vrot.slane %v5934_v4, 1  ;;  %v592_v46 = vsel %vm585_vm5, %v571_v44, %v581_v49  ;;  %v511_v61 = vsel %vm502_vm3, %v490_v63, %v500_v47 }
  0xfa   : > { %4210 = vmatpush3.bf16.msra.mxu1 %v4864_v53  ;;  %v521_v53 = vsel %vm502_vm3, %v500_v47, %v490_v63  ;;  %v5968_v54 = vpack.c.bf16 %v602_v52, %v592_v46  ;;  %v593_v44 = vsel %vm585_vm5, %v572_v3, %v582_v5  ;;  %v603_v49 = vsel %vm585_vm5, %v582_v5, %v572_v3  ;;  %p5098_p9 = pneg %p5097_p13 }
  0xfb   : > { %3433 = vmatmul.mubr.msk.bf16.gmra.mxu0 %vm5673_vm7, %v5798_v0  ;;  %v5973_v41 = vpack.c.bf16 %v511_v61, %v521_v53  ;;  %v512_v63 = vsel %vm502_vm3, %v491_v6, %v501_v17  ;;  %v522_v47 = vsel %vm502_vm3, %v501_v17, %v491_v6  ;;  %v5990_v46 = vpack.c.bf16 %v603_v49, %v593_v44  ;;  %v4880_v44 = vld [vmem:[#allocation10 + $0x28] sm:$0xff]  }
  0xfc   : > { %1316 = vmatprep.mubr.bf16.mxu0 %v5755_v35  ;;  %v5995_v52 = vpack.c.bf16 %v512_v63, %v522_v47  ;;  %v594_v3 = vsel %vm585_vm5, %v573_v7, %v583_v23  ;;  %v604_v5 = vsel %vm585_vm5, %v583_v23, %v573_v7  ;;  %v640_v6 = vsel %vm502_vm3, %v638_v24, %v639_v34  ;;  %v4881_v47 = vld [vmem:[#allocation10 + $0x60] sm:$0xff]  }
  0xfd   : > { %3493 = vmatmul.mubr.msk.bf16.gmra.mxu1 %vm5701_vm9, %v5887_v9  ;;  %v641_v17 = vsel %vm502_vm3, %v639_v34, %v638_v24  ;;  %v6012_v61 = vpack.c.bf16 %v604_v5, %v594_v3  ;;  %v595_v7 = vsel %vm585_vm5, %v574_v43, %v584_v45  ;;  %v605_v23 = vsel %vm585_vm5, %v584_v45, %v574_v43  ;;  %v4866_v34 = vld [vmem:[#allocation8 + $0x230] sm:$0xff]   ;;  %v4867_v43 = vld [vmem:[#allocation8 + $0x228] sm:$0xff]  }
  0xfe   : > { %3497 = vmatprep.mubr.msk.bf16.mxu1 %vm5673_vm7, %v5899_v20  ;;  %v6017_v53 = vpack.c.bf16 %v640_v6, %v641_v17  ;;  %v6030_v24 = vpack.c.bf16 %v605_v23, %v595_v7  ;;  %v4879_v45 = vld [vmem:[#allocation10 + $0x68] sm:$0xff]  }
 0x103   : > { %3437 = vmatmul.mubr.msk.bf16.gmra.mxu0 %vm5673_vm7, %v5842_v39 }
 0x104   : > { %1324 = vmatprep.mubr.bf16.mxu0 %v5793_v62 }
 0x105   : > { %3501 = vmatmul.mubr.msk.bf16.gmra.mxu1 %vm5701_vm9, %v5940_v16 }
 0x106   : > { %3505 = vmatprep.mubr.msk.bf16.mxu1 %vm5673_vm7, %v5945_v11 }
 0x10b   : > { %3441 = vmatmul.mubr.msk.bf16.gmra.mxu0 %vm5673_vm7, %v5899_v20 }
 0x10c   : > { %1332 = vmatprep.mubr.bf16.mxu0 %v5826_v25 }
 0x10d   : > { %3509 = vmatmul.mubr.msk.bf16.gmra.mxu1 %vm5701_vm9, %v5968_v54 }
 0x10e   : > { %3513 = vmatprep.mubr.msk.bf16.mxu1 %vm5673_vm7, %v5973_v41 }
 0x113   : > { %3445 = vmatmul.mubr.msk.bf16.gmra.mxu0 %vm5673_vm7, %v5945_v11 }
 0x114   : > { %1340 = vmatprep.mubr.bf16.mxu0 %v5871_v60 }
 0x115   : > { %3517 = vmatmul.mubr.msk.bf16.gmra.mxu1 %vm5701_vm9, %v5990_v46 }
 0x116   : > { %3521 = vmatprep.mubr.msk.bf16.mxu1 %vm5673_vm7, %v5995_v52 }
 0x11b   : > { %3449 = vmatmul.mubr.msk.bf16.gmra.mxu0 %vm5673_vm7, %v5973_v41 }
 0x11c   : > { %1348 = vmatprep.mubr.bf16.mxu0 %v5885_v8 }
 0x11d   : > { %3525 = vmatmul.mubr.msk.bf16.gmra.mxu1 %vm5701_vm9, %v6012_v61 }
 0x11e   : > { %3529 = vmatprep.mubr.msk.bf16.mxu1 %vm5673_vm7, %v6017_v53 }
 0x123   : > { %3453 = vmatmul.mubr.msk.bf16.gmra.mxu0 %vm5673_vm7, %v5995_v52 }
 0x124   : > { %3537 = vmatprep.mubr.msk.bf16.mxu0 %vm5701_vm9, %v5751_v33  ;;  %v4868_v33 = vld [vmem:[#allocation8 + $0x220] sm:$0xff]  }
 0x125   : > { %3533 = vmatmul.mubr.msk.bf16.gmra.mxu1 %vm5701_vm9, %v6030_v24 }
 0x126   : > { %1615 = vmatprep.mubr.bf16.mxu1 %v5666_v48 }
 0x12b   : > { %3542 = vmatmul.mubr.msk.bf16.vlgmr.msra.gmra.mxu0 %vm5643_vm2, %v5649_v38  ;;  %v4869_v38 = vld [vmem:[#allocation8 + $0x218] sm:$0xff]  }
 0x12c   : > { %4562 = vmatpush3.bf16.msra.mxu0 %v5890_v12  ;;  %3546 = vmatprep.mubr.msk.bf16.mxu0 %vm5701_vm9, %v5788_v59 }
 0x12d   : > { %4563 = vmatprep.subr.bf16.mxu0 %v4866_v34  ;;  %3587 = vmatmul.mubr.msk.bf16.vlgmr.msra.gmra.mxu1 %vm5673_vm7, %v5728_v19  ;;  %v4870_v19 = vld [vmem:[#allocation8 + $0x210] sm:$0xff]  }
 0x12e   : > { %1623 = vmatprep.mubr.bf16.mxu1 %v5692_v2 }
 0x130   : > { %4564 = vmatpush3.bf16.msra.mxu0 %v4866_v34 }
 0x131   : > { %4565 = vmatprep.subr.bf16.mxu0 %v4867_v43 }
 0x133   : > { %1511 = vmatmul.mubr.bf16.gmra.mxu0 %v5666_v48  ;;  %v4871_v48 = vld [vmem:[#allocation8 + $0x208] sm:$0xff]  }
 0x134   : > { %3550 = vmatprep.mubr.msk.bf16.mxu0 %vm5701_vm9, %v5832_v31  ;;  %4566 = vmatpush3.bf16.msra.mxu0 %v4867_v43 }
 0x135   : > { %4567 = vmatprep.subr.bf16.mxu0 %v4868_v33  ;;  %3591 = vmatmul.mubr.msk.bf16.gmra.mxu1 %vm5673_vm7, %v5759_v40  ;;  %v4873_v40 = vld [vmem:[#allocation8 + $0x200] sm:$0xff]  }
 0x136   : > { %1631 = vmatprep.mubr.bf16.mxu1 %v5724_v18 }
 0x138   : > { %4568 = vmatpush3.bf16.msra.mxu0 %v4868_v33 }
 0x139   : > { %4569 = vmatprep.subr.bf16.mxu0 %v4869_v38 }
 0x13b   : > { %1519 = vmatmul.mubr.bf16.gmra.mxu0 %v5692_v2  ;;  %v457_v2 = vld [vmem:[%s357_s15 + $0x8] sm:$0xff]   ;;  %s5101_s15 = scalar_lea.vmem %s5100_s21, 4096 }
 0x13c   : > { %3554 = vmatprep.mubr.msk.bf16.mxu0 %vm5701_vm9, %v5887_v9  ;;  %4570 = vmatpush3.bf16.msra.mxu0 %v4869_v38  ;;  %v4883_v38 = vld [vmem:[#allocation10 + $0x58] sm:$0xff]   ;;  %p5103_p5 = scmp.lt.s32.totalorder %s5101_s15, %s5095_s14 }
 0x13d   : > { %4571 = vmatprep.subr.bf16.mxu0 %v4870_v19  ;;  %3595 = vmatmul.mubr.msk.bf16.gmra.mxu1 %vm5673_vm7, %v5798_v0 }
 0x13e   : > { %1639 = vmatprep.mubr.bf16.mxu1 %v5755_v35  ;;  %p5104_p7 = por %p5103_p5, %p5102_p12 }
 0x140   : > { %4572 = vmatpush3.bf16.msra.mxu0 %v4870_v19  ;;  %p5105_p3 = pnand %p5104_p7, %p5098_p9 }
 0x141   : > { %4573 = vmatprep.subr.bf16.mxu0 %v4871_v48 }
 0x143   : > { %1527 = vmatmul.mubr.bf16.gmra.mxu0 %v5724_v18  ;;  %v7214_v18 = vmov 0 }
 0x144   : > { %3558 = vmatprep.mubr.msk.bf16.mxu0 %vm5701_vm9, %v5940_v16  ;;  %4574 = vmatpush3.bf16.msra.mxu0 %v4871_v48  ;;  %v7215_v18 = vsel %vm6109_vm12, 4294967295, %v7214_v18 }
 0x145   : > { %4575 = vmatprep.subr.bf16.mxu0 %v4873_v40  ;;  %3599 = vmatmul.mubr.msk.bf16.gmra.mxu1 %vm5673_vm7, %v5842_v39  ;;  %7216 = vst [vmem:[#allocation52_spill] sm:$0xff] %v7215_v18 }
 0x146   : > { %1647 = vmatprep.mubr.bf16.mxu1 %v5793_v62 }
 0x148   : > { %4576 = vmatpush3.bf16.msra.mxu0 %v4873_v40 }
 0x14b   : > { %1535 = vmatmul.mubr.bf16.gmra.mxu0 %v5755_v35  ;;  %v461_v35 = vunpack.c.l.bf16 %v457_v2 }
 0x14c   : > { %3562 = vmatprep.mubr.msk.bf16.mxu0 %vm5701_vm9, %v5968_v54 }
 0x14d   : > { %3603 = vmatmul.mubr.msk.bf16.gmra.mxu1 %vm5673_vm7, %v5899_v20  ;;  %v477_v0 = vsel %vm5828_vm10, 0.0, %v461_v35 }
 0x14e   : > { %1655 = vmatprep.mubr.bf16.mxu1 %v5826_v25  ;;  %v653_v39 = vrot.slane %v477_v0, 7 }
 0x153   : > { %1543 = vmatmul.mubr.bf16.gmra.mxu0 %v5793_v62  ;;  %v462_v62 = vunpack.c.h.bf16 %v457_v2 }
 0x154   : > { %3566 = vmatprep.mubr.msk.bf16.mxu0 %vm5701_vm9, %v5990_v46 }
 0x155   : > { %3607 = vmatmul.mubr.msk.bf16.gmra.mxu1 %vm5673_vm7, %v5945_v11  ;;  %v4876_v11 = vld [vmem:[#allocation10 + $0x38] sm:$0xff]  }
 0x156   : > { %1663 = vmatprep.mubr.bf16.mxu1 %v5871_v60 }
 0x15b   : > { %1551 = vmatmul.mubr.bf16.gmra.mxu0 %v5826_v25  ;;  %v478_v25 = vsel %vm5828_vm10, 0.0, %v462_v62  ;;  %v4884_v62 = vld [vmem:[#allocation10 + $0x18] sm:$0xff]  }
 0x15c   : > { %3570 = vmatprep.mubr.msk.bf16.mxu0 %vm5701_vm9, %v6012_v61 }
 0x15d   : > { %3611 = vmatmul.mubr.msk.bf16.gmra.mxu1 %vm5673_vm7, %v5973_v41  ;;  %v4875_v41 = vld [vmem:[#allocation10 + $0x78] sm:$0xff]  }
 0x15e   : > { %1671 = vmatprep.mubr.bf16.mxu1 %v5885_v8  ;;  %4289 = vmatprep.subr.bf16.mxu1 %v4875_v41 }
 0x15f   : > { %4290 = vmatpush3.bf16.msra.mxu1 %v4876_v11 }
 0x163   : > { %1559 = vmatmul.mubr.bf16.gmra.mxu0 %v5871_v60  ;;  %v654_v60 = vrot.slane %v478_v25, 7 }
 0x164   : > { %3574 = vmatprep.mubr.msk.bf16.mxu0 %vm5701_vm9, %v6030_v24 }
 0x165   : > { %3615 = vmatmul.mubr.msk.bf16.gmra.mxu1 %vm5673_vm7, %v5995_v52  ;;  %v655_v12 = vsel %vm502_vm3, %v653_v39, %v654_v60  ;;  %v656_v20 = vsel %vm502_vm3, %v654_v60, %v653_v39  ;;  %v4882_v52 = vld [vmem:[#allocation10 + $0x20] sm:$0xff]  }
 0x166   : > { %3620 = vmatprep.mubr.msk.bf16.mxu1 %vm6109_vm12, %v5837_v36 }
 0x16b   : > { %1567 = vmatmul.mubr.bf16.gmra.mxu0 %v5885_v8  ;;  %v3632_v8 = vpack.c.bf16 %v655_v12, %v656_v20 }
 0x16c   : > { %3578 = vmatprep.mubr.msk.bf16.mxu0 %vm5701_vm9, %v5902_v26 }
 0x16d   : > { %3624 = vmatmul.mubr.msk.bf16.gmra.mxu1 %vm5673_vm7, %v6017_v53 }
 0x16e   : > { %3629 = vmatprep.mubr.msk.bf16.mxu1 %vm6109_vm12, %v457_v2 }
 0x173   : > { %3583 = vmatmul.mubr.msk.bf16.gmra.mxu0 %vm6109_vm12, %v5837_v36  ;;  %v4878_v36 = vld [vmem:[#allocation10 + $0x30] sm:$0xff]  }
 0x174   : > { %4577 = vmatprep.mubr.msk.bf16.mxu0 %vm5701_vm9, %v5788_v59  ;;  %v4877_v59 = vld [vmem:[#allocation10 + $0x70] sm:$0xff]  }
 0x175   : > { %3633 = vmatmul.mubr.msk.bf16.gmra.mxu1 %vm5673_vm7, %v3632_v8  ;;  %4291 = vmatprep.subr.bf16.mxu1 %v4877_v59  ;;  %v4885_v59 = vld [vmem:[#allocation10 + $0xf8] sm:$0xff]  }
 0x176   : > { %4292 = vmatpush3.bf16.msra.mxu1 %v4878_v36  ;;  %4353 = vmatprep.subr.bf16.mxu0 %v4885_v59 }
 0x177   : > { %4293 = vmatprep.subr.bf16.mxu1 %v4879_v45 }
 0x17a   : > { %4294 = vmatpush3.bf16.msra.mxu1 %v4880_v44  ;;  %v4887_v44 = vld [vmem:[#allocation10 + $0x50] sm:$0xff]  }
 0x17b   : > { %4578 = vmatmul.mubr.msk.bf16.vlgmr.msra.gmra.mxu0 %vm5701_vm9, %v5832_v31  ;;  %v661_v31 = vrot.slane %v477_v0, 1  ;;  %4295 = vmatprep.subr.bf16.mxu1 %v4881_v47  ;;  %v4888_v47 = vld [vmem:[#allocation10 + $0x10] sm:$0xff]  }
 0x17c   : > { %4581 = vmatprep.mubr.msk.bf16.mxu0 %vm5701_vm9, %v5887_v9  ;;  %v662_v9 = vrot.slane %v478_v25, 1 }
 0x17e   : > { %4296 = vmatpush3.bf16.msra.mxu1 %v4882_v52 }
 0x17f   : > { %4297 = vmatprep.subr.bf16.mxu1 %v4883_v38 }
 0x182   : > { %4298 = vmatpush3.bf16.msra.mxu1 %v4884_v62  ;;  %v4894_v62 = vld [vmem:[#allocation10 + $0xe0] sm:$0xff]  }
 0x183   : > { %4582 = vmatmul.mubr.msk.bf16.gmra.mxu0 %vm5701_vm9, %v5940_v16  ;;  %v663_v16 = vsel %vm585_vm5, %v661_v31, %v662_v9  ;;  %4299 = vmatprep.subr.bf16.mxu1 %v4887_v44 }
 0x184   : > { %4585 = vmatprep.mubr.msk.bf16.mxu0 %vm5701_vm9, %v5968_v54  ;;  %v664_v54 = vsel %vm585_vm5, %v662_v9, %v661_v31  ;;  %v4886_v9 = vld [vmem:[#allocation10 + $0xb8] sm:$0xff]  }
 0x185   : > { %v3672_v49 = vpack.c.bf16 %v664_v54, %v663_v16  ;;  %4354 = vmatpush3.bf16.msra.mxu0 %v4886_v9 }
 0x186   : > { %4300 = vmatpush3.bf16.msra.mxu1 %v4888_v47 }
 0x18b   : > { %4586 = vmatmul.mubr.msk.bf16.gmra.mxu0 %vm5701_vm9, %v5990_v46 }
 0x18c   : > { %4589 = vmatprep.mubr.msk.bf16.mxu0 %vm5701_vm9, %v6012_v61 }
 0x193   : > { %4590 = vmatmul.mubr.msk.bf16.gmra.mxu0 %vm5701_vm9, %v6030_v24 }
 0x194   : > { %4593 = vmatprep.mubr.msk.bf16.mxu0 %vm5701_vm9, %v5902_v26 }
 0x19b   : > { %v3983_v63 = vpop.f32.mrf.mxu0  ;;  %4594 = vmatmul.mubr.msk.bf16.gmra.mxu0 %vm5701_vm9, %v3672_v49 }
 0x19d   : > { %v3984_v46 = vpop.f32.mrf.mxu0  ;;  %v4059_v3 = vpop.f32.mrf.mxu1 }
 0x19e   : > { %v3985_v5 = vadd.f32 %v3984_v46, %v3983_v63  ;;  %v4889_v46 = vld [vmem:[#allocation10 + $0xf0] sm:$0xff]  }
 0x19f   : > { %v3986_v26 = vpop.f32.mrf.mxu0  ;;  %v4060_v6 = vpop.f32.mrf.mxu1  ;;  %4355 = vmatprep.subr.bf16.mxu0 %v4889_v46  ;;  %v4899_v46 = vld [vmem:[#allocation10 + $0xd0] sm:$0xff]  }
 0x1a0   : > { %v4061_v17 = vadd.f32 %v4060_v6, %v4059_v3  ;;  %v4890_v3 = vld [vmem:[#allocation10 + $0xb0] sm:$0xff]  }
 0x1a1   : > { %v3987_v61 = vpop.f32.mrf.mxu0  ;;  %v4062_v53 = vpop.f32.mrf.mxu1  ;;  %4356 = vmatpush3.bf16.msra.mxu0 %v4890_v3  ;;  %v4900_v3 = vld [vmem:[#allocation10 + $0x90] sm:$0xff]  }
 0x1a2   : > { %v6174_v7 = vadd.f32 %v4061_v17, %v3985_v5  ;;  %v3988_v23 = vadd.f32 %v3987_v61, %v3986_v26 }
 0x1a3   : > { %v3989_v24 = vpop.f32.mrf.mxu0  ;;  %v4063_v34 = vpop.f32.mrf.mxu1 }
 0x1a4   : > { %v4064_v43 = vadd.f32 %v4063_v34, %v4062_v53 }
 0x1a5   : > { %v3990_v33 = vpop.f32.mrf.mxu0  ;;  %v4065_v19 = vpop.f32.mrf.mxu1 }
 0x1a6   : > { %v3991_v48 = vadd.f32 %v3990_v33, %v3989_v24  ;;  %v6176_v40 = vadd.f32 %v4064_v43, %v3988_v23  ;;  %v4891_v23 = vld [vmem:[#allocation10 + $0xe8] sm:$0xff]  }
 0x1a7   : > { %v3992_v2 = vpop.f32.mrf.mxu0  ;;  %v4066_v35 = vpop.f32.mrf.mxu1  ;;  %v4892_v43 = vld [vmem:[#allocation10 + $0xa8] sm:$0xff]   ;;  %4357 = vmatprep.subr.bf16.mxu0 %v4891_v23 }
 0x1a8   : > { %v4067_v0 = vadd.f32 %v4066_v35, %v4065_v19  ;;  %4358 = vmatpush3.bf16.msra.mxu0 %v4892_v43  ;;  %v4893_v35 = vld [vmem:[#allocation10 + $0x48] sm:$0xff]  }
 0x1a9   : > { %v3993_v25 = vpop.f32.mrf.mxu0  ;;  %v4068_v39 = vpop.f32.mrf.mxu1  ;;  %4301 = vmatprep.subr.bf16.mxu1 %v4893_v35  ;;  %4359 = vmatprep.subr.bf16.mxu0 %v4894_v62 }
 0x1aa   : > { %v6178_v60 = vadd.f32 %v4067_v0, %v3991_v48  ;;  %v3994_v12 = vadd.f32 %v3993_v25, %v3992_v2  ;;  %v4896_v25 = vld [vmem:[#allocation10 + $0xa0] sm:$0xff]  }
 0x1ab   : > { %v3995_v20 = vpop.f32.mrf.mxu0  ;;  %v4069_v8 = vpop.f32.mrf.mxu1 }
 0x1ac   : > { %v4070_v41 = vadd.f32 %v4069_v8, %v4068_v39  ;;  %4360 = vmatpush3.bf16.msra.mxu0 %v4896_v25  ;;  %v4905_v25 = vld [vmem:[#allocation10 + $0xc0] sm:$0xff]  }
 0x1ad   : > { %v3996_v11 = vpop.f32.mrf.mxu0  ;;  %v4071_v36 = vpop.f32.mrf.mxu1 }
 0x1ae   : > { %v3997_v31 = vadd.f32 %v3996_v11, %v3995_v20  ;;  %v6180_v45 = vadd.f32 %v4070_v41, %v3994_v12  ;;  %v4895_v41 = vld [vmem:[#allocation10 + $0x8] sm:$0xff]  }
 0x1af   : > { %v3998_v16 = vpop.f32.mrf.mxu0  ;;  %v4072_v54 = vpop.f32.mrf.mxu1  ;;  %4302 = vmatpush3.bf16.msra.mxu1 %v4895_v41 }
 0x1b0   : > { %v4073_v49 = vadd.f32 %v4072_v54, %v4071_v36  ;;  %v4897_v36 = vld [vmem:[#allocation10 + $0xd8] sm:$0xff]  }
 0x1b1   : > { %v3999_v63 = vpop.f32.mrf.mxu0  ;;  %v4074_v52 = vpop.f32.mrf.mxu1  ;;  %4361 = vmatprep.subr.bf16.mxu0 %v4897_v36 }
 0x1b2   : > { %v6182_v5 = vadd.f32 %v4073_v49, %v3997_v31  ;;  %v4000_v26 = vadd.f32 %v3999_v63, %v3998_v16  ;;  %v4898_v16 = vld [vmem:[#allocation10 + $0x98] sm:$0xff]  }
 0x1b3   : > { %v4001_v6 = vpop.f32.mrf.mxu0  ;;  %v4075_v17 = vpop.f32.mrf.mxu1  ;;  %4362 = vmatpush3.bf16.msra.mxu0 %v4898_v16 }
 0x1b4   : > { %v4076_v61 = vadd.f32 %v4075_v17, %v4074_v52  ;;  %4363 = vmatprep.subr.bf16.mxu0 %v4899_v46  ;;  %v4907_v46 = vld [vmem:[#allocation10 + $0x178] sm:$0xff]  }
 0x1b5   : > { %v4002_v53 = vpop.f32.mrf.mxu0  ;;  %v4077_v24 = vpop.f32.mrf.mxu1 }
 0x1b6   : > { %v4003_v34 = vadd.f32 %v4002_v53, %v4001_v6  ;;  %v6184_v33 = vadd.f32 %v4076_v61, %v4000_v26 }
 0x1b7   : > { %v4004_v38 = vpop.f32.mrf.mxu0  ;;  %v4078_v19 = vpop.f32.mrf.mxu1  ;;  %4364 = vmatpush3.bf16.msra.mxu0 %v4900_v3 }
 0x1b8   : > { %v4079_v48 = vadd.f32 %v4078_v19, %v4077_v24  ;;  %v4903_v24 = vld [vmem:[#allocation10 + $0xc8] sm:$0xff]  }
 0x1b9   : > { %v4005_v2 = vpop.f32.mrf.mxu0  ;;  %v4080_v0 = vpop.f32.mrf.mxu1  ;;  %4365 = vmatprep.subr.bf16.mxu0 %v4903_v24 }
 0x1ba   : > { %v6186_v39 = vadd.f32 %v4079_v48, %v4003_v34  ;;  %v4006_v12 = vadd.f32 %v4005_v2, %v4004_v38  ;;  %v4904_v38 = vld [vmem:[#allocation10 + $0x88] sm:$0xff]  }
 0x1bb   : > { %v4007_v20 = vpop.f32.mrf.mxu0  ;;  %v4081_v8 = vpop.f32.mrf.mxu1  ;;  %4366 = vmatpush3.bf16.msra.mxu0 %v4904_v38 }
 0x1bc   : > { %v4082_v11 = vadd.f32 %v4081_v8, %v4080_v0  ;;  %v4901_v0 = vld [vmem:[#allocation10 + $0x40] sm:$0xff]   ;;  %4367 = vmatprep.subr.bf16.mxu0 %v4905_v25 }
 0x1bd   : > { %v4008_v59 = vpop.f32.mrf.mxu0  ;;  %v4083_v31 = vpop.f32.mrf.mxu1  ;;  %v4906_v8 = vld [vmem:[#allocation10 + $0x80] sm:$0xff]   ;;  %4303 = vmatprep.subr.bf16.mxu1 %v4901_v0 }
 0x1be   : > { %v4009_v9 = vadd.f32 %v4008_v59, %v4007_v20  ;;  %v6188_v54 = vadd.f32 %v4082_v11, %v4006_v12  ;;  %v4902_v20 = vld [vmem:[#allocation10] sm:$0xff]  }
 0x1bf   : > { %v4010_v44 = vpop.f32.mrf.mxu0  ;;  %v4084_v49 = vpop.f32.mrf.mxu1  ;;  %4304 = vmatpush3.bf16.msra.mxu1 %v4902_v20  ;;  %4368 = vmatpush3.bf16.msra.mxu0 %v4906_v8 }
 0x1c0   : > { %v4085_v63 = vadd.f32 %v4084_v49, %v4083_v31  ;;  %4417 = vmatprep.subr.bf16.mxu1 %v4907_v46 }
 0x1c1   : > { %v4011_v47 = vpop.f32.mrf.mxu0  ;;  %v4086_v52 = vpop.f32.mrf.mxu1 }
 0x1c2   : > { %v6190_v26 = vadd.f32 %v4085_v63, %v4009_v9  ;;  %v4012_v6 = vadd.f32 %v4011_v47, %v4010_v44 }
 0x1c3   : > { %v4013_v17 = vpop.f32.mrf.mxu0  ;;  %v4087_v61 = vpop.f32.mrf.mxu1 }
 0x1c4   : > { %v4088_v53 = vadd.f32 %v4087_v61, %v4086_v52 }
 0x1c5   : > { %v4014_v23 = vpop.f32.mrf.mxu0  ;;  %v4089_v34 = vpop.f32.mrf.mxu1 }
 0x1c6   : > { %v4015_v43 = vadd.f32 %v4014_v23, %v4013_v17  ;;  %v6192_v19 = vadd.f32 %v4088_v53, %v4012_v6 }
 0x1c7   : > { %v4016_v48 = vpop.f32.mrf.mxu0  ;;  %v4090_v2 = vpop.f32.mrf.mxu1 }
 0x1c8   : > { %v4091_v35 = vadd.f32 %v4090_v2, %v4089_v34 }
 0x1c9   : > { %v4017_v62 = vpop.f32.mrf.mxu0  ;;  %v4092_v12 = vpop.f32.mrf.mxu1 }
 0x1ca   : > { %v6194_v41 = vadd.f32 %v4091_v35, %v4015_v43  ;;  %v4018_v11 = vadd.f32 %v4017_v62, %v4016_v48 }
 0x1cb   : > { %v4019_v59 = vpop.f32.mrf.mxu0  ;;  %v4093_v36 = vpop.f32.mrf.mxu1 }
 0x1cc   : > { %v4094_v31 = vadd.f32 %v4093_v36, %v4092_v12 }
 0x1cd   : > { %v4020_v9 = vpop.f32.mrf.mxu0  ;;  %v4095_v16 = vpop.f32.mrf.mxu1 }
 0x1ce   : > { %v4021_v44 = vadd.f32 %v4020_v9, %v4019_v59  ;;  %v6196_v49 = vadd.f32 %v4094_v31, %v4018_v11 }
 0x1cf   : > { %v4022_v63 = vpop.f32.mrf.mxu0  ;;  %v4096_v47 = vpop.f32.mrf.mxu1 }
 0x1d0   : > { %v4097_v52 = vadd.f32 %v4096_v47, %v4095_v16 }
 0x1d1   : > { %v4023_v3 = vpop.f32.mrf.mxu0  ;;  %v4098_v6 = vpop.f32.mrf.mxu1 }
 0x1d2   : > { %v6198_v17 = vadd.f32 %v4097_v52, %v4021_v44  ;;  %v4024_v61 = vadd.f32 %v4023_v3, %v4022_v63 }
 0x1d3   : > { %v4025_v53 = vpop.f32.mrf.mxu0  ;;  %v4099_v23 = vpop.f32.mrf.mxu1 }
 0x1d4   : > { %v4100_v24 = vadd.f32 %v4099_v23, %v4098_v6 }
 0x1d5   : > { %v4026_v34 = vpop.f32.mrf.mxu0  ;;  %v4101_v43 = vpop.f32.mrf.mxu1 }
 0x1d6   : > { %v4027_v38 = vadd.f32 %v4026_v34, %v4025_v53  ;;  %v6200_v48 = vadd.f32 %v4100_v24, %v4024_v61 }
 0x1d7   : > { %v4028_v2 = vpop.f32.mrf.mxu0  ;;  %v4102_v35 = vpop.f32.mrf.mxu1 }
 0x1d8   : > { %v4103_v62 = vadd.f32 %v4102_v35, %v4101_v43 }
 0x1d9   : > { %v4029_v0 = vpop.f32.mrf.mxu0  ;;  %v4104_v25 = vpop.f32.mrf.mxu1 }
 0x1da   : > { %v6202_v12 = vadd.f32 %v4103_v62, %v4027_v38  ;;  %v4030_v20 = vadd.f32 %v4029_v0, %v4028_v2 }
 0x1db   : > { %v4031_v8 = vpop.f32.mrf.mxu0  ;;  %v4105_v11 = vpop.f32.mrf.mxu1 }
 0x1dc   : > { %v4106_v59 = vadd.f32 %v4105_v11, %v4104_v25 }
 0x1dd   : > { %v4032_v36 = vpop.f32.mrf.mxu0  ;;  %v4107_v31 = vpop.f32.mrf.mxu1 }
 0x1de   : > { %v4033_v9 = vadd.f32 %v4032_v36, %v4031_v8  ;;  %v6204_v16 = vadd.f32 %v4106_v59, %v4030_v20  ;;  %v4915_v20 = vld [vmem:[#allocation10 + $0x1f8] sm:$0xff]  }
 0x1df   : > { %v4034_v44 = vpop.f32.mrf.mxu0  ;;  %v4108_v63 = vpop.f32.mrf.mxu1  ;;  %4481 = vmatprep.subr.bf16.mxu0 %v4915_v20 }
 0x1e0   : > { %v4109_v47 = vadd.f32 %v4108_v63, %v4107_v31 }
 0x1e1   : > { %v4035_v46 = vpop.f32.mrf.mxu0  ;;  %v4110_v52 = vpop.f32.mrf.mxu1 }
 0x1e2   : > { %v6206_v3 = vadd.f32 %v4109_v47, %v4033_v9  ;;  %v4036_v6 = vadd.f32 %v4035_v46, %v4034_v44 }
 0x1e3   : > { %v4037_v61 = vpop.f32.mrf.mxu0  ;;  %v4111_v53 = vpop.f32.mrf.mxu1 }
 0x1e4   : > { %v4112_v23 = vadd.f32 %v4111_v53, %v4110_v52 }
 0x1e5   : > { %v4038_v24 = vpop.f32.mrf.mxu0  ;;  %v4113_v34 = vpop.f32.mrf.mxu1 }
 0x1e6   : > { %v4039_v43 = vadd.f32 %v4038_v24, %v4037_v61  ;;  %v6208_v38 = vadd.f32 %v4112_v23, %v4036_v6 }
 0x1e7   : > { %v4040_v2 = vpop.f32.mrf.mxu0  ;;  %v4114_v35 = vpop.f32.mrf.mxu1 }
 0x1e8   : > { %v4115_v62 = vadd.f32 %v4114_v35, %v4113_v34 }
 0x1e9   : > { %v4041_v0 = vpop.f32.mrf.mxu0  ;;  %v4116_v25 = vpop.f32.mrf.mxu1 }
 0x1ea   : > { %v6210_v8 = vadd.f32 %v4115_v62, %v4039_v43  ;;  %v4042_v11 = vadd.f32 %v4041_v0, %v4040_v2 }
 0x1eb   : > { %v4135_v59 = vpop.f32.mrf.mxu0  ;;  %v4117_v36 = vpop.f32.mrf.mxu1 }
 0x1ec   : > { %v4118_v31 = vadd.f32 %v4117_v36, %v4116_v25 }
 0x1ed   : > { %v4136_v9 = vpop.f32.mrf.mxu0  ;;  %v6212_v63 = vpop.f32.mrf.mxu1 }
 0x1ee   : > { %v4137_v44 = vadd.f32 %v4136_v9, %v4135_v59  ;;  %v6214_v47 = vadd.f32 %v4118_v31, %v4042_v11 }
 0x1ef   : > { %v4138_v46 = vpop.f32.mrf.mxu0  ;;  %v6219_v6 = vpop.f32.mrf.mxu1 }
 0x1f0   : > { %v6217_v52 = vadd.f32 %v4137_v44, %v6174_v7 }
 0x1f1   : > { %v4139_v61 = vpop.f32.mrf.mxu0  ;;  %v6221_v23 = vpop.f32.mrf.mxu1 }
 0x1f2   : > { %v4140_v53 = vadd.f32 %v4139_v61, %v4138_v46 }
 0x1f3   : > { %v4141_v24 = vpop.f32.mrf.mxu0  ;;  %v6226_v43 = vpop.f32.mrf.mxu1 }
 0x1f4   : > { %v6224_v34 = vadd.f32 %v4140_v53, %v6176_v40 }
 0x1f5   : > { %v4142_v2 = vpop.f32.mrf.mxu0  ;;  %v6228_v62 = vpop.f32.mrf.mxu1 }
 0x1f6   : > { %v4143_v35 = vadd.f32 %v4142_v2, %v4141_v24 }
 0x1f7   : > { %v4144_v0 = vpop.f32.mrf.mxu0  ;;  %v6233_v25 = vpop.f32.mrf.mxu1 }
 0x1f8   : > { %v6231_v7 = vadd.f32 %v4143_v35, %v6178_v60 }
 0x1f9   : > { %v4145_v20 = vpop.f32.mrf.mxu0  ;;  %v6235_v59 = vpop.f32.mrf.mxu1 }
 0x1fa   : > { %v4146_v11 = vadd.f32 %v4145_v20, %v4144_v0 }
 0x1fb   : > { %v4147_v36 = vpop.f32.mrf.mxu0  ;;  %v6240_v31 = vpop.f32.mrf.mxu1 }
 0x1fc   : > { %v6238_v40 = vadd.f32 %v4146_v11, %v6180_v45 }
 0x1fd   : > { %v4148_v9 = vpop.f32.mrf.mxu0  ;;  %v6242_v46 = vpop.f32.mrf.mxu1 }
 0x1fe   : > { %v4149_v44 = vadd.f32 %v4148_v9, %v4147_v36 }
 0x1ff   : > { %v4150_v61 = vpop.f32.mrf.mxu0  ;;  %v6247_v53 = vpop.f32.mrf.mxu1 }
 0x200   : > { %v6245_v60 = vadd.f32 %v4149_v44, %v6182_v5 }
 0x201   : > { %v4151_v24 = vpop.f32.mrf.mxu0  ;;  %v6249_v35 = vpop.f32.mrf.mxu1 }
 0x202   : > { %v4152_v2 = vadd.f32 %v4151_v24, %v4150_v61 }
 0x203   : > { %v4153_v0 = vpop.f32.mrf.mxu0  ;;  %v6254_v20 = vpop.f32.mrf.mxu1 }
 0x204   : > { %v6252_v45 = vadd.f32 %v4152_v2, %v6184_v33 }
 0x205   : > { %v4154_v11 = vpop.f32.mrf.mxu0  ;;  %v6256_v9 = vpop.f32.mrf.mxu1 }
 0x206   : > { %v4155_v36 = vadd.f32 %v4154_v11, %v4153_v0 }
 0x207   : > { %v4156_v4 = vpop.f32.mrf.mxu0  ;;  %v6261_v44 = vpop.f32.mrf.mxu1 }
 0x208   : > { %v6259_v5 = vadd.f32 %v4155_v36, %v6186_v39 }
 0x209   : > { %v4157_v27 = vpop.f32.mrf.mxu0  ;;  %v6263_v24 = vpop.f32.mrf.mxu1 }
 0x20a   : > { %v4158_v61 = vadd.f32 %v4157_v27, %v4156_v4 }
 0x20b   : > { %v4159_v42 = vpop.f32.mrf.mxu0  ;;  %v6268_v2 = vpop.f32.mrf.mxu1 }
 0x20c   : > { %v6266_v33 = vadd.f32 %v4158_v61, %v6188_v54 }
 0x20d   : > { %v4160_v21 = vpop.f32.mrf.mxu0  ;;  %v6270_v11 = vpop.f32.mrf.mxu1 }
 0x20e   : > { %v4161_v0 = vadd.f32 %v4160_v21, %v4159_v42 }
 0x20f   : > { %v4162_v58 = vpop.f32.mrf.mxu0  ;;  %v6275_v36 = vpop.f32.mrf.mxu1 }
 0x210   : > { %v6273_v39 = vadd.f32 %v4161_v0, %v6190_v26 }
 0x211   : > { %v4163_v15 = vpop.f32.mrf.mxu0  ;;  %v6277_v4 = vpop.f32.mrf.mxu1 }
 0x212   : > { %v4164_v27 = vadd.f32 %v4163_v15, %v4162_v58 }
 0x213   : > { %v4165_v51 = vpop.f32.mrf.mxu0  ;;  %v6282_v61 = vpop.f32.mrf.mxu1 }
 0x214   : > { %v6280_v54 = vadd.f32 %v4164_v27, %v6192_v19 }
 0x215   : > { %v4166_v29 = vpop.f32.mrf.mxu0  ;;  %v6284_v42 = vpop.f32.mrf.mxu1 }
 0x216   : > { %v4167_v21 = vadd.f32 %v4166_v29, %v4165_v51 }
 0x217   : > { %v4168_v56 = vpop.f32.mrf.mxu0  ;;  %v6289_v0 = vpop.f32.mrf.mxu1 }
 0x218   : > { %v6287_v26 = vadd.f32 %v4167_v21, %v6194_v41 }
 0x219   : > { %v4169_v28 = vpop.f32.mrf.mxu0  ;;  %v6291_v58 = vpop.f32.mrf.mxu1 }
 0x21a   : > { %v4170_v15 = vadd.f32 %v4169_v28, %v4168_v56 }
 0x21b   : > { %v4171_v50 = vpop.f32.mrf.mxu0  ;;  %v6296_v27 = vpop.f32.mrf.mxu1 }
 0x21c   : > { %v6294_v19 = vadd.f32 %v4170_v15, %v6196_v49 }
 0x21d   : > { %v4172_v1 = vpop.f32.mrf.mxu0  ;;  %v6298_v51 = vpop.f32.mrf.mxu1 }
 0x21e   : > { %7217 = vst [vmem:[#allocation53_spill] sm:$0xff] %v6294_v19  ;;  %v4173_v29 = vadd.f32 %v4172_v1, %v4171_v50 }
 0x21f   : > { %v4174_v14 = vpop.f32.mrf.mxu0  ;;  %v4248_v21 = vpop.f32.mrf.mxu1 }
 0x220   : > { %v6301_v41 = vadd.f32 %v4173_v29, %v6198_v17 }
 0x221   : > { %v4175_v57 = vpop.f32.mrf.mxu0  ;;  %v4250_v28 = vpop.f32.mrf.mxu1 }
 0x222   : > { %7218 = vst [vmem:[#allocation54_spill] sm:$0xff] %v6301_v41  ;;  %v4176_v13 = vadd.f32 %v4175_v57, %v4174_v14 }
 0x223   : > { %v4177_v56 = vpop.f32.mrf.mxu0  ;;  %v4251_v49 = vpop.f32.mrf.mxu1 }
 0x224   : > { %v6304_v18 = vadd.f32 %v4176_v13, %v6200_v48 }
 0x225   : > { %v4178_v15 = vpop.f32.mrf.mxu0  ;;  %v4253_v10 = vpop.f32.mrf.mxu1 }
 0x226   : > { %7219 = vst [vmem:[#allocation55_spill] sm:$0xff] %v6304_v18  ;;  %v4179_v30 = vadd.f32 %v4178_v15, %v4177_v56 }
 0x227   : > { %v4180_v55 = vpop.f32.mrf.mxu0  ;;  %v4254_v50 = vpop.f32.mrf.mxu1 }
 0x228   : > { %v6307_v1 = vadd.f32 %v4179_v30, %v6202_v12 }
 0x229   : > { %v4181_v37 = vpop.f32.mrf.mxu0  ;;  %v4256_v29 = vpop.f32.mrf.mxu1 }
 0x22a   : > { %7220 = vst [vmem:[#allocation56_spill] sm:$0xff] %v6307_v1  ;;  %v4182_v17 = vadd.f32 %v4181_v37, %v4180_v55 }
 0x22b   : > { %v4183_v32 = vpop.f32.mrf.mxu0  ;;  %v4257_v14 = vpop.f32.mrf.mxu1 }
 0x22c   : > { %v6310_v57 = vadd.f32 %v4182_v17, %v6204_v16  ;;  %v4213_v17 = vadd.f32 %v6219_v6, %v6212_v63  ;;  %v4228_v63 = vadd.f32 %v6254_v20, %v6249_v35  ;;  %v4231_v6 = vadd.f32 %v6261_v44, %v6256_v9 }
 0x22d   : > { %v4184_v41 = vpop.f32.mrf.mxu0  ;;  %v4259_v48 = vpop.f32.mrf.mxu1  ;;  %v4237_v35 = vadd.f32 %v6275_v36, %v6270_v11  ;;  %v4255_v11 = vadd.f32 %v4254_v50, %v4253_v10  ;;  %v4258_v36 = vadd.f32 %v4257_v14, %v4256_v29  ;;  %v7223_v29 = vld [vmem:[#allocation54_spill] sm:$0xff] }
 0x22e   : > { %v4185_v13 = vadd.f32 %v4184_v41, %v4183_v32  ;;  %v4216_v32 = vadd.f32 %v6226_v43, %v6221_v23 }
 0x22f   : > { %v4186_v18 = vpop.f32.mrf.mxu0  ;;  %v4260_v15 = vpop.f32.mrf.mxu1 }
 0x230   : > { %v6313_v56 = vadd.f32 %v4185_v13, %v6206_v3  ;;  %v4219_v3 = vadd.f32 %v6233_v25, %v6228_v62  ;;  %v1618_v25 = vadd.f32 %v4213_v17, %v6217_v52  ;;  %v4243_v52 = vadd.f32 %v6289_v0, %v6284_v42 }
 0x231   : > { %v4187_v19 = vpop.f32.mrf.mxu0  ;;  %v6318_v37 = vpop.f32.mrf.mxu1 }
 0x232   : > { %v4188_v30 = vadd.f32 %v4187_v19, %v4186_v18  ;;  %v4222_v18 = vadd.f32 %v6240_v31, %v6235_v59  ;;  %v1626_v43 = vadd.f32 %v4219_v3, %v6231_v7  ;;  %v1621_v59 = vadd.f32 %v4216_v32, %v6224_v34 }
 0x233   : > { %v4189_v12 = vpop.f32.mrf.mxu0  ;;  %v6333_v13 = vpop.f32.mrf.mxu1  ;;  %v4240_v7 = vadd.f32 %v6282_v61, %v6277_v4  ;;  %v4261_v61 = vadd.f32 %v4260_v15, %v4259_v48 }
 0x234   : > { %v6316_v1 = vadd.f32 %v4188_v30, %v6208_v38  ;;  %v4225_v38 = vadd.f32 %v6247_v53, %v6242_v46  ;;  %v1629_v46 = vadd.f32 %v4222_v18, %v6238_v40  ;;  %v1642_v40 = vadd.f32 %v4231_v6, %v6259_v5 }
 0x235   : > { %v4190_v55 = vpop.f32.mrf.mxu0  ;;  %v4265_v34 = vpop.f32.mrf.mxu1  ;;  %v6363_v5 = vadd.f32 %v4237_v35, %v6273_v39  ;;  %v6380_v39 = vadd.f32 %v4258_v36, %v6310_v57  ;;  %v6386_v3 = vadd.f32 %v4261_v61, %v6313_v56 }
 0x236   : > { %v4191_v16 = vadd.f32 %v4190_v55, %v4189_v12  ;;  %v1634_v53 = vadd.f32 %v4225_v38, %v6245_v60  ;;  %v1637_v60 = vadd.f32 %v4228_v63, %v6252_v45  ;;  %v6366_v45 = vadd.f32 %v4240_v7, %v6280_v54  ;;  %v7224_v54 = vld [vmem:[#allocation55_spill] sm:$0xff] }
 0x237   : > { %v4192_v41 = vpop.f32.mrf.mxu0  ;;  %v4266_v55 = vpop.f32.mrf.mxu1 }
 0x238   : > { %v6331_v19 = vadd.f32 %v4191_v16, %v6210_v8  ;;  %v4234_v8 = vadd.f32 %v6268_v2, %v6263_v24  ;;  %v4249_v24 = vadd.f32 %v4248_v21, %v6298_v51  ;;  %v4252_v2 = vadd.f32 %v4251_v49, %v4250_v28  ;;  %v7221_v21 = vld [vmem:[#allocation53_spill] sm:$0xff]  ;;  %v7222_v49 = vld [vmem:[#allocation56_spill] sm:$0xff] }
 0x239   : > { %v4193_v30 = vpop.f32.mrf.mxu0  ;;  %v6374_v50 = vadd.f32 %v4255_v11, %v7222_v49  ;;  %v6412_v11 = vadd.f32 %v6333_v13, %v6318_v37  ;;  %v6414_v36 = vadd.f32 %v4266_v55, %v4265_v34  ;;  %v4919_v55 = vld [vmem:[#allocation10 + $0x1f0] sm:$0xff]  }
 0x23a   : > { %v4194_v23 = vadd.f32 %v4193_v30, %v4192_v41  ;;  %v1645_v0 = vadd.f32 %v4234_v8, %v6266_v33  ;;  %v6383_v14 = vadd.f32 %v4252_v2, %v7224_v54  ;;  %v4268_v41 = vpop.f32.mrf.mxu1 }
 0x23b   : > { %v4579_v62 = vpop.f32.mrf.mxu0 }
 0x23c   : > { %v6345_v31 = vadd.f32 %v4194_v23, %v6214_v47  ;;  %v1739_v20 = vadd.f32 %v4579_v62, %v1626_v43  ;;  %v4246_v47 = vadd.f32 %v6296_v27, %v6291_v58  ;;  %v1658_v58 = vadd.f32 %v4243_v52, %v6287_v26  ;;  %v4269_v22 = vpop.f32.mrf.mxu1 }
 0x23d   : > { %v1730_v9 = vpop.f32.mrf.mxu0  ;;  %v6377_v26 = vadd.f32 %v4249_v24, %v7223_v29 }
 0x23e   : > { %v1731_v44 = vadd.f32 %v1730_v9, %v1618_v25  ;;  %v1811_v16 = vmax.f32 %v1739_v20, 0.0  ;;  %v6371_v28 = vadd.f32 %v4246_v47, %v7221_v21  ;;  %v6418_v21 = vadd.f32 %v4269_v22, %v4268_v41 }
 0x23f   : > { %v4580_v4 = vpop.f32.mrf.mxu0 }
 0x240   : > { %v1809_v12 = vmax.f32 %v1731_v44, 0.0  ;;  %v1742_v42 = vadd.f32 %v4580_v4, %v1629_v46  ;;  %v1870_v18 = vrot.slane %v1811_v16, 7  ;;  %v1934_v7 = vrot.slane %v1811_v16, 1  ;;  %v4940_v46 = vld [vmem:[#allocation10 + $0x230] sm:$0xff]  }
 0x241   : > { %v1733_v17 = vpop.f32.mrf.mxu0 }
 0x242   : > { %v1829_v10 = vsel %vm5629_vm0, 0.0, %v1809_v12  ;;  %v1812_v27 = vmax.f32 %v1742_v42, 0.0  ;;  %v1734_v51 = vadd.f32 %v1733_v17, %v1621_v59 }
 0x243   : > { %v4583_v33 = vpop.f32.mrf.mxu0  ;;  %v1869_v38 = vrot.slane %v1829_v10, 7  ;;  %v1933_v30 = vrot.slane %v1829_v10, 1 }
 0x244   : > { %v1878_v48 = vrot.slane %v1812_v27, 7  ;;  %v1810_v15 = vmax.f32 %v1734_v51, 0.0  ;;  %v1755_v32 = vadd.f32 %v4583_v33, %v1642_v40  ;;  %v6388_v6 = vpack.c.bf16 %v1812_v27, %v1811_v16  ;;  %v4916_v51 = vld [vmem:[#allocation10 + $0x1b8] sm:$0xff]  }
 0x245   : > { %v1746_v63 = vpop.f32.mrf.mxu0  ;;  %v1942_v23 = vrot.slane %v1812_v27, 1  ;;  %v4909_v27 = vld [vmem:[#allocation10 + $0x170] sm:$0xff]  }
 0x246   : > { %v1830_v57 = vsel %vm5629_vm0, 0.0, %v1810_v15  ;;  %v3749_v43 = vpack.c.bf16 %v1810_v15, %v1809_v12  ;;  %v1747_v62 = vadd.f32 %v1746_v63, %v1634_v53  ;;  %v1886_v56 = vsel %vm502_vm3, %v1870_v18, %v1878_v48  ;;  %v4908_v12 = vld [vmem:[#allocation10 + $0x138] sm:$0xff]  }
 0x247   : > { %v1877_v25 = vrot.slane %v1830_v57, 7  ;;  %v1941_v59 = vrot.slane %v1830_v57, 1  ;;  %v4584_v8 = vpop.f32.mrf.mxu0  ;;  %v1894_v35 = vsel %vm502_vm3, %v1878_v48, %v1870_v18  ;;  %v6396_v52 = vmax.f32 %v1755_v32, 0.0  ;;  %v4910_v18 = vld [vmem:[#allocation10 + $0x130] sm:$0xff]  }
 0x248   : > { %v6398_v20 = vmax.f32 %v1747_v62, 0.0  ;;  %v1758_v9 = vadd.f32 %v4584_v8, %v1645_v0  ;;  %3750 = vmatprep.mubr.msk.bf16.mxu1 %vm5643_vm2, %v3749_v43  ;;  %v3757_v16 = vpack.c.bf16 %v1886_v56, %v1894_v35  ;;  %v1950_v10 = vsel %vm585_vm5, %v1934_v7, %v1942_v23  ;;  %v4911_v62 = vld [vmem:[#allocation10 + $0x168] sm:$0xff]  }
 0x249   : > { %v1885_v53 = vsel %vm502_vm3, %v1869_v38, %v1877_v25  ;;  %v1893_v44 = vsel %vm502_vm3, %v1877_v25, %v1869_v38  ;;  %v1949_v40 = vsel %vm585_vm5, %v1933_v30, %v1941_v59  ;;  %v1957_v24 = vsel %vm585_vm5, %v1941_v59, %v1933_v30  ;;  %v1749_v2 = vpop.f32.mrf.mxu0  ;;  %v4920_v25 = vld [vmem:[#allocation10 + $0x1b0] sm:$0xff]  }
 0x24a   : > { %v3753_v4 = vpack.c.bf16 %v1885_v53, %v1893_v44  ;;  %v3789_v61 = vpack.c.bf16 %v1957_v24, %v1949_v40  ;;  %v1816_v42 = vmax.f32 %v1758_v9, 0.0  ;;  %v1750_v0 = vadd.f32 %v1749_v2, %v1637_v60  ;;  %3786 = vmatprep.mubr.msk.bf16.mxu0 %vm5673_vm7, %v3757_v16 }
 0x24b   : > { %v4587_v17 = vpop.f32.mrf.mxu0  ;;  %v1936_v33 = vrot.slane %v6396_v52, 1  ;;  %v1958_v34 = vsel %vm585_vm5, %v1942_v23, %v1934_v7  ;;  %v1871_v60 = vrot.slane %v6398_v20, 7  ;;  %v1935_v59 = vrot.slane %v6398_v20, 1 }
 0x24c   : > { %v1771_v37 = vadd.f32 %v4587_v17, %v1658_v58  ;;  %3754 = vmatmul.mubr.msk.bf16.vlgmr.msra.gmra.mxu1 %vm5673_vm7, %v3753_v4  ;;  %v1944_v49 = vrot.slane %v1816_v42, 1  ;;  %v1814_v29 = vmax.f32 %v1750_v0, 0.0  ;;  %v6429_v48 = vpack.c.bf16 %v1958_v34, %v1950_v10  ;;  %3790 = vmatmul.mubr.msk.bf16.vlgmr.msra.gmra.mxu0 %vm5701_vm9, %v3789_v61 }
 0x24d   : > { %v1762_v54 = vpop.f32.mrf.mxu0  ;;  %2635 = vmatprep.mubr.bf16.mxu1 %v6388_v6  ;;  %v1880_v58 = vrot.slane %v1816_v42, 7  ;;  %4418 = vmatpush3.bf16.msra.mxu1 %v4908_v12  ;;  %v6437_v38 = vpack.c.bf16 %v1816_v42, %v6396_v52  ;;  %v4913_v42 = vld [vmem:[#allocation10 + $0x160] sm:$0xff]  }
 0x24e   : > { %v6431_v15 = vmax.f32 %v1771_v37, 0.0  ;;  %v1763_v41 = vadd.f32 %v1762_v54, %v6363_v5  ;;  %v1952_v30 = vsel %vm585_vm5, %v1936_v33, %v1944_v49  ;;  %v1960_v63 = vsel %vm585_vm5, %v1944_v49, %v1936_v33  ;;  %4419 = vmatprep.subr.bf16.mxu1 %v4909_v27  ;;  %4482 = vmatpush3.bf16.msra.mxu0 %v4916_v51  ;;  %v4924_v27 = vld [vmem:[#allocation10 + $0x1a8] sm:$0xff]   ;;  %v4914_v54 = vld [vmem:[#allocation10 + $0x120] sm:$0xff]  }
 0x24f   : > { %v1879_v23 = vrot.slane %v1814_v29, 7  ;;  %v1943_v57 = vrot.slane %v1814_v29, 1  ;;  %v4588_v43 = vpop.f32.mrf.mxu0  ;;  %v1872_v5 = vrot.slane %v6396_v52, 7  ;;  %v6445_v8 = vpack.c.bf16 %v1960_v63, %v1952_v30  ;;  %4483 = vmatprep.subr.bf16.mxu0 %v4919_v55  ;;  %v4922_v52 = vld [vmem:[#allocation10 + $0x1e8] sm:$0xff]  }
 0x250   : > { %v6447_v56 = vmax.f32 %v1763_v41, 0.0  ;;  %v1774_v35 = vadd.f32 %v4588_v43, %v6371_v28  ;;  %v6455_v22 = vpack.c.bf16 %v1814_v29, %v6398_v20  ;;  %v1874_v53 = vrot.slane %v6431_v15, 7  ;;  %v4912_v28 = vld [vmem:[#allocation10 + $0x128] sm:$0xff]  }
 0x251   : > { %v1765_v7 = vpop.f32.mrf.mxu0  ;;  %v1887_v9 = vsel %vm502_vm3, %v1871_v60, %v1879_v23  ;;  %v1895_v47 = vsel %vm502_vm3, %v1879_v23, %v1871_v60  ;;  %v1938_v44 = vrot.slane %v6431_v15, 1  ;;  %4420 = vmatpush3.bf16.msra.mxu1 %v4910_v18  ;;  %v1888_v61 = vsel %vm502_vm3, %v1872_v5, %v1880_v58 }
 0x252   : > { %v1766_v40 = vadd.f32 %v1765_v7, %v6366_v45  ;;  %v6460_v24 = vpack.c.bf16 %v1887_v9, %v1895_v47  ;;  %v6462_v2 = vmax.f32 %v1774_v35, 0.0  ;;  %v1896_v20 = vsel %vm502_vm3, %v1880_v58, %v1872_v5  ;;  %4421 = vmatprep.subr.bf16.mxu1 %v4911_v62  ;;  %4484 = vmatpush3.bf16.msra.mxu0 %v4920_v25  ;;  %v4926_v25 = vld [vmem:[#allocation10 + $0x1a0] sm:$0xff]   ;;  %v4928_v9 = vld [vmem:[#allocation10 + $0x1d8] sm:$0xff]  }
 0x253   : > { %v4591_v4 = vpop.f32.mrf.mxu0  ;;  %v1951_v12 = vsel %vm585_vm5, %v1935_v59, %v1943_v57  ;;  %v6476_v17 = vpack.c.bf16 %v1888_v61, %v1896_v20  ;;  %v1959_v10 = vsel %vm585_vm5, %v1943_v57, %v1935_v59  ;;  %v1937_v51 = vrot.slane %v6447_v56, 1  ;;  %4485 = vmatprep.subr.bf16.mxu0 %v4922_v52 }
 0x254   : > { %v1818_v45 = vmax.f32 %v1766_v40, 0.0  ;;  %v1787_v0 = vadd.f32 %v4591_v4, %v6374_v50  ;;  %3794 = vmatprep.mubr.msk.bf16.mxu0 %vm5673_vm7, %v6460_v24  ;;  %3758 = vmatmul.mubr.msk.bf16.gmra.mxu1 %vm5673_vm7, %v3757_v16  ;;  %v1946_v33 = vrot.slane %v6462_v2, 1  ;;  %v6483_v50 = vpack.c.bf16 %v1959_v10, %v1951_v12  ;;  %v4925_v16 = vld [vmem:[#allocation10 + $0x1e0] sm:$0xff]   ;;  %v4921_v4 = vld [vmem:[#allocation10 + $0x150] sm:$0xff]  }
 0x255   : > { %v1778_v37 = vpop.f32.mrf.mxu0  ;;  %2643 = vmatprep.mubr.bf16.mxu1 %v6455_v22  ;;  %v6487_v34 = vpack.c.bf16 %v6462_v2, %v6431_v15  ;;  %v1882_v55 = vrot.slane %v6462_v2, 7  ;;  %3798 = vmatmul.mubr.msk.bf16.gmra.mxu0 %vm5701_vm9, %v6429_v48  ;;  %v1873_v58 = vrot.slane %v6447_v56, 7  ;;  %v1690_v7 = vadd.f32 %v6414_v36, %v6331_v19  ;;  %v4931_v15 = vld [vmem:[#allocation10 + $0x1d0] sm:$0xff]  }
 0x256   : > { %v1881_v60 = vrot.slane %v1818_v45, 7  ;;  %v1945_v49 = vrot.slane %v1818_v45, 1  ;;  %v1779_v29 = vadd.f32 %v1778_v37, %v6377_v26  ;;  %4422 = vmatpush3.bf16.msra.mxu1 %v4912_v28  ;;  %v1954_v41 = vsel %vm585_vm5, %v1938_v44, %v1946_v33  ;;  %3802 = vmatprep.mubr.msk.bf16.mxu0 %vm5673_vm7, %v6476_v17  ;;  %v4917_v26 = vld [vmem:[#allocation10 + $0x158] sm:$0xff]  }
 0x257   : > { %v1962_v18 = vsel %vm585_vm5, %v1946_v33, %v1938_v44  ;;  %v4592_v30 = vpop.f32.mrf.mxu0  ;;  %4423 = vmatprep.subr.bf16.mxu1 %v4913_v42  ;;  %v6503_v63 = vpack.c.bf16 %v1818_v45, %v6447_v56  ;;  %v6511_v62 = vmax.f32 %v1787_v0, 0.0  ;;  %4486 = vmatpush3.bf16.msra.mxu0 %v4924_v27  ;;  %v1890_v40 = vsel %vm502_vm3, %v1874_v53, %v1882_v55  ;;  %v4923_v33 = vld [vmem:[#allocation10 + $0x110] sm:$0xff]  }
 0x258   : > { %v6505_v23 = vpack.c.bf16 %v1962_v18, %v1954_v41  ;;  %v1953_v57 = vsel %vm585_vm5, %v1937_v51, %v1945_v49  ;;  %v1961_v43 = vsel %vm585_vm5, %v1945_v49, %v1937_v51  ;;  %v6515_v59 = vmax.f32 %v1779_v29, 0.0  ;;  %4487 = vmatprep.subr.bf16.mxu0 %v4925_v16  ;;  %v4932_v18 = vld [vmem:[#allocation10 + $0x190] sm:$0xff]  }
 0x259   : > { %v6513_v5 = vpack.c.bf16 %v1961_v43, %v1953_v57  ;;  %v1790_v56 = vadd.f32 %v4592_v30, %v6380_v39  ;;  %v1781_v35 = vpop.f32.mrf.mxu0  ;;  %v1889_v52 = vsel %vm502_vm3, %v1873_v58, %v1881_v60  ;;  %v1897_v44 = vsel %vm502_vm3, %v1881_v60, %v1873_v58  ;;  %v4918_v39 = vld [vmem:[#allocation10 + $0x118] sm:$0xff]  }
 0x25a   : > { %v1782_v47 = vadd.f32 %v1781_v35, %v6383_v14  ;;  %4424 = vmatpush3.bf16.msra.mxu1 %v4914_v54  ;;  %v6531_v36 = vpack.c.bf16 %v1889_v52, %v1897_v44  ;;  %v1693_v14 = vadd.f32 %v6418_v21, %v6345_v31  ;;  %v1685_v2 = vadd.f32 %v6412_v11, %v6316_v1  ;;  %v4930_v31 = vld [vmem:[#allocation10 + $0x198] sm:$0xff]   ;;  %v4929_v52 = vld [vmem:[#allocation10 + $0x108] sm:$0xff]  }
 0x25b   : > { %v6529_v28 = vmax.f32 %v1790_v56, 0.0  ;;  %v4595_v19 = vpop.f32.mrf.mxu0  ;;  %4425 = vmatprep.subr.bf16.mxu1 %v4917_v26  ;;  %v1940_v61 = vrot.slane %v6511_v62, 1  ;;  %v1898_v42 = vsel %vm502_vm3, %v1882_v55, %v1874_v53  ;;  %4488 = vmatpush3.bf16.msra.mxu0 %v4926_v25  ;;  %v1939_v1 = vrot.slane %v6515_v59, 1 }
 0x25c   : > { %v1822_v20 = vmax.f32 %v1782_v47, 0.0  ;;  %v6538_v12 = vadd.f32 %v4595_v19, %v1690_v7  ;;  %3762 = vmatmul.mubr.msk.bf16.gmra.mxu1 %vm5673_vm7, %v6460_v24  ;;  %v6550_v45 = vpack.c.bf16 %v1890_v40, %v1898_v42  ;;  %4489 = vmatprep.subr.bf16.mxu0 %v4928_v9  ;;  %v1875_v29 = vrot.slane %v6515_v59, 7  ;;  %v4933_v40 = vld [vmem:[#allocation10 + $0x140] sm:$0xff]  }
 0x25d   : > { %v1948_v11 = vrot.slane %v6529_v28, 1  ;;  %v1794_v21 = vpop.f32.mrf.mxu0  ;;  %2651 = vmatprep.mubr.bf16.mxu1 %v6437_v38  ;;  %v6554_v0 = vpack.c.bf16 %v6529_v28, %v6511_v62  ;;  %3806 = vmatmul.mubr.msk.bf16.gmra.mxu0 %vm5701_vm9, %v6483_v50  ;;  %v1884_v37 = vrot.slane %v6529_v28, 7  ;;  %v1876_v30 = vrot.slane %v6511_v62, 7 }
 0x25e   : > { %v1883_v10 = vrot.slane %v1822_v20, 7  ;;  %v1947_v27 = vrot.slane %v1822_v20, 1  ;;  %v1827_v53 = vmax.f32 %v6538_v12, 0.0  ;;  %v1795_v51 = vadd.f32 %v1794_v21, %v6386_v3  ;;  %4426 = vmatpush3.bf16.msra.mxu1 %v4918_v39  ;;  %3810 = vmatprep.mubr.msk.bf16.mxu0 %vm5673_vm7, %v6531_v36  ;;  %v4927_v3 = vld [vmem:[#allocation10 + $0x148] sm:$0xff]   ;;  %v4937_v12 = vld [vmem:[#allocation10 + $0x1c0] sm:$0xff]  }
 0x25f   : > { %v1956_v16 = vsel %vm585_vm5, %v1940_v61, %v1948_v11  ;;  %v1964_v55 = vsel %vm585_vm5, %v1948_v11, %v1940_v61  ;;  %v4596_v60 = vpop.f32.mrf.mxu0  ;;  %4427 = vmatprep.subr.bf16.mxu1 %v4921_v4  ;;  %v6570_v49 = vpack.c.bf16 %v1822_v20, %v6515_v59  ;;  %4490 = vmatpush3.bf16.msra.mxu0 %v4930_v31  ;;  %v4934_v59 = vld [vmem:[#allocation10 + $0x1c8] sm:$0xff]   ;;  %v4935_v21 = vld [vmem:[#allocation10 + $0x100] sm:$0xff]  }
 0x260   : > { %v6573_v54 = vpack.c.bf16 %v1964_v55, %v1956_v16  ;;  %v1955_v58 = vsel %vm585_vm5, %v1939_v1, %v1947_v27  ;;  %v1963_v41 = vsel %vm585_vm5, %v1947_v27, %v1939_v1  ;;  %v1867_v43 = vsel %vm5828_vm10, 0.0, %v1827_v53  ;;  %4491 = vmatprep.subr.bf16.mxu0 %v4931_v15  ;;  %v4938_v16 = vld [vmem:[#allocation10 + $0x180] sm:$0xff]  }
 0x261   : > { %v6580_v26 = vpack.c.bf16 %v1963_v41, %v1955_v58  ;;  %v1825_v25 = vmax.f32 %v1795_v51, 0.0  ;;  %v1797_v56 = vpop.f32.mrf.mxu0  ;;  %v1806_v35 = vadd.f32 %v4596_v60, %v1693_v14  ;;  %v1891_v9 = vsel %vm502_vm3, %v1875_v29, %v1883_v10  ;;  %v4936_v14 = vld [vmem:[#allocation10 + $0x188] sm:$0xff]   ;;  %v4939_v51 = vld [vmem:[#allocation10 + $0x238] sm:$0xff]  }
 0x262   : > { %v1798_v7 = vadd.f32 %v1797_v56, %v1685_v2  ;;  %v1899_v47 = vsel %vm502_vm3, %v1883_v10, %v1875_v29  ;;  %4428 = vmatpush3.bf16.msra.mxu1 %v4923_v33  ;;  %v1892_v44 = vsel %vm502_vm3, %v1876_v30, %v1884_v37  ;;  %v1900_v19 = vsel %vm502_vm3, %v1884_v37, %v1876_v30 }
 0x263   : > { %v6588_v62 = vpack.c.bf16 %v1891_v9, %v1899_v47  ;;  %4429 = vmatprep.subr.bf16.mxu1 %v4927_v3  ;;  %v1828_v39 = vmax.f32 %v1806_v35, 0.0  ;;  %4492 = vmatpush3.bf16.msra.mxu0 %v4932_v18  ;;  %v2004_v2 = vrot.slane %v1867_v43, 7  ;;  %v1989_v4 = vrot.slane %v1825_v25, 7 }
 0x264   : > { %v1826_v28 = vmax.f32 %v1798_v7, 0.0  ;;  %3766 = vmatmul.mubr.msk.bf16.gmra.mxu1 %vm5673_vm7, %v6476_v17  ;;  %v1997_v61 = vrot.slane %v1825_v25, 1  ;;  %v6598_v20 = vpack.c.bf16 %v1892_v44, %v1900_v19  ;;  %4493 = vmatprep.subr.bf16.mxu0 %v4934_v59  ;;  %v2012_v15 = vrot.slane %v1867_v43, 1 }
 0x265   : > { %2659 = vmatprep.mubr.bf16.mxu1 %v6503_v63  ;;  %v1868_v42 = vsel %vm5828_vm10, 0.0, %v1828_v39  ;;  %v6602_v31 = vpack.c.bf16 %v1828_v39, %v1827_v53  ;;  %3814 = vmatmul.mubr.msk.bf16.gmra.mxu0 %vm5701_vm9, %v6445_v8 }
 0x266   : > { %v1990_v1 = vrot.slane %v1826_v28, 7  ;;  %v1998_v11 = vrot.slane %v1826_v28, 1  ;;  %4430 = vmatpush3.bf16.msra.mxu1 %v4929_v52  ;;  %v2005_v10 = vrot.slane %v1868_v42, 7  ;;  %v2013_v27 = vrot.slane %v1868_v42, 1  ;;  %3818 = vmatprep.mubr.msk.bf16.mxu0 %vm5673_vm7, %v6550_v45 }
 0x267   : > { %4431 = vmatprep.subr.bf16.mxu1 %v4933_v40  ;;  %v6610_v33 = vpack.c.bf16 %v1826_v28, %v1825_v25  ;;  %4494 = vmatpush3.bf16.msra.mxu0 %v4936_v14  ;;  %v4942_v25 = vld [vmem:[#allocation10 + $0x220] sm:$0xff]  }
 0x268   : > { %v1991_v53 = vsel %vm502_vm3, %v1989_v4, %v1990_v1  ;;  %v1992_v37 = vsel %vm502_vm3, %v1990_v1, %v1989_v4  ;;  %v1999_v55 = vsel %vm585_vm5, %v1997_v61, %v1998_v11  ;;  %v2000_v60 = vsel %vm585_vm5, %v1998_v11, %v1997_v61  ;;  %4495 = vmatprep.subr.bf16.mxu0 %v4937_v12 }
 0x269   : > { %v6622_v3 = vsel %vm502_vm3, %v2004_v2, %v2005_v10  ;;  %v6626_v29 = vsel %vm502_vm3, %v2005_v10, %v2004_v2  ;;  %v6630_v58 = vsel %vm585_vm5, %v2012_v15, %v2013_v27  ;;  %v6634_v41 = vsel %vm585_vm5, %v2013_v27, %v2012_v15 }
 0x26a   : > { %v3914_v18 = vpack.c.bf16 %v6622_v3, %v6626_v29  ;;  %v3946_v30 = vpack.c.bf16 %v6634_v41, %v6630_v58  ;;  %v6640_v57 = vpack.c.bf16 %v1991_v53, %v1992_v37  ;;  %4432 = vmatpush3.bf16.msra.mxu1 %v4935_v21  ;;  %v6642_v43 = vpack.c.bf16 %v2000_v60, %v1999_v55 }
 0x26b   : > { %4597 = vmatprep.subr.bf16.mxu1 %v4939_v51  ;;  %4496 = vmatpush3.bf16.msra.mxu0 %v4938_v16 }
 0x26c   : > { %3770 = vmatmul.mubr.msk.bf16.gmra.mxu1 %vm5673_vm7, %v6531_v36 }
 0x26d   : > { %2667 = vmatprep.mubr.bf16.mxu1 %v6487_v34  ;;  %3822 = vmatmul.mubr.msk.bf16.gmra.mxu0 %vm5701_vm9, %v6513_v5 }
 0x26e   : > { %3826 = vmatprep.mubr.msk.bf16.mxu0 %vm5673_vm7, %v6588_v62 }
 0x274   : > { %3774 = vmatmul.mubr.msk.bf16.gmra.mxu1 %vm5673_vm7, %v6550_v45 }
 0x275   : > { %2675 = vmatprep.mubr.bf16.mxu1 %v6570_v49  ;;  %3830 = vmatmul.mubr.msk.bf16.gmra.mxu0 %vm5701_vm9, %v6505_v23 }
 0x276   : > { %3834 = vmatprep.mubr.msk.bf16.mxu0 %vm5673_vm7, %v6598_v20 }
 0x27c   : > { %3778 = vmatmul.mubr.msk.bf16.gmra.mxu1 %vm5673_vm7, %v6588_v62 }
 0x27d   : > { %2683 = vmatprep.mubr.bf16.mxu1 %v6554_v0  ;;  %3838 = vmatmul.mubr.msk.bf16.gmra.mxu0 %vm5701_vm9, %v6580_v26 }
 0x27e   : > { %3842 = vmatprep.mubr.msk.bf16.mxu0 %vm5673_vm7, %v6640_v57 }
 0x284   : > { %3782 = vmatmul.mubr.msk.bf16.gmra.mxu1 %vm5673_vm7, %v6598_v20 }
 0x285   : > { %3850 = vmatprep.mubr.msk.bf16.mxu1 %vm5701_vm9, %v6429_v48  ;;  %3846 = vmatmul.mubr.msk.bf16.gmra.mxu0 %vm5701_vm9, %v6573_v54  ;;  %v4941_v48 = vld [vmem:[#allocation10 + $0x228] sm:$0xff]  }
 0x286   : > { %2918 = vmatprep.mubr.bf16.mxu0 %v6455_v22 }
 0x28c   : > { %2822 = vmatmul.mubr.bf16.vlgmr.msra.gmra.mxu1 %v6388_v6  ;;  %v4943_v6 = vld [vmem:[#allocation10 + $0x218] sm:$0xff]  }
 0x28d   : > { %3854 = vmatprep.mubr.msk.bf16.mxu1 %vm5701_vm9, %v6483_v50  ;;  %4598 = vmatpush3.bf16.msra.mxu1 %v4939_v51 }
 0x28e   : > { %3882 = vmatmul.mubr.msk.bf16.vlgmr.msra.gmra.mxu0 %vm5673_vm7, %v6460_v24  ;;  %4599 = vmatprep.subr.bf16.mxu1 %v4940_v46  ;;  %v4944_v24 = vld [vmem:[#allocation10 + $0x210] sm:$0xff]  }
 0x28f   : > { %2926 = vmatprep.mubr.bf16.mxu0 %v6437_v38 }
 0x291   : > { %4600 = vmatpush3.bf16.msra.mxu1 %v4940_v46 }
 0x292   : > { %4601 = vmatprep.subr.bf16.mxu1 %v4941_v48 }
 0x294   : > { %2830 = vmatmul.mubr.bf16.gmra.mxu1 %v6455_v22  ;;  %v4945_v22 = vld [vmem:[#allocation10 + $0x208] sm:$0xff]  }
 0x295   : > { %3858 = vmatprep.mubr.msk.bf16.mxu1 %vm5701_vm9, %v6445_v8  ;;  %4602 = vmatpush3.bf16.msra.mxu1 %v4941_v48 }
 0x296   : > { %3886 = vmatmul.mubr.msk.bf16.gmra.mxu0 %vm5673_vm7, %v6476_v17  ;;  %4603 = vmatprep.subr.bf16.mxu1 %v4942_v25  ;;  %v4946_v17 = vld [vmem:[#allocation10 + $0x200] sm:$0xff]  }
 0x297   : > { %2934 = vmatprep.mubr.bf16.mxu0 %v6503_v63 }
 0x299   : > { %4604 = vmatpush3.bf16.msra.mxu1 %v4942_v25 }
 0x29a   : > { %4605 = vmatprep.subr.bf16.mxu1 %v4943_v6 }
 0x29c   : > { %2838 = vmatmul.mubr.bf16.gmra.mxu1 %v6437_v38 }
 0x29d   : > { %3862 = vmatprep.mubr.msk.bf16.mxu1 %vm5701_vm9, %v6513_v5  ;;  %4606 = vmatpush3.bf16.msra.mxu1 %v4943_v6 }
 0x29e   : > { %3890 = vmatmul.mubr.msk.bf16.gmra.mxu0 %vm5673_vm7, %v6531_v36  ;;  %4607 = vmatprep.subr.bf16.mxu1 %v4944_v24 }
 0x29f   : > { %2942 = vmatprep.mubr.bf16.mxu0 %v6487_v34 }
 0x2a1   : > { %4608 = vmatpush3.bf16.msra.mxu1 %v4944_v24 }
 0x2a2   : > { %4609 = vmatprep.subr.bf16.mxu1 %v4945_v22 }
 0x2a4   : > { %2846 = vmatmul.mubr.bf16.gmra.mxu1 %v6503_v63 }
 0x2a5   : > { %3866 = vmatprep.mubr.msk.bf16.mxu1 %vm5701_vm9, %v6505_v23  ;;  %4610 = vmatpush3.bf16.msra.mxu1 %v4945_v22 }
 0x2a6   : > { %3894 = vmatmul.mubr.msk.bf16.gmra.mxu0 %vm5673_vm7, %v6550_v45  ;;  %4611 = vmatprep.subr.bf16.mxu1 %v4946_v17 }
 0x2a7   : > { %2950 = vmatprep.mubr.bf16.mxu0 %v6570_v49 }
 0x2a9   : > { %4612 = vmatpush3.bf16.msra.mxu1 %v4946_v17 }
 0x2ac   : > { %2854 = vmatmul.mubr.bf16.gmra.mxu1 %v6487_v34 }
 0x2ad   : > { %3870 = vmatprep.mubr.msk.bf16.mxu1 %vm5701_vm9, %v6580_v26 }
 0x2ae   : > { %3898 = vmatmul.mubr.msk.bf16.gmra.mxu0 %vm5673_vm7, %v6588_v62 }
 0x2af   : > { %2958 = vmatprep.mubr.bf16.mxu0 %v6554_v0 }
 0x2b4   : > { %2862 = vmatmul.mubr.bf16.gmra.mxu1 %v6570_v49 }
 0x2b5   : > { %3874 = vmatprep.mubr.msk.bf16.mxu1 %vm5701_vm9, %v6573_v54 }
 0x2b6   : > { %3902 = vmatmul.mubr.msk.bf16.gmra.mxu0 %vm5673_vm7, %v6598_v20 }
 0x2b7   : > { %2966 = vmatprep.mubr.bf16.mxu0 %v6610_v33 }
 0x2bc   : > { %2870 = vmatmul.mubr.bf16.gmra.mxu1 %v6554_v0 }
 0x2bd   : > { %3878 = vmatprep.mubr.msk.bf16.mxu1 %vm5701_vm9, %v6642_v43 }
 0x2be   : > { %3906 = vmatmul.mubr.msk.bf16.gmra.mxu0 %vm5673_vm7, %v6640_v57 }
 0x2bf   : > { %3911 = vmatprep.mubr.msk.bf16.mxu0 %vm6109_vm12, %v6602_v31 }
 0x2c4   : > { %2878 = vmatmul.mubr.bf16.gmra.mxu1 %v6610_v33 }
 0x2c5   : > { %4613 = vmatprep.mubr.msk.bf16.mxu1 %vm5701_vm9, %v6483_v50 }
 0x2c6   : > { %3915 = vmatmul.mubr.msk.bf16.gmra.mxu0 %vm5673_vm7, %v3914_v18 }
 0x2cc   : > { %4614 = vmatmul.mubr.msk.bf16.vlgmr.msra.gmra.mxu1 %vm5701_vm9, %v6445_v8 }
 0x2cd   : > { %4617 = vmatprep.mubr.msk.bf16.mxu1 %vm5701_vm9, %v6513_v5 }
 0x2d4   : > { %4618 = vmatmul.mubr.msk.bf16.gmra.mxu1 %vm5701_vm9, %v6505_v23 }
 0x2d5   : > { %4621 = vmatprep.mubr.msk.bf16.mxu1 %vm5701_vm9, %v6580_v26 }
 0x2dc   : > { %4622 = vmatmul.mubr.msk.bf16.gmra.mxu1 %vm5701_vm9, %v6573_v54 }
 0x2dd   : > { %4625 = vmatprep.mubr.msk.bf16.mxu1 %vm5701_vm9, %v6642_v43 }
 0x2e4   : > { %4626 = vmatmul.mubr.msk.bf16.gmra.mxu1 %vm5701_vm9, %v3946_v30 }
 0x30c   : > { %v4305_v13 = vpop.f32.mrf.mxu1  ;;  %v4369_v8 = vpop.f32.mrf.mxu0 }
 0x30e   : > { %v4306_v50 = vpop.f32.mrf.mxu1  ;;  %v4370_v63 = vpop.f32.mrf.mxu0 }
 0x30f   : > { %v4307_v34 = vadd.f32 %v4306_v50, %v4305_v13  ;;  %v4371_v5 = vadd.f32 %v4370_v63, %v4369_v8 }
 0x310   : > { %v4308_v23 = vpop.f32.mrf.mxu1  ;;  %v4372_v36 = vpop.f32.mrf.mxu0 }
 0x311   : > { %v6774_v0 = vadd.f32 %v4371_v5, %v4307_v34 }
 0x312   : > { %v4309_v45 = vpop.f32.mrf.mxu1  ;;  %v4373_v54 = vpop.f32.mrf.mxu0 }
 0x313   : > { %v4310_v49 = vadd.f32 %v4309_v45, %v4308_v23  ;;  %v4374_v56 = vadd.f32 %v4373_v54, %v4372_v36 }
 0x314   : > { %v4311_v26 = vpop.f32.mrf.mxu1 }
 0x315   : > { %v4375_v59 = vpop.f32.mrf.mxu0  ;;  %v6776_v7 = vadd.f32 %v4374_v56, %v4310_v49 }
 0x316   : > { %v4312_v35 = vpop.f32.mrf.mxu1 }
 0x317   : > { %v4313_v32 = vadd.f32 %v4312_v35, %v4311_v26  ;;  %v4376_v9 = vpop.f32.mrf.mxu0 }
 0x318   : > { %v4314_v47 = vpop.f32.mrf.mxu1  ;;  %v4377_v52 = vadd.f32 %v4376_v9, %v4375_v59 }
 0x319   : > { %v4378_v62 = vpop.f32.mrf.mxu0 }
 0x31a   : > { %v4315_v44 = vpop.f32.mrf.mxu1  ;;  %v6778_v40 = vadd.f32 %v4377_v52, %v4313_v32 }
 0x31b   : > { %v4316_v39 = vadd.f32 %v4315_v44, %v4314_v47  ;;  %v4379_v28 = vpop.f32.mrf.mxu0 }
 0x31c   : > { %v4317_v19 = vpop.f32.mrf.mxu1  ;;  %v4380_v14 = vadd.f32 %v4379_v28, %v4378_v62 }
 0x31d   : > { %v4381_v2 = vpop.f32.mrf.mxu0 }
 0x31e   : > { %v4318_v4 = vpop.f32.mrf.mxu1  ;;  %v6780_v61 = vadd.f32 %v4380_v14, %v4316_v39 }
 0x31f   : > { %v4319_v20 = vadd.f32 %v4318_v4, %v4317_v19  ;;  %v4382_v12 = vpop.f32.mrf.mxu0 }
 0x320   : > { %v4320_v42 = vpop.f32.mrf.mxu1  ;;  %v4383_v31 = vadd.f32 %v4382_v12, %v4381_v2 }
 0x321   : > { %v4384_v1 = vpop.f32.mrf.mxu0 }
 0x322   : > { %v4321_v11 = vpop.f32.mrf.mxu1  ;;  %v6782_v21 = vadd.f32 %v4383_v31, %v4319_v20 }
 0x323   : > { %v4322_v15 = vadd.f32 %v4321_v11, %v4320_v42  ;;  %v4385_v10 = vpop.f32.mrf.mxu0 }
 0x324   : > { %v4323_v27 = vpop.f32.mrf.mxu1  ;;  %v4386_v51 = vadd.f32 %v4385_v10, %v4384_v1 }
 0x325   : > { %v4387_v33 = vpop.f32.mrf.mxu0 }
 0x326   : > { %v4324_v53 = vpop.f32.mrf.mxu1  ;;  %v6784_v37 = vadd.f32 %v4386_v51, %v4322_v15 }
 0x327   : > { %v4325_v16 = vadd.f32 %v4324_v53, %v4323_v27  ;;  %v4388_v55 = vpop.f32.mrf.mxu0 }
 0x328   : > { %v4326_v60 = vpop.f32.mrf.mxu1  ;;  %v4389_v3 = vadd.f32 %v4388_v55, %v4387_v33 }
 0x329   : > { %v4390_v29 = vpop.f32.mrf.mxu0 }
 0x32a   : > { %v4327_v58 = vpop.f32.mrf.mxu1  ;;  %v6786_v41 = vadd.f32 %v4389_v3, %v4325_v16 }
 0x32b   : > { %v4328_v18 = vadd.f32 %v4327_v58, %v4326_v60  ;;  %v4391_v30 = vpop.f32.mrf.mxu0 }
 0x32c   : > { %v4329_v57 = vpop.f32.mrf.mxu1  ;;  %v4392_v43 = vadd.f32 %v4391_v30, %v4390_v29 }
 0x32d   : > { %v4393_v46 = vpop.f32.mrf.mxu0 }
 0x32e   : > { %v4330_v48 = vpop.f32.mrf.mxu1  ;;  %v6788_v25 = vadd.f32 %v4392_v43, %v4328_v18 }
 0x32f   : > { %v4331_v6 = vadd.f32 %v4330_v48, %v4329_v57  ;;  %v4394_v24 = vpop.f32.mrf.mxu0 }
 0x330   : > { %v4332_v22 = vpop.f32.mrf.mxu1  ;;  %v4395_v17 = vadd.f32 %v4394_v24, %v4393_v46 }
 0x331   : > { %v4396_v38 = vpop.f32.mrf.mxu0 }
 0x332   : > { %v4333_v13 = vpop.f32.mrf.mxu1  ;;  %v6790_v8 = vadd.f32 %v4395_v17, %v4331_v6 }
 0x333   : > { %v4334_v50 = vadd.f32 %v4333_v13, %v4332_v22  ;;  %v4397_v34 = vpop.f32.mrf.mxu0 }
 0x334   : > { %7231 = vst [vmem:[#allocation53_spill] sm:$0xff] %v6790_v8  ;;  %v4335_v63 = vpop.f32.mrf.mxu1  ;;  %v4398_v23 = vadd.f32 %v4397_v34, %v4396_v38 }
 0x335   : > { %v4399_v5 = vpop.f32.mrf.mxu0 }
 0x336   : > { %v4336_v36 = vpop.f32.mrf.mxu1  ;;  %v6792_v45 = vadd.f32 %v4398_v23, %v4334_v50 }
 0x337   : > { %v4337_v49 = vadd.f32 %v4336_v36, %v4335_v63  ;;  %v4400_v54 = vpop.f32.mrf.mxu0 }
 0x338   : > { %7232 = vst [vmem:[#allocation56_spill] sm:$0xff] %v6792_v45  ;;  %v4338_v26 = vpop.f32.mrf.mxu1  ;;  %v4401_v56 = vadd.f32 %v4400_v54, %v4399_v5 }
 0x339   : > { %v4402_v59 = vpop.f32.mrf.mxu0 }
 0x33a   : > { %v4339_v35 = vpop.f32.mrf.mxu1  ;;  %v6794_v32 = vadd.f32 %v4401_v56, %v4337_v49 }
 0x33b   : > { %v4340_v9 = vadd.f32 %v4339_v35, %v4338_v26  ;;  %v4403_v47 = vpop.f32.mrf.mxu0 }
 0x33c   : > { %v4341_v52 = vpop.f32.mrf.mxu1  ;;  %v4404_v62 = vadd.f32 %v4403_v47, %v4402_v59 }
 0x33d   : > { %v4405_v44 = vpop.f32.mrf.mxu0 }
 0x33e   : > { %v4342_v39 = vpop.f32.mrf.mxu1  ;;  %v6796_v28 = vadd.f32 %v4404_v62, %v4340_v9 }
 0x33f   : > { %v4343_v19 = vadd.f32 %v4342_v39, %v4341_v52  ;;  %v4406_v14 = vpop.f32.mrf.mxu0 }
 0x340   : > { %7233 = vst [vmem:[#allocation54_spill] sm:$0xff] %v6796_v28  ;;  %v4344_v2 = vpop.f32.mrf.mxu1  ;;  %v4407_v4 = vadd.f32 %v4406_v14, %v4405_v44 }
 0x341   : > { %v4408_v20 = vpop.f32.mrf.mxu0 }
 0x342   : > { %v4345_v12 = vpop.f32.mrf.mxu1  ;;  %v6798_v42 = vadd.f32 %v4407_v4, %v4343_v19 }
 0x343   : > { %v4346_v31 = vadd.f32 %v4345_v12, %v4344_v2  ;;  %v4409_v1 = vpop.f32.mrf.mxu0 }
 0x344   : > { %7234 = vst [vmem:[#allocation55_spill] sm:$0xff] %v6798_v42  ;;  %v4347_v11 = vpop.f32.mrf.mxu1  ;;  %v4410_v15 = vadd.f32 %v4409_v1, %v4408_v20 }
 0x345   : > { %v6800_v10 = vpop.f32.mrf.mxu0 }
 0x346   : > { %v4348_v27 = vpop.f32.mrf.mxu1  ;;  %v6802_v51 = vadd.f32 %v4410_v15, %v4346_v31 }
 0x347   : > { %v6804_v33 = vadd.f32 %v4348_v27, %v4347_v11  ;;  %v6806_v53 = vpop.f32.mrf.mxu0 }
 0x348   : > { %7235 = vst [vmem:[#allocation31_spill] sm:$0xff] %v6802_v51  ;;  %v4350_v16 = vpop.f32.mrf.mxu1 }
 0x349   : > { %7236 = vst [vmem:[#allocation32_spill] sm:$0xff] %v6804_v33  ;;  %v6808_v55 = vpop.f32.mrf.mxu0 }
 0x34a   : > { %7237 = vst [vmem:[#allocation33_spill] sm:$0xff] %v6808_v55  ;;  %v4351_v60 = vpop.f32.mrf.mxu1 }
 0x34b   : > { %v6810_v3 = vadd.f32 %v4351_v60, %v4350_v16  ;;  %v6812_v29 = vpop.f32.mrf.mxu0 }
 0x34c   : > { %7239 = vst [vmem:[#allocation45_spill] sm:$0xff] %v6812_v29  ;;  %v4433_v58 = vpop.f32.mrf.mxu1 }
 0x34d   : > { %7238 = vst [vmem:[#allocation36_spill] sm:$0xff] %v6810_v3 }
 0x34e   : > { %v6814_v18 = vpop.f32.mrf.mxu0  ;;  %v4434_v30 = vpop.f32.mrf.mxu1 }
 0x350   : > { %v6816_v57 = vpop.f32.mrf.mxu0  ;;  %v4436_v43 = vpop.f32.mrf.mxu1 }
 0x352   : > { %v6818_v46 = vpop.f32.mrf.mxu0  ;;  %v4437_v48 = vpop.f32.mrf.mxu1 }
 0x354   : > { %v6820_v6 = vpop.f32.mrf.mxu0  ;;  %v4439_v24 = vpop.f32.mrf.mxu1 }
 0x356   : > { %v4503_v22 = vpop.f32.mrf.mxu0  ;;  %v4440_v17 = vpop.f32.mrf.mxu1 }
 0x357   : > { %v4441_v55 = vadd.f32 %v4440_v17, %v4439_v24 }
 0x358   : > { %v4504_v38 = vpop.f32.mrf.mxu0  ;;  %v4442_v13 = vpop.f32.mrf.mxu1 }
 0x35a   : > { %v4506_v50 = vpop.f32.mrf.mxu0  ;;  %v4443_v34 = vpop.f32.mrf.mxu1 }
 0x35c   : > { %v4507_v63 = vpop.f32.mrf.mxu0  ;;  %v4445_v23 = vpop.f32.mrf.mxu1 }
 0x35e   : > { %v6822_v5 = vpop.f32.mrf.mxu0  ;;  %v4446_v36 = vpop.f32.mrf.mxu1 }
 0x360   : > { %v6824_v49 = vpop.f32.mrf.mxu0  ;;  %v6826_v54 = vpop.f32.mrf.mxu1 }
 0x362   : > { %v6828_v26 = vpop.f32.mrf.mxu0  ;;  %v6830_v56 = vpop.f32.mrf.mxu1 }
 0x364   : > { %v6832_v59 = vpop.f32.mrf.mxu0  ;;  %v4451_v35 = vpop.f32.mrf.mxu1 }
 0x366   : > { %v4515_v9 = vpop.f32.mrf.mxu0  ;;  %v4452_v47 = vpop.f32.mrf.mxu1 }
 0x367   : > { %v4453_v8 = vadd.f32 %v4452_v47, %v4451_v35 }
 0x368   : > { %v4516_v52 = vpop.f32.mrf.mxu0  ;;  %v4454_v62 = vpop.f32.mrf.mxu1 }
 0x36a   : > { %v6834_v44 = vpop.f32.mrf.mxu0  ;;  %v4455_v39 = vpop.f32.mrf.mxu1 }
 0x36c   : > { %v6836_v19 = vpop.f32.mrf.mxu0  ;;  %v6838_v14 = vpop.f32.mrf.mxu1 }
 0x36e   : > { %v6840_v2 = vpop.f32.mrf.mxu0  ;;  %v6842_v4 = vpop.f32.mrf.mxu1 }
 0x36f   : > { %7240 = vst [vmem:[#allocation52_spill] sm:$0xff] %v6840_v2 }
 0x370   : > { %v6844_v20 = vpop.f32.mrf.mxu0  ;;  %v6846_v12 = vpop.f32.mrf.mxu1 }
 0x371   : > { %7241 = vst [vmem:[#allocation57_spill] sm:$0xff] %v6844_v20  ;;  %v4435_v20 = vadd.f32 %v4434_v30, %v4433_v58  ;;  %v4499_v58 = vadd.f32 %v6816_v57, %v6814_v18  ;;  %v4456_v18 = vadd.f32 %v4455_v39, %v4454_v62  ;;  %v7252_v57 = vld [vmem:[#allocation37_spill] sm:$0xff] }
 0x372   : > { %v6848_v31 = vpop.f32.mrf.mxu0  ;;  %v6850_v1 = vpop.f32.mrf.mxu1 }
 0x373   : > { %7242 = vst [vmem:[#allocation58_spill] sm:$0xff] %v6848_v31 }
 0x374   : > { %v6852_v11 = vpop.f32.mrf.mxu0  ;;  %v4463_v15 = vpop.f32.mrf.mxu1 }
 0x375   : > { %7243 = vst [vmem:[#allocation59_spill] sm:$0xff] %v6852_v11 }
 0x376   : > { %v6854_v27 = vpop.f32.mrf.mxu0  ;;  %v4464_v16 = vpop.f32.mrf.mxu1 }
 0x377   : > { %7244 = vst [vmem:[#allocation60_spill] sm:$0xff] %v6854_v27 }
 0x378   : > { %v6856_v60 = vpop.f32.mrf.mxu1  ;;  %v6858_v51 = vpop.f32.mrf.mxu0 }
 0x379   : > { %7245 = vst [vmem:[#allocation61_spill] sm:$0xff] %v6858_v51 }
 0x37a   : > { %v6860_v42 = vpop.f32.mrf.mxu1  ;;  %v6864_v33 = vpop.f32.mrf.mxu0 }
 0x37b   : > { %7247 = vst [vmem:[#allocation63_spill] sm:$0xff] %v6864_v33  ;;  %v4444_v33 = vadd.f32 %v4443_v34, %v4442_v13  ;;  %v4508_v34 = vadd.f32 %v4507_v63, %v4506_v50  ;;  %v4511_v63 = vadd.f32 %v6824_v49, %v6822_v5  ;;  %v4459_v5 = vadd.f32 %v6842_v4, %v6838_v14  ;;  %v7255_v49 = vld [vmem:[#allocation35_spill] sm:$0xff] }
 0x37c   : > { %v6862_v3 = vpop.f32.mrf.mxu1  ;;  %v6870_v29 = vpop.f32.mrf.mxu0  ;;  %v4413_v4 = vadd.f32 %v6806_v53, %v6800_v10 }
 0x37d   : > { %7246 = vst [vmem:[#allocation62_spill] sm:$0xff] %v6862_v3  ;;  %7250 = vst [vmem:[#allocation66_spill] sm:$0xff] %v6870_v29  ;;  %v2832_v3 = vadd.f32 %v4441_v55, %v6778_v40  ;;  %v4505_v29 = vadd.f32 %v4504_v38, %v4503_v22  ;;  %v2835_v30 = vadd.f32 %v4444_v33, %v6780_v61 }
 0x37e   : > { %v6866_v45 = vpop.f32.mrf.mxu1  ;;  %v6876_v2 = vpop.f32.mrf.mxu0  ;;  %v4447_v40 = vadd.f32 %v4446_v36, %v4445_v23  ;;  %v2848_v22 = vadd.f32 %v4453_v8, %v6786_v41  ;;  %v7253_v41 = vld [vmem:[#allocation34_spill] sm:$0xff] }
 0x37f   : > { %7248 = vst [vmem:[#allocation64_spill] sm:$0xff] %v6866_v45  ;;  %v4438_v45 = vadd.f32 %v4437_v48, %v4436_v43  ;;  %v2929_v17 = vadd.f32 %v4505_v29, %v2832_v3  ;;  %v4502_v48 = vadd.f32 %v6820_v6, %v6818_v46  ;;  %v2932_v3 = vadd.f32 %v4508_v34, %v2835_v30 }
 0x380   : > { %v6868_v31 = vpop.f32.mrf.mxu1  ;;  %v2840_v29 = vadd.f32 %v4447_v40, %v6782_v21  ;;  %v7259_v34 = vld [vmem:[#allocation61_spill] sm:$0xff] }
 0x381   : > { %7249 = vst [vmem:[#allocation65_spill] sm:$0xff] %v6868_v31  ;;  %v2824_v31 = vadd.f32 %v4435_v20, %v6774_v0  ;;  %v2827_v13 = vadd.f32 %v4438_v45, %v6776_v7  ;;  %v4450_v7 = vadd.f32 %v6830_v56, %v6826_v54  ;;  %v4517_v45 = vadd.f32 %v4516_v52, %v4515_v9  ;;  %v7254_v9 = vld [vmem:[#allocation38_spill] sm:$0xff] }
 0x382   : > { %v6872_v11 = vpop.f32.mrf.mxu1  ;;  %v2851_v54 = vadd.f32 %v4456_v18, %v6788_v25  ;;  %v4465_v56 = vadd.f32 %v4464_v16, %v4463_v15  ;;  %v2937_v20 = vadd.f32 %v4511_v63, %v2840_v29  ;;  %v4514_v15 = vadd.f32 %v6832_v59, %v6828_v26 }
 0x383   : > { %7251 = vst [vmem:[#allocation67_spill] sm:$0xff] %v6872_v11  ;;  %v6884_v11 = vpop.f32.mrf.mxu0  ;;  %v2921_v43 = vadd.f32 %v4499_v58, %v2824_v31  ;;  %v2924_v6 = vadd.f32 %v4502_v48, %v2827_v13  ;;  %v2945_v36 = vadd.f32 %v4517_v45, %v2848_v22  ;;  %v2843_v62 = vadd.f32 %v4450_v7, %v6784_v37  ;;  %v7257_v13 = vld [vmem:[#allocation53_spill] sm:$0xff]  ;;  %v7261_v22 = vld [vmem:[#allocation52_spill] sm:$0xff] }
 0x384   : > { %v6874_v28 = vpop.f32.mrf.mxu1  ;;  %v4520_v31 = vadd.f32 %v6836_v19, %v6834_v44  ;;  %v4468_v16 = vadd.f32 %v6860_v42, %v6856_v60  ;;  %v7256_v44 = vld [vmem:[#allocation41_spill] sm:$0xff]  ;;  %v2856_v42 = vadd.f32 %v4459_v5, %v7257_v13  ;;  %v7258_v60 = vld [vmem:[#allocation60_spill] sm:$0xff] }
 0x385   : > { %v6896_v38 = vpop.f32.mrf.mxu0  ;;  %v2940_v59 = vadd.f32 %v4514_v15, %v2843_v62  ;;  %v7265_v7 = vld [vmem:[#allocation33_spill] sm:$0xff] }
 0x386   : > { %v6878_v51 = vpop.f32.mrf.mxu1  ;;  %v2948_v14 = vadd.f32 %v4520_v31, %v2851_v54  ;;  %v7266_v45 = vld [vmem:[#allocation45_spill] sm:$0xff] }
 0x387   : > { %v6908_v23 = vpop.f32.mrf.mxu0 }
 0x388   : > { %v6881_v27 = vpop.f32.mrf.mxu1 }
 0x389   : > { %v4539_v37 = vpop.f32.mrf.mxu0 }
 0x38a   : > { %v6886_v24 = vpop.f32.mrf.mxu1 }
 0x38b   : > { %v4540_v53 = vpop.f32.mrf.mxu0  ;;  %v4480_v15 = vadd.f32 %v6886_v24, %v6881_v27 }
 0x38c   : > { %v4615_v55 = vpop.f32.mrf.mxu1 }
 0x38d   : > { %v3026_v0 = vadd.f32 %v4615_v55, %v2929_v17  ;;  %v2864_v17 = vadd.f32 %v4465_v56, %v6794_v32  ;;  %v4462_v55 = vadd.f32 %v6850_v1, %v6846_v12  ;;  %v7260_v32 = vld [vmem:[#allocation39_spill] sm:$0xff]  ;;  %v4477_v12 = vadd.f32 %v6878_v51, %v6874_v28  ;;  %v7264_v1 = vld [vmem:[#allocation42_spill] sm:$0xff]  ;;  %v7273_v51 = vld [vmem:[#allocation40_spill] sm:$0xff]  ;;  %v4542_v5 = vpop.f32.mrf.mxu0 }
 0x38e   : > { %v3017_v35 = vpop.f32.mrf.mxu1 }
 0x38f   : > { %v3082_v61 = vadd.f32 %v3026_v0, %v7252_v57  ;;  %v3018_v33 = vadd.f32 %v3017_v35, %v2921_v43  ;;  %v4529_v0 = vadd.f32 %v7259_v34, %v7258_v60  ;;  %v7262_v35 = vld [vmem:[#allocation57_spill] sm:$0xff]  ;;  %v7263_v57 = vld [vmem:[#allocation54_spill] sm:$0xff]  ;;  %v7282_v60 = vld [vmem:[#allocation43_spill] sm:$0xff]  ;;  %v4535_v34 = vadd.f32 %v6884_v11, %v6876_v2 }
 0x390   : > { %v4616_v50 = vpop.f32.mrf.mxu1  ;;  %v4523_v18 = vadd.f32 %v7262_v35, %v7261_v22  ;;  %v2867_v10 = vadd.f32 %v4468_v16, %v7263_v57  ;;  %v7276_v16 = vld [vmem:[#allocation46_spill] sm:$0xff]  ;;  %v7285_v2 = vld [vmem:[#allocation44_spill] sm:$0xff] }
 0x391   : > { %3098 = vst [vmem:[%s6902_s1 + $0x10] sm:$0xff] %v3082_v61  ;;  %v3080_v8 = vadd.f32 %v3018_v33, %v7253_v41  ;;  %v3029_v46 = vadd.f32 %v4616_v50, %v2932_v3  ;;  %v2961_v29 = vadd.f32 %v4529_v0, %v2864_v17  ;;  %v4416_v50 = vadd.f32 %v7266_v45, %v7265_v7  ;;  %v7267_v41 = vld [vmem:[#allocation56_spill] sm:$0xff]  ;;  %v4543_v0 = vpop.f32.mrf.mxu0 }
 0x392   : > { %v3020_v21 = vpop.f32.mrf.mxu1  ;;  %v2953_v62 = vadd.f32 %v4523_v18, %v2856_v42  ;;  %v4541_v42 = vadd.f32 %v4540_v53, %v4539_v37  ;;  %v7284_v37 = vld [vmem:[#allocation31_spill] sm:$0xff] }
 0x393   : > { %3096 = vst [vmem:[%s6902_s1] sm:$0xff] %v3080_v8  ;;  %v3083_v47 = vadd.f32 %v3029_v46, %v7254_v9  ;;  %v3021_v52 = vadd.f32 %v3020_v21, %v2924_v6  ;;  %v2859_v8 = vadd.f32 %v4462_v55, %v7267_v41  ;;  %v7268_v46 = vld [vmem:[#allocation63_spill] sm:$0xff]  ;;  %v7269_v6 = vld [vmem:[#allocation66_spill] sm:$0xff]  ;;  %v7272_v9 = vld [vmem:[#allocation32_spill] sm:$0xff] }
 0x394   : > { %v4619_v39 = vpop.f32.mrf.mxu1  ;;  %v4532_v63 = vadd.f32 %v7269_v6, %v7268_v46  ;;  %v7270_v21 = vld [vmem:[#allocation62_spill] sm:$0xff]  ;;  %v2783_v28 = vadd.f32 %v4413_v4, %v7272_v9  ;;  %v7287_v41 = vld [vmem:[#allocation48_spill] sm:$0xff] }
 0x395   : > { %3099 = vst [vmem:[%s6902_s1 + $0x18] sm:$0xff] %v3083_v47  ;;  %v3081_v58 = vadd.f32 %v3021_v52, %v7255_v49  ;;  %v3042_v25 = vadd.f32 %v4619_v39, %v2945_v36  ;;  %v7271_v36 = vld [vmem:[#allocation64_spill] sm:$0xff]  ;;  %v7274_v39 = vld [vmem:[#allocation58_spill] sm:$0xff] }
 0x396   : > { %v3033_v30 = vpop.f32.mrf.mxu1  ;;  %v4471_v54 = vadd.f32 %v7271_v36, %v7270_v21  ;;  %v7289_v36 = vld [vmem:[#allocation49_spill] sm:$0xff] }
 0x397   : > { %3097 = vst [vmem:[%s6902_s1 + $0x8] sm:$0xff] %v3081_v58  ;;  %v3086_v19 = vadd.f32 %v3042_v25, %v7256_v44  ;;  %v3034_v40 = vadd.f32 %v3033_v30, %v2937_v20  ;;  %v7275_v20 = vld [vmem:[#allocation59_spill] sm:$0xff]  ;;  %v2964_v58 = vadd.f32 %v4532_v63, %v2867_v10  ;;  %v2880_v25 = vadd.f32 %v4477_v12, %v2783_v28  ;;  %v7277_v44 = vld [vmem:[#allocation36_spill] sm:$0xff] }
 0x398   : > { %v4620_v26 = vpop.f32.mrf.mxu1  ;;  %v4526_v31 = vadd.f32 %v7275_v20, %v7274_v39 }
 0x399   : > { %3102 = vst [vmem:[%s6902_s1 + $0x30] sm:$0xff] %v3086_v19  ;;  %v3084_v43 = vadd.f32 %v3034_v40, %v7260_v32  ;;  %v3045_v48 = vadd.f32 %v4620_v26, %v2948_v14  ;;  %v2786_v19 = vadd.f32 %v4416_v50, %v7277_v44  ;;  %v7278_v40 = vld [vmem:[#allocation55_spill] sm:$0xff]  ;;  %v7279_v26 = vld [vmem:[#allocation65_spill] sm:$0xff]  ;;  %v2977_v18 = vadd.f32 %v4541_v42, %v2880_v25 }
 0x39a   : > { %v3036_v61 = vpop.f32.mrf.mxu1  ;;  %v2872_v14 = vadd.f32 %v4471_v54, %v7278_v40  ;;  %v2956_v55 = vadd.f32 %v4526_v31, %v2859_v8 }
 0x39b   : > { %3100 = vst [vmem:[%s6902_s1 + $0x20] sm:$0xff] %v3084_v43  ;;  %v3087_v33 = vadd.f32 %v3045_v48, %v7264_v1  ;;  %v3037_v3 = vadd.f32 %v3036_v61, %v2940_v59  ;;  %v7280_v59 = vld [vmem:[#allocation67_spill] sm:$0xff]  ;;  %v2883_v43 = vadd.f32 %v4480_v15, %v2786_v19  ;;  %v4544_v61 = vadd.f32 %v4543_v0, %v4542_v5 }
 0x39c   : > { %v4623_v56 = vpop.f32.mrf.mxu1  ;;  %v4474_v13 = vadd.f32 %v7280_v59, %v7279_v26  ;;  %v7283_v48 = vld [vmem:[#allocation47_spill] sm:$0xff]  ;;  %v2969_v10 = vadd.f32 %v4535_v34, %v2872_v14 }
 0x39d   : > { %3103 = vst [vmem:[%s6902_s1 + $0x38] sm:$0xff] %v3087_v33  ;;  %v3085_v47 = vadd.f32 %v3037_v3, %v7273_v51  ;;  %v3058_v52 = vadd.f32 %v4623_v56, %v2961_v29  ;;  %v4538_v33 = vadd.f32 %v6908_v23, %v6896_v38  ;;  %v7286_v3 = vld [vmem:[#allocation50_spill] sm:$0xff]  ;;  %v2980_v45 = vadd.f32 %v4544_v61, %v2883_v43  ;;  %v7288_v38 = vld [vmem:[#allocation51_spill] sm:$0xff] }
 0x39e   : > { %v3049_v49 = vpop.f32.mrf.mxu1  ;;  %v2875_v53 = vadd.f32 %v4474_v13, %v7284_v37 }
 0x39f   : > { %3101 = vst [vmem:[%s6902_s1 + $0x28] sm:$0xff] %v3085_v47  ;;  %v3090_v30 = vadd.f32 %v3058_v52, %v7276_v16  ;;  %v3050_v17 = vadd.f32 %v3049_v49, %v2953_v62 }
 0x3a0   : > { %v4624_v4 = vpop.f32.mrf.mxu1  ;;  %v2972_v6 = vadd.f32 %v4538_v33, %v2875_v53 }
 0x3a1   : > { %3106 = vst [vmem:[%s6902_s1 + $0x50] sm:$0xff] %v3090_v30  ;;  %v3088_v27 = vadd.f32 %v3050_v17, %v7282_v60  ;;  %v3061_v24 = vadd.f32 %v4624_v4, %v2964_v58 }
 0x3a2   : > { %v3052_v32 = vpop.f32.mrf.mxu1 }
 0x3a3   : > { %3104 = vst [vmem:[%s6902_s1 + $0x40] sm:$0xff] %v3088_v27  ;;  %v3091_v22 = vadd.f32 %v3061_v24, %v7283_v48  ;;  %v3053_v35 = vadd.f32 %v3052_v32, %v2956_v55 }
 0x3a4   : > { %v4627_v57 = vpop.f32.mrf.mxu1 }
 0x3a5   : > { %3107 = vst [vmem:[%s6902_s1 + $0x58] sm:$0xff] %v3091_v22  ;;  %v3089_v11 = vadd.f32 %v3053_v35, %v7285_v2  ;;  %v3074_v12 = vadd.f32 %v4627_v57, %v2977_v18 }
 0x3a6   : > { %v3065_v1 = vpop.f32.mrf.mxu1 }
 0x3a7   : > { %3105 = vst [vmem:[%s6902_s1 + $0x48] sm:$0xff] %v3089_v11  ;;  %v3094_v29 = vadd.f32 %v3074_v12, %v7286_v3  ;;  %v3066_v7 = vadd.f32 %v3065_v1, %v2969_v10 }
 0x3a8   : > { %v4628_v50 = vpop.f32.mrf.mxu1 }
 0x3a9   : > { %3110 = vst [vmem:[%s6902_s1 + $0x70] sm:$0xff] %v3094_v29  ;;  %v3092_v8 = vadd.f32 %v3066_v7, %v7287_v41  ;;  %v3077_v46 = vadd.f32 %v4628_v50, %v2980_v45 }
 0x3aa   : > { %v3068_v63 = vpop.f32.mrf.mxu1 }
 0x3ab   : > { %3108 = vst [vmem:[%s6902_s1 + $0x60] sm:$0xff] %v3092_v8  ;;  %v3095_v23 = vadd.f32 %v3077_v46, %v7288_v38  ;;  %v3069_v21 = vadd.f32 %v3068_v63, %v2972_v6 }
 0x3ad   : > { %3111 = vst [vmem:[%s6902_s1 + $0x78] sm:$0xff] %v3095_v23  ;;  %v3093_v54 = vadd.f32 %v3069_v21, %v7289_v36 }
 0x3af   : > { %3109 = vst [vmem:[%s6902_s1 + $0x68] sm:$0xff] %v3093_v54 }
 0x3b0   : > { %5108 = shalt.err (!%p5105_p3)
}
 0x3b1   : > { %s5109_s3 = scalar_lea.hbm %s6990_s19, 2048  ;;  %s5113_s4 = scalar_lea.hbm %s7291_s13, 8192 }
 0x3b2   : > { %p5110_p10 = scmp.ne.s32.totalorder %s6990_s19, %s5109_s3  ;;  %p5114_p0 = scmp.lt.s32.totalorder %s6990_s19, %s7291_s13 }
 0x3b3   : > { %p5115_p8 = scmp.lt.s32.totalorder %s5113_s4, %s5109_s3 }
 0x3b4   : > { %p5111_p4 = pnand %p5110_p10, %p7292_p1 }
 0x3b5   : > { %p5116_p6 = por %p5115_p8, %p5114_p0 }
 0x3b6   : > { %p5112_p2 = pneg %p5111_p4 }
 0x3b8   : > { %p5117_p11 = pnand %p5116_p6, %p5112_p2 }
 0x3ba   : > { %5120 = shalt.err (!%p5117_p11)
}
 0x3bb   : > { %s5262_s16 = smov 128   ;;  %s5263_s8 = smov 8  }
 0x3bc   : > { %4643 = dma.vmem_to_hbm [thread:$0]  (%p7292_p1), %s6983_s18, 2048, %s6990_s19, %s3113_s20, %s5262_s16, %s5262_s16, %s5263_s8  }
 0x3bd PF: > { %p4671_p13 = scmp.ge.s32.totalorder %s5251_s6, 2  ;;  %s3144_s22 = sand.u32 1, %s5223_s24  }
 0x3be   : > { %p7293_p9 = scmp.ne.s32.totalorder %s7158_s5, 0  ;;  %s3145_s0 = scalar_lea.sflag [#allocation4], %s3144_s22 }
 0x3c0   : > { %p4663_p12 = pnand %p4671_p13, %p7293_p9 }
 0x3c2   : > { %p4664_p5 = pneg %p4663_p12 }
 0x3c4   : > { %5194 = dma.done.wait (%p4664_p5), %s3145_s0, 2048  }
 0x3c5   : > { %5196 = vsyncadd (%p4664_p5), %s3145_s0, 4294965248  ;;  %s25_s6 = sadd.s32 1, %s5251_s6   ;;  %s7295_s18 = sld [smem:[#allocation18_spill]] }
 0x3c6   : > { %p7021_p7 = scmp.ge.s32.totalorder %s25_s6, 6   ;;  %s7296_s19 = sld [smem:[#allocation19_spill]] }
 0x3c7   : > { %s7297_s21 = sld [smem:[#allocation20_spill]]  ;;  %s7303_s20 = smov %s7325_s28 }
 0x3c8   : > { %s7298_s10 = sld [smem:[#allocation30_spill]]  ;;  %s7304_s22 = smov %s5219_s23 }
 0x3c9   : > { %s7299_s27 = sld [smem:[#allocation23_spill]]  ;;  %s7306_s24 = smov %s5227_s25 }
 0x3ca   : > { %s7300_s5 = sld [smem:[#allocation24_spill]]  ;;  %s7307_s25 = smov %s5231_s26 }
 0x3cb   : > { %s7301_s29 = sld [smem:[#allocation26_spill]]  ;;  %s7308_s26 = smov %s5496_s9 }
 0x3cc   : > { %s7302_s30 = sld [smem:[#allocation27_spill]]  ;;  %24 = sbr.rel (!%p7021_p7) target bundleno = 20 (0x14), region = 117 }
 0x3ce   : > { %s7305_s23 = smov %s7298_s10 }
 0x3d0   : > { %s7309_s28 = smov %s7300_s5 }
 0x3d1   :  { %3150 = vsyncpa [#allocation3], 1 }
 0x3d2   :  { %3152 = vsyncpa [#allocation3 + $0x1], 1 }
 0x3d3   :  { %3153 = vsyncpa [#allocation6], 1 }
 0x3d4   :  { %3155 = vsyncpa [#allocation6 + $0x1], 1 }
 0x3d5   :  { %3156 = vsyncpa [#allocation9], 1 }
 0x3d6   :  { %3157 = vsyncpa [#allocation4], 1 }
 0x3d7   :  { %3159 = vsyncpa [#allocation4 + $0x1], 1 }

</bundles_post_ra>
